<compile_context>
chip_gen: v6e
topology: v6e:2x2x1
jax: 0.10.0
libtpu: 0.0.40
codegen_flags: <defaults>
</compile_context>

<pallas_src>
import jax
import jax.numpy as jnp
from jax.experimental import pallas as pl
from jax.experimental.pallas import tpu as pltpu

# ----------------------------- small synthetic config -----------------------------
SEQ = 8                      # mx_len
BATCH = 2                    # bsz
N = SEQ * BATCH
EMBED = 64                   # embed_size
DMODEL = 2 * EMBED           # d_model of the transformer (second: E -> 2E)
DFF = 4 * EMBED              # feed-forward dim
NHEAD = 8
HEAD_DIM = DMODEL // NHEAD
NLAYERS = 9
MAXLEN = 16                  # positional-embedding rows
BUCKETS = (0, 8, 16, 32, 48)      # adaptive-softmax cutoffs (small synthetic vocab)
DECAY = 4
VOCAB = BUCKETS[-1]
NCLUSTER = len(BUCKETS) - 1       # 4
EMB_DIMS = [EMBED // DECAY ** i for i in range(NCLUSTER)]    # 64, 16, 4, 1
BUCKET_SIZES = [BUCKETS[i + 1] - BUCKETS[i] for i in range(NCLUSTER)]
N_HEAD_COLS = BUCKET_SIZES[0] + NCLUSTER                     # head logit width
LN_EPS = 1e-5
NEG_INF = -1e30
VOCAB_PAD = 128              # lane-dense padded output width


# --------------------------------- kernel helpers ---------------------------------
def _mm_nt(x, w):
    """x @ w.T (contract last dim of both), f32 accumulation."""
    return jax.lax.dot_general(x, w, (((1,), (1,)), ((), ())),
                               preferred_element_type=jnp.float32)


def _bmm(a, b, ca, cb):
    """Batched (leading axis) matmul contracting dims (ca, cb), f32 accumulation."""
    return jax.lax.dot_general(a, b, (((ca,), (cb,)), ((0,), (0,))),
                               preferred_element_type=jnp.float32)


def _log_softmax(z):
    m = jnp.max(z, axis=-1, keepdims=True)
    zs = z - m
    return zs - jnp.log(jnp.sum(jnp.exp(zs), axis=-1, keepdims=True))


def _layernorm(x, w, b):
    mu = jnp.mean(x, axis=-1, keepdims=True)
    xc = x - mu
    var = jnp.mean(xc * xc, axis=-1, keepdims=True)
    return xc * jax.lax.rsqrt(var + LN_EPS) * w + b


# --------------------------------- the fused kernel --------------------------------
def _fused_kernel(emb_ref, sec_w_ref, sec_b_ref,
                  qw_ref, kw_ref, vw_ref, qb_ref, kb_ref, vb_ref,
                  ow_ref, ob_ref, ln1w_ref, ln1b_ref,
                  fw1_ref, fb1_ref, fw2_ref, fb2_ref, ln2w_ref, ln2b_ref,
                  dw_ref, db_ref,
                  p0_ref, wh_ref, bh_ref,
                  p1_ref, t1w_ref, t1b_ref,
                  p2_ref, t2w_ref, t2b_ref,
                  p3_ref, t3w_ref, t3b_ref,
                  o_ref, act_ref):
    l = pl.program_id(0)

    # ---- grid step 0: embedded tokens (+PE) -> `second` linear (E -> 2E) ----
    @pl.when(l == 0)
    def _():
        act_ref[...] = _mm_nt(emb_ref[...], sec_w_ref[...]) + sec_b_ref[...]

    # ---- TransformerEncoderLayer l (post-norm, ReLU FF, eval dropout = id) ----
    x = act_ref[...]                                   # (N, D) f32

    qw = qw_ref[0]; kw = kw_ref[0]; vw = vw_ref[0]     # (H, hd, D) bf16
    qb = qb_ref[0]; kb = kb_ref[0]; vb = vb_ref[0]     # (H, 1, hd) f32
    ow = ow_ref[0]                                     # (H, D, hd) bf16

    # causal mask generated in-kernel (no DMA'd mask input)
    ii = jax.lax.broadcasted_iota(jnp.int32, (SEQ, SEQ), 0)
    jj = jax.lax.broadcasted_iota(jnp.int32, (SEQ, SEQ), 1)
    mask = jnp.where(jj <= ii, 0.0, NEG_INF).astype(jnp.float32)[None]   # (1, S, S)

    scale = 1.0 / (HEAD_DIM ** 0.5)
    attn_rows = []
    for b in range(BATCH):                             # B=2 -> trace-time unroll
        xb = x[b * SEQ:(b + 1) * SEQ, :].astype(jnp.bfloat16)            # (S, D)
        xh = jnp.broadcast_to(xb, (NHEAD, SEQ, DMODEL))                  # (H, S, D)
        q = _bmm(xh, qw, 2, 2) + qb                                      # (H, S, hd)
        k = _bmm(xh, kw, 2, 2) + kb
        v = _bmm(xh, vw, 2, 2) + vb
        s = _bmm(q.astype(jnp.bfloat16), k.astype(jnp.bfloat16), 2, 2) * scale
        s = s + mask                                                     # (H, S, S)
        s = s - jnp.max(s, axis=-1, keepdims=True)
        p = jnp.exp(s)
        p = p * pl.reciprocal(jnp.sum(p, axis=-1, keepdims=True), approx=True)
        ctx = _bmm(p.astype(jnp.bfloat16), v.astype(jnp.bfloat16), 2, 1) # (H, S, hd)
        oh = _bmm(ctx.astype(jnp.bfloat16), ow, 2, 2)                    # (H, S, D)
        attn_rows.append(jnp.sum(oh, axis=0))                            # (S, D)
    attn = jnp.concatenate(attn_rows, axis=0) + ob_ref[0]                # (N, D)

    x1 = _layernorm(x + attn, ln1w_ref[0], ln1b_ref[0])
    h = jnp.maximum(_mm_nt(x1.astype(jnp.bfloat16), fw1_ref[0]) + fb1_ref[0], 0.0)
    ff = _mm_nt(h.astype(jnp.bfloat16), fw2_ref[0]) + fb2_ref[0]
    x2 = _layernorm(x1 + ff, ln2w_ref[0], ln2b_ref[0])
    act_ref[...] = x2

    # ---- last grid step: `down` linear (2E -> E) + AdaptiveLogSoftmax (eval) ----
    @pl.when(l == pl.num_programs(0) - 1)
    def _():
        xs = _mm_nt(x2.astype(jnp.bfloat16), dw_ref[...]) + db_ref[...]   # (N, E) f32

        hid0 = _mm_nt(xs, p0_ref[...])                                    # (N, 64)
        head = _log_softmax(_mm_nt(hid0, wh_ref[...]) + bh_ref[...])      # (N, n0+4)

        o_ref[...] = jnp.zeros_like(o_ref)                                # padded, lane-dense
        o_ref[:, 0:BUCKET_SIZES[0]] = head[:, 0:BUCKET_SIZES[0]]
        lo = BUCKET_SIZES[0]
        tails = ((p1_ref, t1w_ref, t1b_ref, 1),
                 (p2_ref, t2w_ref, t2b_ref, 2),
                 (p3_ref, t3w_ref, t3b_ref, 3))
        for p_r, w_r, b_r, i in tails:
            hid = _mm_nt(xs, p_r[...])
            logit = _mm_nt(hid, w_r[...]) + b_r[...]
            col = N_HEAD_COLS - i          # matches reference's head[:, -i]
            piece = _log_softmax(logit) + head[:, col:col + 1]
            hi = lo + BUCKET_SIZES[i]
            o_ref[:, lo:hi] = piece
            lo = hi


# --------------------------------- wrapper / glue ----------------------------------
def _fused_forward(emb_flat, params):
    bf = lambda a: a.astype(jnp.bfloat16)
    f32 = lambda a: a.astype(jnp.float32)
    L = params['layers']
    st = lambda idx: jnp.stack([lp[idx] for lp in L], axis=0)

    inw, inb = st(0), st(1)                    # (9, 3D, D), (9, 3D)
    oww, obb = st(2), st(3)                    # (9, D, D), (9, D)
    ln1w, ln1b = st(4), st(5)
    fw1, fb1 = st(6), st(7)
    fw2, fb2 = st(8), st(9)
    ln2w, ln2b = st(10), st(11)

    # head-major q/k/v weights: (L, H, hd, D);  out_proj split per head: (L, H, D, hd)
    qw = bf(inw[:, 0:DMODEL].reshape(NLAYERS, NHEAD, HEAD_DIM, DMODEL))
    kw = bf(inw[:, DMODEL:2 * DMODEL].reshape(NLAYERS, NHEAD, HEAD_DIM, DMODEL))
    vw = bf(inw[:, 2 * DMODEL:3 * DMODEL].reshape(NLAYERS, NHEAD, HEAD_DIM, DMODEL))
    qb = f32(inb[:, 0:DMODEL].reshape(NLAYERS, NHEAD, 1, HEAD_DIM))
    kb = f32(inb[:, DMODEL:2 * DMODEL].reshape(NLAYERS, NHEAD, 1, HEAD_DIM))
    vb = f32(inb[:, 2 * DMODEL:3 * DMODEL].reshape(NLAYERS, NHEAD, 1, HEAD_DIM))
    ow = bf(oww.reshape(NLAYERS, DMODEL, NHEAD, HEAD_DIM).transpose(0, 2, 1, 3))
    ob = f32(obb.reshape(NLAYERS, 1, DMODEL))

    # adaptive-softmax head (weight-tied to the embedding tables / projections)
    wh = jnp.concatenate([params['emb_tables'][0], params['cluster_w']], axis=0)
    bh = jnp.concatenate([params['out_bias'][0], params['cluster_b']]).reshape(1, -1)

    args = [
        bf(emb_flat),
        bf(params['second_w']), f32(params['second_b'].reshape(1, DMODEL)),
        qw, kw, vw, qb, kb, vb,
        ow, ob,
        f32(ln1w.reshape(NLAYERS, 1, DMODEL)), f32(ln1b.reshape(NLAYERS, 1, DMODEL)),
        bf(fw1), f32(fb1.reshape(NLAYERS, 1, DFF)),
        bf(fw2), f32(fb2.reshape(NLAYERS, 1, DMODEL)),
        f32(ln2w.reshape(NLAYERS, 1, DMODEL)), f32(ln2b.reshape(NLAYERS, 1, DMODEL)),
        bf(params['down_w']), f32(params['down_b'].reshape(1, EMBED)),
        f32(params['emb_projs'][0]), f32(wh), f32(bh),
        f32(params['emb_projs'][1]), f32(params['emb_tables'][1]),
        f32(params['out_bias'][1].reshape(1, -1)),
        f32(params['emb_projs'][2]), f32(params['emb_tables'][2]),
        f32(params['out_bias'][2].reshape(1, -1)),
        f32(params['emb_projs'][3]), f32(params['emb_tables'][3]),
        f32(params['out_bias'][3].reshape(1, -1)),
    ]

    def cspec(a):                                # constant across the layer grid
        n = a.ndim
        return pl.BlockSpec(a.shape, lambda l: (0,) * n)

    def lspec(a):                                # stacked on a leading layer axis
        n = a.ndim
        return pl.BlockSpec((1,) + a.shape[1:], lambda l: (l,) + (0,) * (n - 1))

    in_specs = ([cspec(a) for a in args[0:3]]
                + [lspec(a) for a in args[3:19]]
                + [cspec(a) for a in args[19:]])

    return pl.pallas_call(
        _fused_kernel,
        out_shape=jax.ShapeDtypeStruct((N, VOCAB_PAD), jnp.float32),
        grid_spec=pltpu.PrefetchScalarGridSpec(
            num_scalar_prefetch=0,
            grid=(NLAYERS,),
            in_specs=in_specs,
            out_specs=pl.BlockSpec((N, VOCAB_PAD), lambda l: (0, 0)),
            scratch_shapes=[pltpu.VMEM((N, DMODEL), jnp.float32)]),
        compiler_params=pltpu.CompilerParams(
            dimension_semantics=("arbitrary",)),
    )(*args)


def transformer_network_forward(tokens, tgt, params):
    # tokens: (mx_len, bsz) int32 — mirrors `mx_len, bsz = x.shape`
    mx_len, bsz = tokens.shape
    tok = tokens.T                                       # x.permute(1, 0) -> (bsz, mx_len)

    # AdaptiveInputEmbedding: bucket tables projected to E once (param-only, plain jnp,
    # hoisted out of the kernel), then a per-token gather (data-dependent glue).
    # TODO(synk): data-dependent token gather left to XLA (scalar-prefetch DMA gather
    #             is not worthwhile at this size).
    table = jnp.concatenate(
        [jnp.dot(t, p) for t, p in zip(params['emb_tables'], params['emb_projs'])],
        axis=0)                                          # (VOCAB, E)
    emb = table[tok] + params['pe'][:mx_len]             # (bsz, mx_len, E); eval dropout = id

    del tgt                                              # eval branch of AdaptiveLogSoftmax
    out_pad = _fused_forward(emb.reshape(bsz * mx_len, EMBED), params)
    return out_pad[:, :VOCAB]                            # drop lane padding


# ----------------------------- deterministic parameters ----------------------------
def init_params(key):
    keys = iter(jax.random.split(key, 128))

    def unif(shape, scale=0.01):
        return jax.random.uniform(next(keys), shape, jnp.float32, -scale, scale)

    def nrm(shape, scale=0.05):
        return jax.random.normal(next(keys), shape, jnp.float32) * scale

    params = {}
    params['pe'] = unif((MAXLEN, EMBED))
    params['emb_tables'] = [nrm((BUCKET_SIZES[i], EMB_DIMS[i])) for i in range(NCLUSTER)]
    params['emb_projs'] = [unif((EMB_DIMS[i], EMBED)) for i in range(NCLUSTER)]
    params['second_w'] = nrm((DMODEL, EMBED))
    params['second_b'] = nrm((DMODEL,))
    layers = []
    for _ in range(NLAYERS):
        layers.append((
            nrm((3 * DMODEL, DMODEL)), nrm((3 * DMODEL,)),                        # in_proj
            nrm((DMODEL, DMODEL)), nrm((DMODEL,)),                                # out_proj
            jnp.ones((DMODEL,), jnp.float32), jnp.zeros((DMODEL,), jnp.float32),  # ln1
            nrm((DFF, DMODEL)), nrm((DFF,)),                                      # linear1
            nrm((DMODEL, DFF)), nrm((DMODEL,)),                                   # linear2
            jnp.ones((DMODEL,), jnp.float32), jnp.zeros((DMODEL,), jnp.float32),  # ln2
        ))
    params['layers'] = layers
    params['down_w'] = nrm((EMBED, DMODEL))
    params['down_b'] = nrm((EMBED,))
    params['cluster_w'] = jnp.zeros((NCLUSTER, EMBED), jnp.float32)
    params['cluster_b'] = jnp.zeros((NCLUSTER,), jnp.float32)
    params['out_bias'] = [nrm((BUCKET_SIZES[i],)) for i in range(NCLUSTER)]
    # weight tying (softmax out_layers.weight / out_projs <- embedding tables / linears)
    # is realized by reusing emb_tables / emb_projs inside the fused kernel.
    return params


if __name__ == "__main__":
    key = jax.random.PRNGKey(0)
    pkey, xkey, tkey = jax.random.split(key, 3)
    params = init_params(pkey)
    tokens = jax.random.randint(xkey, (SEQ, BATCH), 0, VOCAB, dtype=jnp.int32)
    tgt = jax.random.randint(tkey, (SEQ, BATCH), 0, VOCAB, dtype=jnp.int32)  # unused (eval)
    out = transformer_network_forward(tokens, tgt, params)
    out = jax.block_until_ready(out)
    assert out.shape == (SEQ * BATCH, VOCAB)
    assert bool(jnp.all(jnp.isfinite(out)))
    print("KERNEL_OK")
</pallas_src>

<mosaic_0001>
module attributes {stable_mosaic.version = 11 : i64} {
  func.func @_fused_kernel(%arg0: i32, %arg1: memref<16x64xbf16, #tpu.memory_space<vmem>>, %arg2: memref<128x64xbf16, #tpu.memory_space<vmem>>, %arg3: memref<1x128xf32, #tpu.memory_space<vmem>>, %arg4: memref<1x8x16x128xbf16, #tpu.memory_space<vmem>>, %arg5: memref<1x8x16x128xbf16, #tpu.memory_space<vmem>>, %arg6: memref<1x8x16x128xbf16, #tpu.memory_space<vmem>>, %arg7: memref<1x8x1x16xf32, #tpu.memory_space<vmem>>, %arg8: memref<1x8x1x16xf32, #tpu.memory_space<vmem>>, %arg9: memref<1x8x1x16xf32, #tpu.memory_space<vmem>>, %arg10: memref<1x8x128x16xbf16, #tpu.memory_space<vmem>>, %arg11: memref<1x1x128xf32, #tpu.memory_space<vmem>>, %arg12: memref<1x1x128xf32, #tpu.memory_space<vmem>>, %arg13: memref<1x1x128xf32, #tpu.memory_space<vmem>>, %arg14: memref<1x256x128xbf16, #tpu.memory_space<vmem>>, %arg15: memref<1x1x256xf32, #tpu.memory_space<vmem>>, %arg16: memref<1x128x256xbf16, #tpu.memory_space<vmem>>, %arg17: memref<1x1x128xf32, #tpu.memory_space<vmem>>, %arg18: memref<1x1x128xf32, #tpu.memory_space<vmem>>, %arg19: memref<1x1x128xf32, #tpu.memory_space<vmem>>, %arg20: memref<64x128xbf16, #tpu.memory_space<vmem>>, %arg21: memref<1x64xf32, #tpu.memory_space<vmem>>, %arg22: memref<64x64xf32, #tpu.memory_space<vmem>>, %arg23: memref<12x64xf32, #tpu.memory_space<vmem>>, %arg24: memref<1x12xf32, #tpu.memory_space<vmem>>, %arg25: memref<16x64xf32, #tpu.memory_space<vmem>>, %arg26: memref<8x16xf32, #tpu.memory_space<vmem>>, %arg27: memref<1x8xf32, #tpu.memory_space<vmem>>, %arg28: memref<4x64xf32, #tpu.memory_space<vmem>>, %arg29: memref<16x4xf32, #tpu.memory_space<vmem>>, %arg30: memref<1x16xf32, #tpu.memory_space<vmem>>, %arg31: memref<1x64xf32, #tpu.memory_space<vmem>>, %arg32: memref<16x1xf32, #tpu.memory_space<vmem>>, %arg33: memref<1x16xf32, #tpu.memory_space<vmem>>, %arg34: memref<16x128xf32, #tpu.memory_space<vmem>>, %arg35: memref<16x128xf32, #tpu.memory_space<vmem>>) attributes {dimension_semantics = [#tpu.dimension_semantics<arbitrary>], iteration_bounds = array<i64: 9>, scalar_prefetch = 0 : i64, scratch_operands = 1 : i64, tpu.core_type = #tpu.core_type<tc>, window_params = [{pipeline_mode = #tpu.pipeline_mode<synchronous>, transform_indices = @transform_0, window_bounds = array<i64: 16, 64>}, {pipeline_mode = #tpu.pipeline_mode<synchronous>, transform_indices = @transform_1, window_bounds = array<i64: 128, 64>}, {pipeline_mode = #tpu.pipeline_mode<synchronous>, transform_indices = @transform_2, window_bounds = array<i64: 1, 128>}, {transform_indices = @transform_3, window_bounds = array<i64: 1, 8, 16, 128>}, {transform_indices = @transform_4, window_bounds = array<i64: 1, 8, 16, 128>}, {transform_indices = @transform_5, window_bounds = array<i64: 1, 8, 16, 128>}, {transform_indices = @transform_6, window_bounds = array<i64: 1, 8, 1, 16>}, {transform_indices = @transform_7, window_bounds = array<i64: 1, 8, 1, 16>}, {transform_indices = @transform_8, window_bounds = array<i64: 1, 8, 1, 16>}, {transform_indices = @transform_9, window_bounds = array<i64: 1, 8, 128, 16>}, {transform_indices = @transform_10, window_bounds = array<i64: 1, 1, 128>}, {transform_indices = @transform_11, window_bounds = array<i64: 1, 1, 128>}, {transform_indices = @transform_12, window_bounds = array<i64: 1, 1, 128>}, {transform_indices = @transform_13, window_bounds = array<i64: 1, 256, 128>}, {transform_indices = @transform_14, window_bounds = array<i64: 1, 1, 256>}, {transform_indices = @transform_15, window_bounds = array<i64: 1, 128, 256>}, {transform_indices = @transform_16, window_bounds = array<i64: 1, 1, 128>}, {transform_indices = @transform_17, window_bounds = array<i64: 1, 1, 128>}, {transform_indices = @transform_18, window_bounds = array<i64: 1, 1, 128>}, {pipeline_mode = #tpu.pipeline_mode<synchronous>, transform_indices = @transform_19, window_bounds = array<i64: 64, 128>}, {pipeline_mode = #tpu.pipeline_mode<synchronous>, transform_indices = @transform_20, window_bounds = array<i64: 1, 64>}, {pipeline_mode = #tpu.pipeline_mode<synchronous>, transform_indices = @transform_21, window_bounds = array<i64: 64, 64>}, {pipeline_mode = #tpu.pipeline_mode<synchronous>, transform_indices = @transform_22, window_bounds = array<i64: 12, 64>}, {pipeline_mode = #tpu.pipeline_mode<synchronous>, transform_indices = @transform_23, window_bounds = array<i64: 1, 12>}, {pipeline_mode = #tpu.pipeline_mode<synchronous>, transform_indices = @transform_24, window_bounds = array<i64: 16, 64>}, {pipeline_mode = #tpu.pipeline_mode<synchronous>, transform_indices = @transform_25, window_bounds = array<i64: 8, 16>}, {pipeline_mode = #tpu.pipeline_mode<synchronous>, transform_indices = @transform_26, window_bounds = array<i64: 1, 8>}, {pipeline_mode = #tpu.pipeline_mode<synchronous>, transform_indices = @transform_27, window_bounds = array<i64: 4, 64>}, {pipeline_mode = #tpu.pipeline_mode<synchronous>, transform_indices = @transform_28, window_bounds = array<i64: 16, 4>}, {pipeline_mode = #tpu.pipeline_mode<synchronous>, transform_indices = @transform_29, window_bounds = array<i64: 1, 16>}, {pipeline_mode = #tpu.pipeline_mode<synchronous>, transform_indices = @transform_30, window_bounds = array<i64: 1, 64>}, {pipeline_mode = #tpu.pipeline_mode<synchronous>, transform_indices = @transform_31, window_bounds = array<i64: 16, 1>}, {pipeline_mode = #tpu.pipeline_mode<synchronous>, transform_indices = @transform_32, window_bounds = array<i64: 1, 16>}, {pipeline_mode = #tpu.pipeline_mode<synchronous>, transform_indices = @transform_33, window_bounds = array<i64: 16, 128>}]} {
    %c0_i32 = arith.constant 0 : i32
    %0 = arith.cmpi eq, %arg0, %c0_i32 : i32
    %1 = arith.extui %0 : i1 to i32
    %c0_i32_0 = arith.constant 0 : i32
    %2 = arith.cmpi ne, %1, %c0_i32_0 : i32
    scf.if %2 {
      %c0_94 = arith.constant 0 : index
      %c0_95 = arith.constant 0 : index
      %174 = vector.load %arg1[%c0_94, %c0_95] : memref<16x64xbf16, #tpu.memory_space<vmem>>, vector<16x64xbf16>
      %c0_96 = arith.constant 0 : index
      %c0_97 = arith.constant 0 : index
      %175 = vector.load %arg2[%c0_96, %c0_97] : memref<128x64xbf16, #tpu.memory_space<vmem>>, vector<128x64xbf16>
      %cst_98 = arith.constant dense<0.000000e+00> : vector<16x128xf32>
      %176 = tpu.matmul %174, %175, %cst_98 {dimension_numbers = #tpu.dot_dimension_numbers<[1], [1], [0], [0], [0, 0, 1, 0], [], []>} : vector<16x64xbf16>, vector<128x64xbf16>, vector<16x128xf32> -> vector<16x128xf32>
      %c0_99 = arith.constant 0 : index
      %c0_100 = arith.constant 0 : index
      %177 = vector.load %arg3[%c0_99, %c0_100] : memref<1x128xf32, #tpu.memory_space<vmem>>, vector<1x128xf32>
      %178 = vector.broadcast %177 : vector<1x128xf32> to vector<16x128xf32>
      %179 = arith.addf %176, %178 : vector<16x128xf32>
      %c0_101 = arith.constant 0 : index
      %c0_102 = arith.constant 0 : index
      %180 = vector.load %arg35[%c0_101, %c0_102] : memref<16x128xf32, #tpu.memory_space<vmem>>, vector<16x128xf32>
      tpu.vector_store %arg35[%c0_101, %c0_102], %179 {strides = array<i32>} : memref<16x128xf32, #tpu.memory_space<vmem>>, vector<16x128xf32>,
    } else {
    }
    %c0 = arith.constant 0 : index
    %c0_1 = arith.constant 0 : index
    %3 = vector.load %arg35[%c0, %c0_1] : memref<16x128xf32, #tpu.memory_space<vmem>>, vector<16x128xf32>
    %c0_2 = arith.constant 0 : index
    %c0_3 = arith.constant 0 : index
    %c0_4 = arith.constant 0 : index
    %c0_5 = arith.constant 0 : index
    %4 = vector.load %arg4[%c0_2, %c0_3, %c0_4, %c0_5] : memref<1x8x16x128xbf16, #tpu.memory_space<vmem>>, vector<1x8x16x128xbf16>
    %5 = vector.shape_cast %4 : vector<1x8x16x128xbf16> to vector<8x16x128xbf16>
    %c0_6 = arith.constant 0 : index
    %c0_7 = arith.constant 0 : index
    %c0_8 = arith.constant 0 : index
    %c0_9 = arith.constant 0 : index
    %6 = vector.load %arg5[%c0_6, %c0_7, %c0_8, %c0_9] : memref<1x8x16x128xbf16, #tpu.memory_space<vmem>>, vector<1x8x16x128xbf16>
    %7 = vector.shape_cast %6 : vector<1x8x16x128xbf16> to vector<8x16x128xbf16>
    %c0_10 = arith.constant 0 : index
    %c0_11 = arith.constant 0 : index
    %c0_12 = arith.constant 0 : index
    %c0_13 = arith.constant 0 : index
    %8 = vector.load %arg6[%c0_10, %c0_11, %c0_12, %c0_13] : memref<1x8x16x128xbf16, #tpu.memory_space<vmem>>, vector<1x8x16x128xbf16>
    %9 = vector.shape_cast %8 : vector<1x8x16x128xbf16> to vector<8x16x128xbf16>
    %c0_14 = arith.constant 0 : index
    %c0_15 = arith.constant 0 : index
    %c0_16 = arith.constant 0 : index
    %c0_17 = arith.constant 0 : index
    %10 = vector.load %arg7[%c0_14, %c0_15, %c0_16, %c0_17] : memref<1x8x1x16xf32, #tpu.memory_space<vmem>>, vector<1x8x1x16xf32>
    %11 = vector.shape_cast %10 : vector<1x8x1x16xf32> to vector<8x1x16xf32>
    %c0_18 = arith.constant 0 : index
    %c0_19 = arith.constant 0 : index
    %c0_20 = arith.constant 0 : index
    %c0_21 = arith.constant 0 : index
    %12 = vector.load %arg8[%c0_18, %c0_19, %c0_20, %c0_21] : memref<1x8x1x16xf32, #tpu.memory_space<vmem>>, vector<1x8x1x16xf32>
    %13 = vector.shape_cast %12 : vector<1x8x1x16xf32> to vector<8x1x16xf32>
    %c0_22 = arith.constant 0 : index
    %c0_23 = arith.constant 0 : index
    %c0_24 = arith.constant 0 : index
    %c0_25 = arith.constant 0 : index
    %14 = vector.load %arg9[%c0_22, %c0_23, %c0_24, %c0_25] : memref<1x8x1x16xf32, #tpu.memory_space<vmem>>, vector<1x8x1x16xf32>
    %15 = vector.shape_cast %14 : vector<1x8x1x16xf32> to vector<8x1x16xf32>
    %c0_26 = arith.constant 0 : index
    %c0_27 = arith.constant 0 : index
    %c0_28 = arith.constant 0 : index
    %c0_29 = arith.constant 0 : index
    %16 = vector.load %arg10[%c0_26, %c0_27, %c0_28, %c0_29] : memref<1x8x128x16xbf16, #tpu.memory_space<vmem>>, vector<1x8x128x16xbf16>
    %17 = vector.shape_cast %16 : vector<1x8x128x16xbf16> to vector<8x128x16xbf16>
    %18 = tpu.iota {dimensions = array<i32: 0>} : vector<8x8xi32>
    %19 = tpu.iota {dimensions = array<i32: 1>} : vector<8x8xi32>
    %20 = arith.cmpi sle, %19, %18 : vector<8x8xi32>
    %cst = arith.constant 0.000000e+00 : f32
    %cst_30 = arith.constant -1.000000e+30 : f32
    %21 = vector.broadcast %cst : f32 to vector<8x8xf32>
    %22 = vector.broadcast %cst_30 : f32 to vector<8x8xf32>
    %23 = arith.select %20, %21, %22 : vector<8x8xi1>, vector<8x8xf32>
    %24 = vector.shape_cast %23 : vector<8x8xf32> to vector<1x8x8xf32>
    %25 = vector.extract_strided_slice %3 {offsets = [0, 0], sizes = [8, 128], strides = [1, 1]} : vector<16x128xf32> to vector<8x128xf32>
    %26 = arith.truncf %25 : vector<8x128xf32> to vector<8x128xbf16>
    %27 = vector.shape_cast %26 : vector<8x128xbf16> to vector<1x8x128xbf16>
    %28 = vector.broadcast %27 : vector<1x8x128xbf16> to vector<8x8x128xbf16>
    %cst_31 = arith.constant dense<0.000000e+00> : vector<8x8x16xf32>
    %29 = tpu.matmul %28, %5, %cst_31 {dimension_numbers = #tpu.dot_dimension_numbers<[2], [2], [1], [1], [0, 0, 0, 1, 1, 1], [0], [0]>} : vector<8x8x128xbf16>, vector<8x16x128xbf16>, vector<8x8x16xf32> -> vector<8x8x16xf32>
    %30 = vector.broadcast %11 : vector<8x1x16xf32> to vector<8x8x16xf32>
    %31 = arith.addf %29, %30 : vector<8x8x16xf32>
    %cst_32 = arith.constant dense<0.000000e+00> : vector<8x8x16xf32>
    %32 = tpu.matmul %28, %7, %cst_32 {dimension_numbers = #tpu.dot_dimension_numbers<[2], [2], [1], [1], [0, 0, 0, 1, 1, 1], [0], [0]>} : vector<8x8x128xbf16>, vector<8x16x128xbf16>, vector<8x8x16xf32> -> vector<8x8x16xf32>
    %33 = vector.broadcast %13 : vector<8x1x16xf32> to vector<8x8x16xf32>
    %34 = arith.addf %32, %33 : vector<8x8x16xf32>
    %cst_33 = arith.constant dense<0.000000e+00> : vector<8x8x16xf32>
    %35 = tpu.matmul %28, %9, %cst_33 {dimension_numbers = #tpu.dot_dimension_numbers<[2], [2], [1], [1], [0, 0, 0, 1, 1, 1], [0], [0]>} : vector<8x8x128xbf16>, vector<8x16x128xbf16>, vector<8x8x16xf32> -> vector<8x8x16xf32>
    %36 = vector.broadcast %15 : vector<8x1x16xf32> to vector<8x8x16xf32>
    %37 = arith.addf %35, %36 : vector<8x8x16xf32>
    %38 = arith.truncf %31 : vector<8x8x16xf32> to vector<8x8x16xbf16>
    %39 = arith.truncf %34 : vector<8x8x16xf32> to vector<8x8x16xbf16>
    %cst_34 = arith.constant dense<0.000000e+00> : vector<8x8x8xf32>
    %40 = tpu.matmul %38, %39, %cst_34 {dimension_numbers = #tpu.dot_dimension_numbers<[2], [2], [1], [1], [0, 0, 0, 1, 1, 1], [0], [0]>} : vector<8x8x16xbf16>, vector<8x8x16xbf16>, vector<8x8x8xf32> -> vector<8x8x8xf32>
    %cst_35 = arith.constant 2.500000e-01 : f32
    %41 = vector.broadcast %cst_35 : f32 to vector<8x8x8xf32>
    %42 = arith.mulf %40, %41 : vector<8x8x8xf32>
    %43 = vector.broadcast %24 : vector<1x8x8xf32> to vector<8x8x8xf32>
    %44 = arith.addf %42, %43 : vector<8x8x8xf32>
    %cst_36 = arith.constant dense<0xFF800000> : vector<8x8xf32>
    %45 = vector.multi_reduction <maximumf>, %44, %cst_36 [2] : vector<8x8x8xf32> to vector<8x8xf32>
    %46 = vector.shape_cast %45 : vector<8x8xf32> to vector<8x8x1xf32>
    %47 = vector.broadcast %46 : vector<8x8x1xf32> to vector<8x8x8xf32>
    %48 = arith.subf %44, %47 : vector<8x8x8xf32>
    %49 = math.exp %48 : vector<8x8x8xf32>
    %cst_37 = arith.constant dense<0.000000e+00> : vector<8x8xf32>
    %50 = vector.multi_reduction <add>, %49, %cst_37 [2] : vector<8x8x8xf32> to vector<8x8xf32>
    %51 = vector.shape_cast %50 : vector<8x8xf32> to vector<8x8x1xf32>
    %52 = tpu.reciprocal %51 {approx = true} : vector<8x8x1xf32> -> vector<8x8x1xf32>
    %53 = vector.broadcast %52 : vector<8x8x1xf32> to vector<8x8x8xf32>
    %54 = arith.mulf %49, %53 : vector<8x8x8xf32>
    %55 = arith.truncf %54 : vector<8x8x8xf32> to vector<8x8x8xbf16>
    %56 = arith.truncf %37 : vector<8x8x16xf32> to vector<8x8x16xbf16>
    %cst_38 = arith.constant dense<0.000000e+00> : vector<8x8x16xf32>
    %57 = tpu.matmul %55, %56, %cst_38 {dimension_numbers = #tpu.dot_dimension_numbers<[2], [1], [1], [2], [0, 0, 0, 1, 1, 2], [0], [0]>} : vector<8x8x8xbf16>, vector<8x8x16xbf16>, vector<8x8x16xf32> -> vector<8x8x16xf32>
    %58 = arith.truncf %57 : vector<8x8x16xf32> to vector<8x8x16xbf16>
    %cst_39 = arith.constant dense<0.000000e+00> : vector<8x8x128xf32>
    %59 = tpu.matmul %58, %17, %cst_39 {dimension_numbers = #tpu.dot_dimension_numbers<[2], [2], [1], [1], [0, 0, 0, 1, 1, 1], [0], [0]>} : vector<8x8x16xbf16>, vector<8x128x16xbf16>, vector<8x8x128xf32> -> vector<8x8x128xf32>
    %cst_40 = arith.constant dense<0.000000e+00> : vector<8x128xf32>
    %60 = vector.multi_reduction <add>, %59, %cst_40 [0] : vector<8x8x128xf32> to vector<8x128xf32>
    %61 = vector.extract_strided_slice %3 {offsets = [8, 0], sizes = [8, 128], strides = [1, 1]} : vector<16x128xf32> to vector<8x128xf32>
    %62 = arith.truncf %61 : vector<8x128xf32> to vector<8x128xbf16>
    %63 = vector.shape_cast %62 : vector<8x128xbf16> to vector<1x8x128xbf16>
    %64 = vector.broadcast %63 : vector<1x8x128xbf16> to vector<8x8x128xbf16>
    %cst_41 = arith.constant dense<0.000000e+00> : vector<8x8x16xf32>
    %65 = tpu.matmul %64, %5, %cst_41 {dimension_numbers = #tpu.dot_dimension_numbers<[2], [2], [1], [1], [0, 0, 0, 1, 1, 1], [0], [0]>} : vector<8x8x128xbf16>, vector<8x16x128xbf16>, vector<8x8x16xf32> -> vector<8x8x16xf32>
    %66 = vector.broadcast %11 : vector<8x1x16xf32> to vector<8x8x16xf32>
    %67 = arith.addf %65, %66 : vector<8x8x16xf32>
    %cst_42 = arith.constant dense<0.000000e+00> : vector<8x8x16xf32>
    %68 = tpu.matmul %64, %7, %cst_42 {dimension_numbers = #tpu.dot_dimension_numbers<[2], [2], [1], [1], [0, 0, 0, 1, 1, 1], [0], [0]>} : vector<8x8x128xbf16>, vector<8x16x128xbf16>, vector<8x8x16xf32> -> vector<8x8x16xf32>
    %69 = vector.broadcast %13 : vector<8x1x16xf32> to vector<8x8x16xf32>
    %70 = arith.addf %68, %69 : vector<8x8x16xf32>
    %cst_43 = arith.constant dense<0.000000e+00> : vector<8x8x16xf32>
    %71 = tpu.matmul %64, %9, %cst_43 {dimension_numbers = #tpu.dot_dimension_numbers<[2], [2], [1], [1], [0, 0, 0, 1, 1, 1], [0], [0]>} : vector<8x8x128xbf16>, vector<8x16x128xbf16>, vector<8x8x16xf32> -> vector<8x8x16xf32>
    %72 = vector.broadcast %15 : vector<8x1x16xf32> to vector<8x8x16xf32>
    %73 = arith.addf %71, %72 : vector<8x8x16xf32>
    %74 = arith.truncf %67 : vector<8x8x16xf32> to vector<8x8x16xbf16>
    %75 = arith.truncf %70 : vector<8x8x16xf32> to vector<8x8x16xbf16>
    %cst_44 = arith.constant dense<0.000000e+00> : vector<8x8x8xf32>
    %76 = tpu.matmul %74, %75, %cst_44 {dimension_numbers = #tpu.dot_dimension_numbers<[2], [2], [1], [1], [0, 0, 0, 1, 1, 1], [0], [0]>} : vector<8x8x16xbf16>, vector<8x8x16xbf16>, vector<8x8x8xf32> -> vector<8x8x8xf32>
    %cst_45 = arith.constant 2.500000e-01 : f32
    %77 = vector.broadcast %cst_45 : f32 to vector<8x8x8xf32>
    %78 = arith.mulf %76, %77 : vector<8x8x8xf32>
    %79 = vector.broadcast %24 : vector<1x8x8xf32> to vector<8x8x8xf32>
    %80 = arith.addf %78, %79 : vector<8x8x8xf32>
    %cst_46 = arith.constant dense<0xFF800000> : vector<8x8xf32>
    %81 = vector.multi_reduction <maximumf>, %80, %cst_46 [2] : vector<8x8x8xf32> to vector<8x8xf32>
    %82 = vector.shape_cast %81 : vector<8x8xf32> to vector<8x8x1xf32>
    %83 = vector.broadcast %82 : vector<8x8x1xf32> to vector<8x8x8xf32>
    %84 = arith.subf %80, %83 : vector<8x8x8xf32>
    %85 = math.exp %84 : vector<8x8x8xf32>
    %cst_47 = arith.constant dense<0.000000e+00> : vector<8x8xf32>
    %86 = vector.multi_reduction <add>, %85, %cst_47 [2] : vector<8x8x8xf32> to vector<8x8xf32>
    %87 = vector.shape_cast %86 : vector<8x8xf32> to vector<8x8x1xf32>
    %88 = tpu.reciprocal %87 {approx = true} : vector<8x8x1xf32> -> vector<8x8x1xf32>
    %89 = vector.broadcast %88 : vector<8x8x1xf32> to vector<8x8x8xf32>
    %90 = arith.mulf %85, %89 : vector<8x8x8xf32>
    %91 = arith.truncf %90 : vector<8x8x8xf32> to vector<8x8x8xbf16>
    %92 = arith.truncf %73 : vector<8x8x16xf32> to vector<8x8x16xbf16>
    %cst_48 = arith.constant dense<0.000000e+00> : vector<8x8x16xf32>
    %93 = tpu.matmul %91, %92, %cst_48 {dimension_numbers = #tpu.dot_dimension_numbers<[2], [1], [1], [2], [0, 0, 0, 1, 1, 2], [0], [0]>} : vector<8x8x8xbf16>, vector<8x8x16xbf16>, vector<8x8x16xf32> -> vector<8x8x16xf32>
    %94 = arith.truncf %93 : vector<8x8x16xf32> to vector<8x8x16xbf16>
    %cst_49 = arith.constant dense<0.000000e+00> : vector<8x8x128xf32>
    %95 = tpu.matmul %94, %17, %cst_49 {dimension_numbers = #tpu.dot_dimension_numbers<[2], [2], [1], [1], [0, 0, 0, 1, 1, 1], [0], [0]>} : vector<8x8x16xbf16>, vector<8x128x16xbf16>, vector<8x8x128xf32> -> vector<8x8x128xf32>
    %cst_50 = arith.constant dense<0.000000e+00> : vector<8x128xf32>
    %96 = vector.multi_reduction <add>, %95, %cst_50 [0] : vector<8x8x128xf32> to vector<8x128xf32>
    %97 = tpu.concatenate %60, %96 in 0 : vector<8x128xf32>, vector<8x128xf32> -> vector<16x128xf32>
    %c0_51 = arith.constant 0 : index
    %c0_52 = arith.constant 0 : index
    %c0_53 = arith.constant 0 : index
    %98 = vector.load %arg11[%c0_51, %c0_52, %c0_53] : memref<1x1x128xf32, #tpu.memory_space<vmem>>, vector<1x1x128xf32>
    %99 = vector.shape_cast %98 : vector<1x1x128xf32> to vector<1x128xf32>
    %100 = vector.broadcast %99 : vector<1x128xf32> to vector<16x128xf32>
    %101 = arith.addf %97, %100 : vector<16x128xf32>
    %102 = arith.addf %3, %101 : vector<16x128xf32>
    %c0_54 = arith.constant 0 : index
    %c0_55 = arith.constant 0 : index
    %c0_56 = arith.constant 0 : index
    %103 = vector.load %arg12[%c0_54, %c0_55, %c0_56] : memref<1x1x128xf32, #tpu.memory_space<vmem>>, vector<1x1x128xf32>
    %104 = vector.shape_cast %103 : vector<1x1x128xf32> to vector<1x128xf32>
    %c0_57 = arith.constant 0 : index
    %c0_58 = arith.constant 0 : index
    %c0_59 = arith.constant 0 : index
    %105 = vector.load %arg13[%c0_57, %c0_58, %c0_59] : memref<1x1x128xf32, #tpu.memory_space<vmem>>, vector<1x1x128xf32>
    %106 = vector.shape_cast %105 : vector<1x1x128xf32> to vector<1x128xf32>
    %cst_60 = arith.constant dense<0.000000e+00> : vector<16xf32>
    %107 = vector.multi_reduction <add>, %102, %cst_60 [1] : vector<16x128xf32> to vector<16xf32>
    %108 = vector.shape_cast %107 : vector<16xf32> to vector<16x1xf32>
    %cst_61 = arith.constant 1.280000e+02 : f32
    %109 = vector.broadcast %cst_61 : f32 to vector<16x1xf32>
    %110 = arith.divf %108, %109 : vector<16x1xf32>
    %111 = vector.broadcast %110 : vector<16x1xf32> to vector<16x128xf32>
    %112 = arith.subf %102, %111 : vector<16x128xf32>
    %113 = arith.mulf %112, %112 : vector<16x128xf32>
    %cst_62 = arith.constant dense<0.000000e+00> : vector<16xf32>
    %114 = vector.multi_reduction <add>, %113, %cst_62 [1] : vector<16x128xf32> to vector<16xf32>
    %115 = vector.shape_cast %114 : vector<16xf32> to vector<16x1xf32>
    %cst_63 = arith.constant 1.280000e+02 : f32
    %116 = vector.broadcast %cst_63 : f32 to vector<16x1xf32>
    %117 = arith.divf %115, %116 : vector<16x1xf32>
    %cst_64 = arith.constant 9.99999974E-6 : f32
    %118 = vector.broadcast %cst_64 : f32 to vector<16x1xf32>
    %119 = arith.addf %117, %118 : vector<16x1xf32>
    %120 = math.rsqrt %119 : vector<16x1xf32>
    %121 = vector.broadcast %120 : vector<16x1xf32> to vector<16x128xf32>
    %122 = arith.mulf %112, %121 : vector<16x128xf32>
    %123 = vector.broadcast %104 : vector<1x128xf32> to vector<16x128xf32>
    %124 = arith.mulf %122, %123 : vector<16x128xf32>
    %125 = vector.broadcast %106 : vector<1x128xf32> to vector<16x128xf32>
    %126 = arith.addf %124, %125 : vector<16x128xf32>
    %127 = arith.truncf %126 : vector<16x128xf32> to vector<16x128xbf16>
    %c0_65 = arith.constant 0 : index
    %c0_66 = arith.constant 0 : index
    %c0_67 = arith.constant 0 : index
    %128 = vector.load %arg14[%c0_65, %c0_66, %c0_67] : memref<1x256x128xbf16, #tpu.memory_space<vmem>>, vector<1x256x128xbf16>
    %129 = vector.shape_cast %128 : vector<1x256x128xbf16> to vector<256x128xbf16>
    %cst_68 = arith.constant dense<0.000000e+00> : vector<16x256xf32>
    %130 = tpu.matmul %127, %129, %cst_68 {dimension_numbers = #tpu.dot_dimension_numbers<[1], [1], [0], [0], [0, 0, 1, 0], [], []>} : vector<16x128xbf16>, vector<256x128xbf16>, vector<16x256xf32> -> vector<16x256xf32>
    %c0_69 = arith.constant 0 : index
    %c0_70 = arith.constant 0 : index
    %c0_71 = arith.constant 0 : index
    %131 = vector.load %arg15[%c0_69, %c0_70, %c0_71] : memref<1x1x256xf32, #tpu.memory_space<vmem>>, vector<1x1x256xf32>
    %132 = vector.shape_cast %131 : vector<1x1x256xf32> to vector<1x256xf32>
    %133 = vector.broadcast %132 : vector<1x256xf32> to vector<16x256xf32>
    %134 = arith.addf %130, %133 : vector<16x256xf32>
    %cst_72 = arith.constant 0.000000e+00 : f32
    %135 = vector.broadcast %cst_72 : f32 to vector<16x256xf32>
    %136 = arith.maximumf %134, %135 : vector<16x256xf32>
    %137 = arith.truncf %136 : vector<16x256xf32> to vector<16x256xbf16>
    %c0_73 = arith.constant 0 : index
    %c0_74 = arith.constant 0 : index
    %c0_75 = arith.constant 0 : index
    %138 = vector.load %arg16[%c0_73, %c0_74, %c0_75] : memref<1x128x256xbf16, #tpu.memory_space<vmem>>, vector<1x128x256xbf16>
    %139 = vector.shape_cast %138 : vector<1x128x256xbf16> to vector<128x256xbf16>
    %cst_76 = arith.constant dense<0.000000e+00> : vector<16x128xf32>
    %140 = tpu.matmul %137, %139, %cst_76 {dimension_numbers = #tpu.dot_dimension_numbers<[1], [1], [0], [0], [0, 0, 1, 0], [], []>} : vector<16x256xbf16>, vector<128x256xbf16>, vector<16x128xf32> -> vector<16x128xf32>
    %c0_77 = arith.constant 0 : index
    %c0_78 = arith.constant 0 : index
    %c0_79 = arith.constant 0 : index
    %141 = vector.load %arg17[%c0_77, %c0_78, %c0_79] : memref<1x1x128xf32, #tpu.memory_space<vmem>>, vector<1x1x128xf32>
    %142 = vector.shape_cast %141 : vector<1x1x128xf32> to vector<1x128xf32>
    %143 = vector.broadcast %142 : vector<1x128xf32> to vector<16x128xf32>
    %144 = arith.addf %140, %143 : vector<16x128xf32>
    %145 = arith.addf %126, %144 : vector<16x128xf32>
    %c0_80 = arith.constant 0 : index
    %c0_81 = arith.constant 0 : index
    %c0_82 = arith.constant 0 : index
    %146 = vector.load %arg18[%c0_80, %c0_81, %c0_82] : memref<1x1x128xf32, #tpu.memory_space<vmem>>, vector<1x1x128xf32>
    %147 = vector.shape_cast %146 : vector<1x1x128xf32> to vector<1x128xf32>
    %c0_83 = arith.constant 0 : index
    %c0_84 = arith.constant 0 : index
    %c0_85 = arith.constant 0 : index
    %148 = vector.load %arg19[%c0_83, %c0_84, %c0_85] : memref<1x1x128xf32, #tpu.memory_space<vmem>>, vector<1x1x128xf32>
    %149 = vector.shape_cast %148 : vector<1x1x128xf32> to vector<1x128xf32>
    %cst_86 = arith.constant dense<0.000000e+00> : vector<16xf32>
    %150 = vector.multi_reduction <add>, %145, %cst_86 [1] : vector<16x128xf32> to vector<16xf32>
    %151 = vector.shape_cast %150 : vector<16xf32> to vector<16x1xf32>
    %cst_87 = arith.constant 1.280000e+02 : f32
    %152 = vector.broadcast %cst_87 : f32 to vector<16x1xf32>
    %153 = arith.divf %151, %152 : vector<16x1xf32>
    %154 = vector.broadcast %153 : vector<16x1xf32> to vector<16x128xf32>
    %155 = arith.subf %145, %154 : vector<16x128xf32>
    %156 = arith.mulf %155, %155 : vector<16x128xf32>
    %cst_88 = arith.constant dense<0.000000e+00> : vector<16xf32>
    %157 = vector.multi_reduction <add>, %156, %cst_88 [1] : vector<16x128xf32> to vector<16xf32>
    %158 = vector.shape_cast %157 : vector<16xf32> to vector<16x1xf32>
    %cst_89 = arith.constant 1.280000e+02 : f32
    %159 = vector.broadcast %cst_89 : f32 to vector<16x1xf32>
    %160 = arith.divf %158, %159 : vector<16x1xf32>
    %cst_90 = arith.constant 9.99999974E-6 : f32
    %161 = vector.broadcast %cst_90 : f32 to vector<16x1xf32>
    %162 = arith.addf %160, %161 : vector<16x1xf32>
    %163 = math.rsqrt %162 : vector<16x1xf32>
    %164 = vector.broadcast %163 : vector<16x1xf32> to vector<16x128xf32>
    %165 = arith.mulf %155, %164 : vector<16x128xf32>
    %166 = vector.broadcast %147 : vector<1x128xf32> to vector<16x128xf32>
    %167 = arith.mulf %165, %166 : vector<16x128xf32>
    %168 = vector.broadcast %149 : vector<1x128xf32> to vector<16x128xf32>
    %169 = arith.addf %167, %168 : vector<16x128xf32>
    %c0_91 = arith.constant 0 : index
    %c0_92 = arith.constant 0 : index
    %170 = vector.load %arg35[%c0_91, %c0_92] : memref<16x128xf32, #tpu.memory_space<vmem>>, vector<16x128xf32>
    tpu.vector_store %arg35[%c0_91, %c0_92], %169 {strides = array<i32>} : memref<16x128xf32, #tpu.memory_space<vmem>>, vector<16x128xf32>,
    %c8_i32 = arith.constant 8 : i32
    %171 = arith.cmpi eq, %arg0, %c8_i32 : i32
    %172 = arith.extui %171 : i1 to i32
    %c0_i32_93 = arith.constant 0 : i32
    %173 = arith.cmpi ne, %172, %c0_i32_93 : i32
    scf.if %173 {
      %174 = arith.truncf %169 : vector<16x128xf32> to vector<16x128xbf16>
      %c0_94 = arith.constant 0 : index
      %c0_95 = arith.constant 0 : index
      %175 = vector.load %arg20[%c0_94, %c0_95] : memref<64x128xbf16, #tpu.memory_space<vmem>>, vector<64x128xbf16>
      %cst_96 = arith.constant dense<0.000000e+00> : vector<16x64xf32>
      %176 = tpu.matmul %174, %175, %cst_96 {dimension_numbers = #tpu.dot_dimension_numbers<[1], [1], [0], [0], [0, 0, 1, 0], [], []>} : vector<16x128xbf16>, vector<64x128xbf16>, vector<16x64xf32> -> vector<16x64xf32>
      %c0_97 = arith.constant 0 : index
      %c0_98 = arith.constant 0 : index
      %177 = vector.load %arg21[%c0_97, %c0_98] : memref<1x64xf32, #tpu.memory_space<vmem>>, vector<1x64xf32>
      %178 = vector.broadcast %177 : vector<1x64xf32> to vector<16x64xf32>
      %179 = arith.addf %176, %178 : vector<16x64xf32>
      %c0_99 = arith.constant 0 : index
      %c0_100 = arith.constant 0 : index
      %180 = vector.load %arg22[%c0_99, %c0_100] : memref<64x64xf32, #tpu.memory_space<vmem>>, vector<64x64xf32>
      %cst_101 = arith.constant dense<0.000000e+00> : vector<16x64xf32>
      %181 = tpu.matmul %179, %180, %cst_101 {dimension_numbers = #tpu.dot_dimension_numbers<[1], [1], [0], [0], [0, 0, 1, 0], [], []>} : vector<16x64xf32>, vector<64x64xf32>, vector<16x64xf32> -> vector<16x64xf32>
      %c0_102 = arith.constant 0 : index
      %c0_103 = arith.constant 0 : index
      %182 = vector.load %arg23[%c0_102, %c0_103] : memref<12x64xf32, #tpu.memory_space<vmem>>, vector<12x64xf32>
      %cst_104 = arith.constant dense<0.000000e+00> : vector<16x12xf32>
      %183 = tpu.matmul %181, %182, %cst_104 {dimension_numbers = #tpu.dot_dimension_numbers<[1], [1], [0], [0], [0, 0, 1, 0], [], []>} : vector<16x64xf32>, vector<12x64xf32>, vector<16x12xf32> -> vector<16x12xf32>
      %c0_105 = arith.constant 0 : index
      %c0_106 = arith.constant 0 : index
      %184 = vector.load %arg24[%c0_105, %c0_106] : memref<1x12xf32, #tpu.memory_space<vmem>>, vector<1x12xf32>
      %185 = vector.broadcast %184 : vector<1x12xf32> to vector<16x12xf32>
      %186 = arith.addf %183, %185 : vector<16x12xf32>
      %cst_107 = arith.constant dense<0xFF800000> : vector<16xf32>
      %187 = vector.multi_reduction <maximumf>, %186, %cst_107 [1] : vector<16x12xf32> to vector<16xf32>
      %188 = vector.shape_cast %187 : vector<16xf32> to vector<16x1xf32>
      %189 = vector.broadcast %188 : vector<16x1xf32> to vector<16x12xf32>
      %190 = arith.subf %186, %189 : vector<16x12xf32>
      %191 = math.exp %190 : vector<16x12xf32>
      %cst_108 = arith.constant dense<0.000000e+00> : vector<16xf32>
      %192 = vector.multi_reduction <add>, %191, %cst_108 [1] : vector<16x12xf32> to vector<16xf32>
      %193 = vector.shape_cast %192 : vector<16xf32> to vector<16x1xf32>
      %194 = math.log %193 : vector<16x1xf32>
      %195 = vector.broadcast %194 : vector<16x1xf32> to vector<16x12xf32>
      %196 = arith.subf %190, %195 : vector<16x12xf32>
      %cst_109 = arith.constant 0.000000e+00 : f32
      %197 = vector.broadcast %cst_109 : f32 to vector<16x128xf32>
      %c0_110 = arith.constant 0 : index
      %c0_111 = arith.constant 0 : index
      %198 = vector.load %arg34[%c0_110, %c0_111] : memref<16x128xf32, #tpu.memory_space<vmem>>, vector<16x128xf32>
      tpu.vector_store %arg34[%c0_110, %c0_111], %197 {strides = array<i32>} : memref<16x128xf32, #tpu.memory_space<vmem>>, vector<16x128xf32>,
      %199 = vector.extract_strided_slice %196 {offsets = [0, 0], sizes = [16, 8], strides = [1, 1]} : vector<16x12xf32> to vector<16x8xf32>
      %c0_112 = arith.constant 0 : index
      %c0_113 = arith.constant 0 : index
      %200 = vector.load %arg34[%c0_112, %c0_113] : memref<16x128xf32, #tpu.memory_space<vmem>>, vector<16x8xf32>
      tpu.vector_store %arg34[%c0_112, %c0_113], %199 {strides = array<i32>} : memref<16x128xf32, #tpu.memory_space<vmem>>, vector<16x8xf32>,
      %c0_114 = arith.constant 0 : index
      %c0_115 = arith.constant 0 : index
      %201 = vector.load %arg25[%c0_114, %c0_115] : memref<16x64xf32, #tpu.memory_space<vmem>>, vector<16x64xf32>
      %cst_116 = arith.constant dense<0.000000e+00> : vector<16x16xf32>
      %202 = tpu.matmul %179, %201, %cst_116 {dimension_numbers = #tpu.dot_dimension_numbers<[1], [1], [0], [0], [0, 0, 1, 0], [], []>} : vector<16x64xf32>, vector<16x64xf32>, vector<16x16xf32> -> vector<16x16xf32>
      %c0_117 = arith.constant 0 : index
      %c0_118 = arith.constant 0 : index
      %203 = vector.load %arg26[%c0_117, %c0_118] : memref<8x16xf32, #tpu.memory_space<vmem>>, vector<8x16xf32>
      %cst_119 = arith.constant dense<0.000000e+00> : vector<16x8xf32>
      %204 = tpu.matmul %202, %203, %cst_119 {dimension_numbers = #tpu.dot_dimension_numbers<[1], [1], [0], [0], [0, 0, 1, 0], [], []>} : vector<16x16xf32>, vector<8x16xf32>, vector<16x8xf32> -> vector<16x8xf32>
      %c0_120 = arith.constant 0 : index
      %c0_121 = arith.constant 0 : index
      %205 = vector.load %arg27[%c0_120, %c0_121] : memref<1x8xf32, #tpu.memory_space<vmem>>, vector<1x8xf32>
      %206 = vector.broadcast %205 : vector<1x8xf32> to vector<16x8xf32>
      %207 = arith.addf %204, %206 : vector<16x8xf32>
      %cst_122 = arith.constant dense<0xFF800000> : vector<16xf32>
      %208 = vector.multi_reduction <maximumf>, %207, %cst_122 [1] : vector<16x8xf32> to vector<16xf32>
      %209 = vector.shape_cast %208 : vector<16xf32> to vector<16x1xf32>
      %210 = vector.broadcast %209 : vector<16x1xf32> to vector<16x8xf32>
      %211 = arith.subf %207, %210 : vector<16x8xf32>
      %212 = math.exp %211 : vector<16x8xf32>
      %cst_123 = arith.constant dense<0.000000e+00> : vector<16xf32>
      %213 = vector.multi_reduction <add>, %212, %cst_123 [1] : vector<16x8xf32> to vector<16xf32>
      %214 = vector.shape_cast %213 : vector<16xf32> to vector<16x1xf32>
      %215 = math.log %214 : vector<16x1xf32>
      %216 = vector.broadcast %215 : vector<16x1xf32> to vector<16x8xf32>
      %217 = arith.subf %211, %216 : vector<16x8xf32>
      %218 = vector.extract_strided_slice %196 {offsets = [0, 11], sizes = [16, 1], strides = [1, 1]} : vector<16x12xf32> to vector<16x1xf32>
      %219 = vector.broadcast %218 : vector<16x1xf32> to vector<16x8xf32>
      %220 = arith.addf %217, %219 : vector<16x8xf32>
      %c0_124 = arith.constant 0 : index
      %c8 = arith.constant 8 : index
      %221 = vector.load %arg34[%c0_124, %c8] : memref<16x128xf32, #tpu.memory_space<vmem>>, vector<16x8xf32>
      tpu.vector_store %arg34[%c0_124, %c8], %220 {strides = array<i32>} : memref<16x128xf32, #tpu.memory_space<vmem>>, vector<16x8xf32>,
      %c0_125 = arith.constant 0 : index
      %c0_126 = arith.constant 0 : index
      %222 = vector.load %arg28[%c0_125, %c0_126] : memref<4x64xf32, #tpu.memory_space<vmem>>, vector<4x64xf32>
      %cst_127 = arith.constant dense<0.000000e+00> : vector<16x4xf32>
      %223 = tpu.matmul %179, %222, %cst_127 {dimension_numbers = #tpu.dot_dimension_numbers<[1], [1], [0], [0], [0, 0, 1, 0], [], []>} : vector<16x64xf32>, vector<4x64xf32>, vector<16x4xf32> -> vector<16x4xf32>
      %c0_128 = arith.constant 0 : index
      %c0_129 = arith.constant 0 : index
      %224 = vector.load %arg29[%c0_128, %c0_129] : memref<16x4xf32, #tpu.memory_space<vmem>>, vector<16x4xf32>
      %cst_130 = arith.constant dense<0.000000e+00> : vector<16x16xf32>
      %225 = tpu.matmul %223, %224, %cst_130 {dimension_numbers = #tpu.dot_dimension_numbers<[1], [1], [0], [0], [0, 0, 1, 0], [], []>} : vector<16x4xf32>, vector<16x4xf32>, vector<16x16xf32> -> vector<16x16xf32>
      %c0_131 = arith.constant 0 : index
      %c0_132 = arith.constant 0 : index
      %226 = vector.load %arg30[%c0_131, %c0_132] : memref<1x16xf32, #tpu.memory_space<vmem>>, vector<1x16xf32>
      %227 = vector.broadcast %226 : vector<1x16xf32> to vector<16x16xf32>
      %228 = arith.addf %225, %227 : vector<16x16xf32>
      %cst_133 = arith.constant dense<0xFF800000> : vector<16xf32>
      %229 = vector.multi_reduction <maximumf>, %228, %cst_133 [1] : vector<16x16xf32> to vector<16xf32>
      %230 = vector.shape_cast %229 : vector<16xf32> to vector<16x1xf32>
      %231 = vector.broadcast %230 : vector<16x1xf32> to vector<16x16xf32>
      %232 = arith.subf %228, %231 : vector<16x16xf32>
      %233 = math.exp %232 : vector<16x16xf32>
      %cst_134 = arith.constant dense<0.000000e+00> : vector<16xf32>
      %234 = vector.multi_reduction <add>, %233, %cst_134 [1] : vector<16x16xf32> to vector<16xf32>
      %235 = vector.shape_cast %234 : vector<16xf32> to vector<16x1xf32>
      %236 = math.log %235 : vector<16x1xf32>
      %237 = vector.broadcast %236 : vector<16x1xf32> to vector<16x16xf32>
      %238 = arith.subf %232, %237 : vector<16x16xf32>
      %239 = vector.extract_strided_slice %196 {offsets = [0, 10], sizes = [16, 1], strides = [1, 1]} : vector<16x12xf32> to vector<16x1xf32>
      %240 = vector.broadcast %239 : vector<16x1xf32> to vector<16x16xf32>
      %241 = arith.addf %238, %240 : vector<16x16xf32>
      %c0_135 = arith.constant 0 : index
      %c16 = arith.constant 16 : index
      %242 = vector.load %arg34[%c0_135, %c16] : memref<16x128xf32, #tpu.memory_space<vmem>>, vector<16x16xf32>
      tpu.vector_store %arg34[%c0_135, %c16], %241 {strides = array<i32>} : memref<16x128xf32, #tpu.memory_space<vmem>>, vector<16x16xf32>,
      %c0_136 = arith.constant 0 : index
      %c0_137 = arith.constant 0 : index
      %243 = vector.load %arg31[%c0_136, %c0_137] : memref<1x64xf32, #tpu.memory_space<vmem>>, vector<1x64xf32>
      %cst_138 = arith.constant dense<0.000000e+00> : vector<16x1xf32>
      %244 = tpu.matmul %179, %243, %cst_138 {dimension_numbers = #tpu.dot_dimension_numbers<[1], [1], [0], [0], [0, 0, 1, 0], [], []>} : vector<16x64xf32>, vector<1x64xf32>, vector<16x1xf32> -> vector<16x1xf32>
      %c0_139 = arith.constant 0 : index
      %c0_140 = arith.constant 0 : index
      %245 = vector.load %arg32[%c0_139, %c0_140] : memref<16x1xf32, #tpu.memory_space<vmem>>, vector<16x1xf32>
      %cst_141 = arith.constant dense<0.000000e+00> : vector<16x16xf32>
      %246 = tpu.matmul %244, %245, %cst_141 {dimension_numbers = #tpu.dot_dimension_numbers<[1], [1], [0], [0], [0, 0, 1, 0], [], []>} : vector<16x1xf32>, vector<16x1xf32>, vector<16x16xf32> -> vector<16x16xf32>
      %c0_142 = arith.constant 0 : index
      %c0_143 = arith.constant 0 : index
      %247 = vector.load %arg33[%c0_142, %c0_143] : memref<1x16xf32, #tpu.memory_space<vmem>>, vector<1x16xf32>
      %248 = vector.broadcast %247 : vector<1x16xf32> to vector<16x16xf32>
      %249 = arith.addf %246, %248 : vector<16x16xf32>
      %cst_144 = arith.constant dense<0xFF800000> : vector<16xf32>
      %250 = vector.multi_reduction <maximumf>, %249, %cst_144 [1] : vector<16x16xf32> to vector<16xf32>
      %251 = vector.shape_cast %250 : vector<16xf32> to vector<16x1xf32>
      %252 = vector.broadcast %251 : vector<16x1xf32> to vector<16x16xf32>
      %253 = arith.subf %249, %252 : vector<16x16xf32>
      %254 = math.exp %253 : vector<16x16xf32>
      %cst_145 = arith.constant dense<0.000000e+00> : vector<16xf32>
      %255 = vector.multi_reduction <add>, %254, %cst_145 [1] : vector<16x16xf32> to vector<16xf32>
      %256 = vector.shape_cast %255 : vector<16xf32> to vector<16x1xf32>
      %257 = math.log %256 : vector<16x1xf32>
      %258 = vector.broadcast %257 : vector<16x1xf32> to vector<16x16xf32>
      %259 = arith.subf %253, %258 : vector<16x16xf32>
      %260 = vector.extract_strided_slice %196 {offsets = [0, 9], sizes = [16, 1], strides = [1, 1]} : vector<16x12xf32> to vector<16x1xf32>
      %261 = vector.broadcast %260 : vector<16x1xf32> to vector<16x16xf32>
      %262 = arith.addf %259, %261 : vector<16x16xf32>
      %c0_146 = arith.constant 0 : index
      %c32 = arith.constant 32 : index
      %263 = vector.load %arg34[%c0_146, %c32] : memref<16x128xf32, #tpu.memory_space<vmem>>, vector<16x16xf32>
      tpu.vector_store %arg34[%c0_146, %c32], %262 {strides = array<i32>} : memref<16x128xf32, #tpu.memory_space<vmem>>, vector<16x16xf32>,
    } else {
    }
    return
  }
  func.func @transform_0(%arg0: i32) -> (i32, i32) {
    %c0_i32 = arith.constant 0 : i32
    %c0_i32_0 = arith.constant 0 : i32
    %c0_i32_1 = arith.constant 0 : i32
    return %c0_i32, %c0_i32_0 : i32, i32
  }
  func.func @transform_1(%arg0: i32) -> (i32, i32) {
    %c0_i32 = arith.constant 0 : i32
    %c0_i32_0 = arith.constant 0 : i32
    %c0_i32_1 = arith.constant 0 : i32
    return %c0_i32, %c0_i32_0 : i32, i32
  }
  func.func @transform_2(%arg0: i32) -> (i32, i32) {
    %c0_i32 = arith.constant 0 : i32
    %c0_i32_0 = arith.constant 0 : i32
    %c0_i32_1 = arith.constant 0 : i32
    return %c0_i32, %c0_i32_0 : i32, i32
  }
  func.func @transform_3(%arg0: i32) -> (i32, i32, i32, i32) {
    %c0_i32 = arith.constant 0 : i32
    %c0_i32_0 = arith.constant 0 : i32
    %c0_i32_1 = arith.constant 0 : i32
    %c0_i32_2 = arith.constant 0 : i32
    return %arg0, %c0_i32, %c0_i32_0, %c0_i32_1 : i32, i32, i32, i32
  }
  func.func @transform_4(%arg0: i32) -> (i32, i32, i32, i32) {
    %c0_i32 = arith.constant 0 : i32
    %c0_i32_0 = arith.constant 0 : i32
    %c0_i32_1 = arith.constant 0 : i32
    %c0_i32_2 = arith.constant 0 : i32
    return %arg0, %c0_i32, %c0_i32_0, %c0_i32_1 : i32, i32, i32, i32
  }
  func.func @transform_5(%arg0: i32) -> (i32, i32, i32, i32) {
    %c0_i32 = arith.constant 0 : i32
    %c0_i32_0 = arith.constant 0 : i32
    %c0_i32_1 = arith.constant 0 : i32
    %c0_i32_2 = arith.constant 0 : i32
    return %arg0, %c0_i32, %c0_i32_0, %c0_i32_1 : i32, i32, i32, i32
  }
  func.func @transform_6(%arg0: i32) -> (i32, i32, i32, i32) {
    %c0_i32 = arith.constant 0 : i32
    %c0_i32_0 = arith.constant 0 : i32
    %c0_i32_1 = arith.constant 0 : i32
    %c0_i32_2 = arith.constant 0 : i32
    return %arg0, %c0_i32, %c0_i32_0, %c0_i32_1 : i32, i32, i32, i32
  }
  func.func @transform_7(%arg0: i32) -> (i32, i32, i32, i32) {
    %c0_i32 = arith.constant 0 : i32
    %c0_i32_0 = arith.constant 0 : i32
    %c0_i32_1 = arith.constant 0 : i32
    %c0_i32_2 = arith.constant 0 : i32
    return %arg0, %c0_i32, %c0_i32_0, %c0_i32_1 : i32, i32, i32, i32
  }
  func.func @transform_8(%arg0: i32) -> (i32, i32, i32, i32) {
    %c0_i32 = arith.constant 0 : i32
    %c0_i32_0 = arith.constant 0 : i32
    %c0_i32_1 = arith.constant 0 : i32
    %c0_i32_2 = arith.constant 0 : i32
    return %arg0, %c0_i32, %c0_i32_0, %c0_i32_1 : i32, i32, i32, i32
  }
  func.func @transform_9(%arg0: i32) -> (i32, i32, i32, i32) {
    %c0_i32 = arith.constant 0 : i32
    %c0_i32_0 = arith.constant 0 : i32
    %c0_i32_1 = arith.constant 0 : i32
    %c0_i32_2 = arith.constant 0 : i32
    return %arg0, %c0_i32, %c0_i32_0, %c0_i32_1 : i32, i32, i32, i32
  }
  func.func @transform_10(%arg0: i32) -> (i32, i32, i32) {
    %c0_i32 = arith.constant 0 : i32
    %c0_i32_0 = arith.constant 0 : i32
    %c0_i32_1 = arith.constant 0 : i32
    return %arg0, %c0_i32, %c0_i32_0 : i32, i32, i32
  }
  func.func @transform_11(%arg0: i32) -> (i32, i32, i32) {
    %c0_i32 = arith.constant 0 : i32
    %c0_i32_0 = arith.constant 0 : i32
    %c0_i32_1 = arith.constant 0 : i32
    return %arg0, %c0_i32, %c0_i32_0 : i32, i32, i32
  }
  func.func @transform_12(%arg0: i32) -> (i32, i32, i32) {
    %c0_i32 = arith.constant 0 : i32
    %c0_i32_0 = arith.constant 0 : i32
    %c0_i32_1 = arith.constant 0 : i32
    return %arg0, %c0_i32, %c0_i32_0 : i32, i32, i32
  }
  func.func @transform_13(%arg0: i32) -> (i32, i32, i32) {
    %c0_i32 = arith.constant 0 : i32
    %c0_i32_0 = arith.constant 0 : i32
    %c0_i32_1 = arith.constant 0 : i32
    return %arg0, %c0_i32, %c0_i32_0 : i32, i32, i32
  }
  func.func @transform_14(%arg0: i32) -> (i32, i32, i32) {
    %c0_i32 = arith.constant 0 : i32
    %c0_i32_0 = arith.constant 0 : i32
    %c0_i32_1 = arith.constant 0 : i32
    return %arg0, %c0_i32, %c0_i32_0 : i32, i32, i32
  }
  func.func @transform_15(%arg0: i32) -> (i32, i32, i32) {
    %c0_i32 = arith.constant 0 : i32
    %c0_i32_0 = arith.constant 0 : i32
    %c0_i32_1 = arith.constant 0 : i32
    return %arg0, %c0_i32, %c0_i32_0 : i32, i32, i32
  }
  func.func @transform_16(%arg0: i32) -> (i32, i32, i32) {
    %c0_i32 = arith.constant 0 : i32
    %c0_i32_0 = arith.constant 0 : i32
    %c0_i32_1 = arith.constant 0 : i32
    return %arg0, %c0_i32, %c0_i32_0 : i32, i32, i32
  }
  func.func @transform_17(%arg0: i32) -> (i32, i32, i32) {
    %c0_i32 = arith.constant 0 : i32
    %c0_i32_0 = arith.constant 0 : i32
    %c0_i32_1 = arith.constant 0 : i32
    return %arg0, %c0_i32, %c0_i32_0 : i32, i32, i32
  }
  func.func @transform_18(%arg0: i32) -> (i32, i32, i32) {
    %c0_i32 = arith.constant 0 : i32
    %c0_i32_0 = arith.constant 0 : i32
    %c0_i32_1 = arith.constant 0 : i32
    return %arg0, %c0_i32, %c0_i32_0 : i32, i32, i32
  }
  func.func @transform_19(%arg0: i32) -> (i32, i32) {
    %c0_i32 = arith.constant 0 : i32
    %c0_i32_0 = arith.constant 0 : i32
    %c0_i32_1 = arith.constant 0 : i32
    return %c0_i32, %c0_i32_0 : i32, i32
  }
  func.func @transform_20(%arg0: i32) -> (i32, i32) {
    %c0_i32 = arith.constant 0 : i32
    %c0_i32_0 = arith.constant 0 : i32
    %c0_i32_1 = arith.constant 0 : i32
    return %c0_i32, %c0_i32_0 : i32, i32
  }
  func.func @transform_21(%arg0: i32) -> (i32, i32) {
    %c0_i32 = arith.constant 0 : i32
    %c0_i32_0 = arith.constant 0 : i32
    %c0_i32_1 = arith.constant 0 : i32
    return %c0_i32, %c0_i32_0 : i32, i32
  }
  func.func @transform_22(%arg0: i32) -> (i32, i32) {
    %c0_i32 = arith.constant 0 : i32
    %c0_i32_0 = arith.constant 0 : i32
    %c0_i32_1 = arith.constant 0 : i32
    return %c0_i32, %c0_i32_0 : i32, i32
  }
  func.func @transform_23(%arg0: i32) -> (i32, i32) {
    %c0_i32 = arith.constant 0 : i32
    %c0_i32_0 = arith.constant 0 : i32
    %c0_i32_1 = arith.constant 0 : i32
    return %c0_i32, %c0_i32_0 : i32, i32
  }
  func.func @transform_24(%arg0: i32) -> (i32, i32) {
    %c0_i32 = arith.constant 0 : i32
    %c0_i32_0 = arith.constant 0 : i32
    %c0_i32_1 = arith.constant 0 : i32
    return %c0_i32, %c0_i32_0 : i32, i32
  }
  func.func @transform_25(%arg0: i32) -> (i32, i32) {
    %c0_i32 = arith.constant 0 : i32
    %c0_i32_0 = arith.constant 0 : i32
    %c0_i32_1 = arith.constant 0 : i32
    return %c0_i32, %c0_i32_0 : i32, i32
  }
  func.func @transform_26(%arg0: i32) -> (i32, i32) {
    %c0_i32 = arith.constant 0 : i32
    %c0_i32_0 = arith.constant 0 : i32
    %c0_i32_1 = arith.constant 0 : i32
    return %c0_i32, %c0_i32_0 : i32, i32
  }
  func.func @transform_27(%arg0: i32) -> (i32, i32) {
    %c0_i32 = arith.constant 0 : i32
    %c0_i32_0 = arith.constant 0 : i32
    %c0_i32_1 = arith.constant 0 : i32
    return %c0_i32, %c0_i32_0 : i32, i32
  }
  func.func @transform_28(%arg0: i32) -> (i32, i32) {
    %c0_i32 = arith.constant 0 : i32
    %c0_i32_0 = arith.constant 0 : i32
    %c0_i32_1 = arith.constant 0 : i32
    return %c0_i32, %c0_i32_0 : i32, i32
  }
  func.func @transform_29(%arg0: i32) -> (i32, i32) {
    %c0_i32 = arith.constant 0 : i32
    %c0_i32_0 = arith.constant 0 : i32
    %c0_i32_1 = arith.constant 0 : i32
    return %c0_i32, %c0_i32_0 : i32, i32
  }
  func.func @transform_30(%arg0: i32) -> (i32, i32) {
    %c0_i32 = arith.constant 0 : i32
    %c0_i32_0 = arith.constant 0 : i32
    %c0_i32_1 = arith.constant 0 : i32
    return %c0_i32, %c0_i32_0 : i32, i32
  }
  func.func @transform_31(%arg0: i32) -> (i32, i32) {
    %c0_i32 = arith.constant 0 : i32
    %c0_i32_0 = arith.constant 0 : i32
    %c0_i32_1 = arith.constant 0 : i32
    return %c0_i32, %c0_i32_0 : i32, i32
  }
  func.func @transform_32(%arg0: i32) -> (i32, i32) {
    %c0_i32 = arith.constant 0 : i32
    %c0_i32_0 = arith.constant 0 : i32
    %c0_i32_1 = arith.constant 0 : i32
    return %c0_i32, %c0_i32_0 : i32, i32
  }
  func.func @transform_33(%arg0: i32) -> (i32, i32) {
    %c0_i32 = arith.constant 0 : i32
    %c0_i32_0 = arith.constant 0 : i32
    %c0_i32_1 = arith.constant 0 : i32
    return %c0_i32, %c0_i32_0 : i32, i32
  }
}

</mosaic_0001>

<bundles_post_ra>
// kernel: tpu_custom_call.1
= control target key start
LH: loop header
LB: loop body
LE: loop exit
PB: predicated region body
PF: predicated region fallthrough
CT: control target
= control target key end

     0   :  { %s10330_s6 = smov 1   ;;  %s10331_s10 = smov 2   ;;  %s12014_s0 = inlined_call_operand.smem [shape: u32[34], index: -1, kind: input, shape index: {}] }
   0x1   :  { %s10387_s5 = sld [smem:[%s12014_s0]]   ;;  %s10332_s14 = smov 3  }
   0x2   :  { %s10392_s9 = sld [smem:[%s12014_s0 + %s10330_s6]]   ;;  %s10333_s18 = smov 4  }
   0x3   :  { %s10397_s13 = sld [smem:[%s12014_s0 + %s10331_s10]]   ;;  %s10334_s22 = smov 5  }
   0x4   :  { %s10402_s17 = sld [smem:[%s12014_s0 + %s10332_s14]]   ;;  %s10335_s26 = smov 6  }
   0x5   :  { %s10407_s21 = sld [smem:[%s12014_s0 + %s10333_s18]]   ;;  %s10336_s30 = smov 7  }
   0x6   :  { %s10412_s25 = sld [smem:[%s12014_s0 + %s10334_s22]]   ;;  %s10337_s4 = smov 8  }
   0x7   :  { %12063 = sst [smem:[#allocation6_spill]] %s10387_s5  ;;  %s10338_s10 = smov 9  }
   0x8   :  { %12064 = sst [smem:[#allocation7_spill]] %s10392_s9  ;;  %s10339_s15 = smov 10  }
   0x9   :  { %12065 = sst [smem:[#allocation8_spill]] %s10397_s13  ;;  %s10340_s20 = smov 11  }
   0xa   :  { %12066 = sst [smem:[#allocation9_spill]] %s10402_s17  ;;  %s10342_s1 = smov 13  }
   0xb   :  { %12067 = sst [smem:[#allocation10_spill]] %s10407_s21  ;;  %s10343_s7 = smov 14  }
   0xc   :  { %12068 = sst [smem:[#allocation11_spill]] %s10412_s25  ;;  %s10345_s22 = smov 16  }
   0xd   :  { %s10417_s29 = sld [smem:[%s12014_s0 + %s10335_s26]]   ;;  %s10341_s26 = smov 12  }
   0xe   :  { %s10422_s3 = sld [smem:[%s12014_s0 + %s10336_s30]]   ;;  %s10346_s28 = smov 17  }
   0xf   :  { %s10427_s8 = sld [smem:[%s12014_s0 + %s10337_s4]]  }
  0x10   :  { %s10432_s14 = sld [smem:[%s12014_s0 + %s10338_s10]]  }
  0x11   :  { %s10437_s19 = sld [smem:[%s12014_s0 + %s10339_s15]]   ;;  %s10344_s15 = smov 15  }
  0x12   :  { %s10442_s24 = sld [smem:[%s12014_s0 + %s10340_s20]]  }
  0x13   :  { %12069 = sst [smem:[#allocation12_spill]] %s10417_s29 }
  0x14   :  { %12070 = sst [smem:[#allocation13_spill]] %s10422_s3 }
  0x15   :  { %s10447_s30 = sld [smem:[%s12014_s0 + %s10341_s26]]  }
  0x16   :  { %s10452_s6 = sld [smem:[%s12014_s0 + %s10342_s1]]  }
  0x17   :  { %s10457_s12 = sld [smem:[%s12014_s0 + %s10343_s7]]   ;;  %s10347_s7 = smov 18  }
  0x18   :  { %s10462_s20 = sld [smem:[%s12014_s0 + %s10344_s15]]   ;;  %s10348_s15 = smov 19  }
  0x19   :  { %s10467_s27 = sld [smem:[%s12014_s0 + %s10345_s22]]   ;;  %s10349_s22 = smov 20  }
  0x1a   :  { %s10472_s4 = sld [smem:[%s12014_s0 + %s10346_s28]]   ;;  %s10350_s28 = smov 21  }
  0x1b   :  { %s10477_s13 = sld [smem:[%s12014_s0 + %s10347_s7]]   ;;  %s10351_s7 = smov 22  }
  0x1c   :  { %s10482_s5 = sld [smem:[%s12014_s0 + %s10348_s15]]   ;;  %s10352_s15 = smov 23  }
  0x1d   :  { %s10487_s9 = sld [smem:[%s12014_s0 + %s10349_s22]]   ;;  %s10353_s22 = smov 24  }
  0x20   :  { %12071 = sst [smem:[#allocation14_spill]] %s10472_s4 }
  0x21   :  { %12072 = sst [smem:[#allocation15_spill]] %s10477_s13 }
  0x22   :  { %12073 = sst [smem:[#allocation16_spill]] %s10482_s5 }
  0x23   :  { %12074 = sst [smem:[#allocation17_spill]] %s10487_s9 }
  0x24   :  { %s10492_s4 = sld [smem:[%s12014_s0 + %s10350_s28]]   ;;  %s10354_s28 = smov 25  }
  0x25   :  { %s10497_s13 = sld [smem:[%s12014_s0 + %s10351_s7]]   ;;  %s10355_s7 = smov 26  }
  0x26   :  { %s10502_s5 = sld [smem:[%s12014_s0 + %s10352_s15]]   ;;  %s10356_s15 = smov 27  }
  0x27   :  { %s10507_s9 = sld [smem:[%s12014_s0 + %s10353_s22]]   ;;  %s10357_s22 = smov 28  }
  0x2a   :  { %12075 = sst [smem:[#allocation18_spill]] %s10492_s4 }
  0x2b   :  { %12076 = sst [smem:[#allocation19_spill]] %s10497_s13 }
  0x2c   :  { %12077 = sst [smem:[#allocation20_spill]] %s10502_s5 }
  0x2d   :  { %12078 = sst [smem:[#allocation21_spill]] %s10507_s9 }
  0x2e   :  { %s10512_s4 = sld [smem:[%s12014_s0 + %s10354_s28]]   ;;  %s10358_s28 = smov 29  }
  0x2f   :  { %s10517_s13 = sld [smem:[%s12014_s0 + %s10355_s7]]   ;;  %s10359_s7 = smov 30  }
  0x30   :  { %s10522_s5 = sld [smem:[%s12014_s0 + %s10356_s15]]   ;;  %s10360_s15 = smov 31  }
  0x31   :  { %s10527_s9 = sld [smem:[%s12014_s0 + %s10357_s22]]   ;;  %s10361_s22 = smov 32  }
  0x34   :  { %12079 = sst [smem:[#allocation22_spill]] %s10512_s4 }
  0x35   :  { %12080 = sst [smem:[#allocation23_spill]] %s10517_s13 }
  0x36   :  { %12081 = sst [smem:[#allocation24_spill]] %s10522_s5 }
  0x37   :  { %12082 = sst [smem:[#allocation25_spill]] %s10527_s9 }
  0x38   :  { %s10532_s4 = sld [smem:[%s12014_s0 + %s10358_s28]]   ;;  %s10362_s28 = smov 33  }
  0x39   :  { %s10537_s13 = sld [smem:[%s12014_s0 + %s10359_s7]]  }
  0x3a   :  { %s10542_s5 = sld [smem:[%s12014_s0 + %s10360_s15]]  }
  0x3b   :  { %s10547_s9 = sld [smem:[%s12014_s0 + %s10361_s22]]  }
  0x3e   :  { %12083 = sst [smem:[#allocation26_spill]] %s10532_s4 }
  0x3f   :  { %12084 = sst [smem:[#allocation27_spill]] %s10537_s13 }
  0x40   :  { %12085 = sst [smem:[#allocation28_spill]] %s10542_s5 }
  0x41   :  { %12086 = sst [smem:[#allocation29_spill]] %s10547_s9 }
  0x42   :  { %s10552_s4 = sld [smem:[%s12014_s0 + %s10362_s28]]  }
  0x48   :  { %12087 = sst [smem:[#allocation30_spill]] %s10552_s4 }
  0x49   :  { %72 = vsyncpa [#allocation4], 0  ;;  %s10554_s7 = smov 0  }
  0x4a LB: > { %12088 = sst [smem:[#allocation31_spill]] %s10328_s7  ;;  %s10560_s10 = sadd.s32 4294967295, %s10328_s7   ;;  %s10328_s7 = sphi %s10554_s7, %s78_s7  }
  0x4b   : > { %p8394_p0 = scmp.ge.s32.totalorder %s10328_s7, 1  ;;  %p1051_p1 = scmp.lt.s32.totalorder %s10328_s7, 10 }
  0x4d   : > { %p1052_p2 = pnand %p8394_p0, %p1051_p1 }
  0x4f   : > { %1055 = sbr.rel (%p1052_p2) target bundleno = 5187 (0x1443), region = 152 }
  0x54   : > { %s12089_s17 = sld [smem:[#allocation9_spill]]  ;;  %p1189_p3 = scmp.lt.s32.totalorder %s10560_s10, 8 }
  0x55   : > { %s12090_s21 = sld [smem:[#allocation10_spill]]  ;;  %p8411_p4 = scmp.ne.s32.totalorder %s10560_s10, 0 }
  0x56   : > { %s12091_s25 = sld [smem:[#allocation11_spill]] }
  0x57   : > { %s12092_s29 = sld [smem:[#allocation12_spill]] }
  0x58   : > { %s12093_s3 = sld [smem:[#allocation13_spill]] }
  0x59   : > { %s10566_s0 = scalar_select %p1189_p3, %s10560_s10, 8 }
  0x5a   : > { %s12095_s22 = sld [smem:[#allocation14_spill]] }
  0x5b   : > { %s8668_s11 = sshll.u32 %s10566_s0, 6  ;;  %s8401_s15 = sshll.u32 %s10566_s0, 3 }
  0x5c   : > { %s10571_s16 = scalar_lea.vmem %s12089_s17, %s8668_s11  ;;  %s10574_s18 = scalar_lea.vmem %s12090_s21, %s8668_s11 }
  0x5d   : > { %12094 = sst [smem:[#allocation32_spill]] %s10574_s18  ;;  %s10577_s23 = scalar_lea.vmem %s12091_s25, %s8668_s11 }
  0x5e   : > { %s12096_s26 = sld [smem:[#allocation15_spill]]  ;;  %s10580_s28 = scalar_lea.vmem %s12092_s29, %s8401_s15 }
  0x5f   : > { %12097 = sst [smem:[#allocation33_spill]] %s10580_s28  ;;  %s10583_s1 = scalar_lea.vmem %s12093_s3, %s8401_s15 }
  0x60   : > { %s10586_s2 = scalar_lea.vmem %s10427_s8, %s8401_s15  ;;  %s8671_s7 = sshll.u32 %s10566_s0, 9 }
  0x61   : > { %s1223_s4 = scalar_lea.vmem %s10437_s19, %s10566_s0  ;;  %s10592_s17 = scalar_lea.vmem %s10432_s14, %s8671_s7 }
  0x62   : > { %s1226_s9 = scalar_lea.vmem %s10442_s24, %s10566_s0  ;;  %s1229_s5 = scalar_lea.vmem %s10447_s30, %s10566_s0 }
  0x63   : > { %s8672_s21 = sshll.u32 %s10566_s0, 7  ;;  %s8408_s18 = sshll.u32 %s10566_s0, 1 }
  0x64   : > { %s10600_s13 = scalar_lea.vmem %s10452_s6, %s8672_s21  ;;  %s10604_s11 = scalar_lea.vmem %s10457_s12, %s8408_s18 }
  0x65   : > { %s10607_s25 = scalar_lea.vmem %s10462_s20, %s8672_s21  ;;  %s1246_s29 = scalar_lea.vmem %s10467_s27, %s10566_s0 }
  0x66   : > { %s1249_s28 = scalar_lea.vmem %s12095_s22, %s10566_s0  ;;  %s1252_s3 = scalar_lea.vmem %s12096_s26, %s10566_s0 }
  0x67   : > { %1257 = sbr.rel (%p8411_p4) target bundleno = 374 (0x176), region = 156  ;;  %s12098_s15 = sld [smem:[#allocation7_spill]] (!%p8411_p4) }
  0x68   : > { %s12099_s21 = sld [smem:[#allocation6_spill]] (!%p8411_p4) }
  0x69   : > { %s12100_s7 = sld [smem:[#allocation8_spill]] (!%p8411_p4) }
  0x6c   : > { %v10363_v1 = vmov 0.0   ;;  %vm1328_vm0 = vcmask 523264   ;;  %vm10364_vm1 = vmmov 0  }
  0x6d   : > { %v9994_v0 = vld [vmem:[%s12098_s15 + $0x38] sm:$0xff]   ;;  %9042 = vmatprep.subr.bf16.mxu0 %v10363_v1  ;;  %v9995_v3 = vld [vmem:[%s12098_s15 + $0x30] sm:$0xff]   ;;  %9058 = vmatprep.mubr.msk.bf16.mxu0 %vm10364_vm1, %v10363_v1  ;;  %v9996_v5 = vld [vmem:[%s12098_s15 + $0x28] sm:$0xff]  }
  0x6e   : > { %v1354_v2 = vsel %vm1328_vm0, %v9994_v0, 0  ;;  %v1351_v4 = vsel %vm1328_vm0, %v9995_v3, 0  ;;  %v1348_v6 = vsel %vm1328_vm0, %v9996_v5, 0  ;;  %v9997_v7 = vld [vmem:[%s12098_s15 + $0x20] sm:$0xff]   ;;  %v9998_v9 = vld [vmem:[%s12098_s15 + $0x18] sm:$0xff]   ;;  %v9999_v11 = vld [vmem:[%s12098_s15 + $0x10] sm:$0xff]  }
  0x6f   : > { %9043 = vmatpush3.bf16.xpose.msra.mxu0 %v1354_v2  ;;  %v1345_v8 = vsel %vm1328_vm0, %v9997_v7, 0  ;;  %v1342_v10 = vsel %vm1328_vm0, %v9998_v9, 0  ;;  %v1339_v12 = vsel %vm1328_vm0, %v9999_v11, 0  ;;  %v10000_v13 = vld [vmem:[%s12098_s15 + $0x8] sm:$0xff]   ;;  %v10001_v15 = vld [vmem:[%s12098_s15] sm:$0xff]  }
  0x70   : > { %9044 = vmatprep.subr.bf16.mxu0 %v10363_v1  ;;  %v1336_v14 = vsel %vm1328_vm0, %v10000_v13, 0  ;;  %v1333_v16 = vsel %vm1328_vm0, %v10001_v15, 0  ;;  %v10002_v17 = vld [vmem:[%s12099_s21] sm:$0xff]  }
  0x71   : > { %v8412_v18 = vld [vmem:[%s12100_s7] ss:$0 sm:$0xff] }
  0x77   : > { %9045 = vmatpush3.bf16.xpose.msra.mxu0 %v1351_v4 }
  0x78   : > { %9046 = vmatprep.subr.bf16.mxu0 %v10363_v1 }
  0x7f   : > { %9047 = vmatpush3.bf16.xpose.msra.mxu0 %v1348_v6 }
  0x80   : > { %9048 = vmatprep.subr.bf16.mxu0 %v10363_v1 }
  0x87   : > { %9049 = vmatpush3.bf16.xpose.msra.mxu0 %v1345_v8 }
  0x88   : > { %9050 = vmatprep.subr.bf16.mxu0 %v10363_v1 }
  0x8f   : > { %9051 = vmatpush3.bf16.xpose.msra.mxu0 %v1342_v10 }
  0x90   : > { %9052 = vmatprep.subr.bf16.mxu0 %v10363_v1 }
  0x97   : > { %9053 = vmatpush3.bf16.xpose.msra.mxu0 %v1339_v12 }
  0x98   : > { %9054 = vmatprep.subr.bf16.mxu0 %v10363_v1 }
  0x9f   : > { %9055 = vmatpush3.bf16.xpose.msra.mxu0 %v1336_v14 }
  0xa0   : > { %9056 = vmatprep.subr.bf16.mxu0 %v10363_v1 }
  0xa7   : > { %9057 = vmatpush3.bf16.xpose.msra.mxu0 %v1333_v16 }
  0xae   : > { %9059 = vmatmul.mubr.msk.bf16.vlgmr.msra.gmra.mxu0 %vm1328_vm0, %v10002_v17 }
 0x16e   : > { %v1390_v19 = vpop.f32.mrf.mxu0 }
 0x16f   : > { %v1391_v20 = vadd.f32 %v8412_v18, %v1390_v19 }
 0x170   : > { %v9060_v21 = vpop.f32.mrf.mxu0 }
 0x171   : > { %1397 = vst [vmem:[#allocation2] sm:$0xff] %v1391_v20 }
 0x172   : > { %v1393_v22 = vpop.f32.mrf.mxu0 }
 0x173   : > { %v1394_v23 = vadd.f32 %v8412_v18, %v1393_v22 }
 0x174   : > { %v9061_v24 = vpop.f32.mrf.mxu0 }
 0x175   : > { %1398 = vst [vmem:[#allocation2 + $0x8] sm:$0xff] %v1394_v23 }
 0x176 PF: > { %v10003_v25 = vld [vmem:[%s10571_s16] sm:$0xff]   ;;  %v12048_v26 = vmov 0.0   ;;  %v10004_v27 = vld [vmem:[%s10571_s16 + $0x8] sm:$0xff]   ;;  %vm10366_vm2 = vmmov 0   ;;  %v10005_v30 = vld [vmem:[%s10571_s16 + $0x10] sm:$0xff]   ;;  %s12101_s18 = sld [smem:[#allocation32_spill]] }
 0x177   : > { %9062 = vmatprep.subr.bf16.mxu0 %v12048_v26  ;;  %9068 = vmatprep.subr.bf16.mxu1 %v12048_v26  ;;  %v10006_v31 = vld [vmem:[%s10571_s16 + $0x18] sm:$0xff]   ;;  %v10007_v32 = vld [vmem:[%s10571_s16 + $0x20] sm:$0xff]   ;;  %v10008_v33 = vld [vmem:[%s10571_s16 + $0x28] sm:$0xff]   ;;  %s12102_s22 = sld [smem:[#allocation33_spill]]  ;;  %vm2872_vm3 = vcmask 130048   ;;  %vm3365_vm4 = vcmask 1043456  }
 0x178   : > { %9063 = vmatpush3.bf16.xpose.msra.mxu0 %v10003_v25  ;;  %9064 = vmatprep.mubr.msk.bf16.mxu0 %vm10366_vm2, %v12048_v26  ;;  %v1399_v28 = vld [vmem:[#allocation2] sm:$0xff]  ;;  %v10009_v34 = vld [vmem:[%s10571_s16 + $0x30] sm:$0xff]   ;;  %v10010_v35 = vld [vmem:[%s10571_s16 + $0x38] sm:$0xff]   ;;  %vm3257_vm6 = vcmask 64512   ;;  %p8621_p5 = scmp.ne.s32.totalorder %s10560_s10, 8 }
 0x179   : > { %9069 = vmatpush3.bf16.xpose.msra.mxu1 %v10004_v27  ;;  %9070 = vmatprep.mubr.msk.bf16.mxu1 %vm10366_vm2, %v12048_v26  ;;  %v10645_v29 = vpack.c.bf16 %v1399_v28, %v1399_v28  ;;  %v10019_v44 = vld [vmem:[%s10577_s23] sm:$0xff]   ;;  %v10020_v45 = vld [vmem:[%s10577_s23 + $0x8] sm:$0xff]   ;;  %v10021_v46 = vld [vmem:[%s10577_s23 + $0x10] sm:$0xff]   ;;  %s12182_s0 = sld [smem:[#allocation28_spill]] (!%p8621_p5)  ;;  %s10373_s21 = smov (!%p8621_p5), 8  }
 0x17a   : > { %9074 = vmatprep.subr.bf16.mxu0 %v12048_v26  ;;  %9080 = vmatprep.subr.bf16.mxu1 %v12048_v26  ;;  %v10022_v47 = vld [vmem:[%s10577_s23 + $0x18] sm:$0xff]   ;;  %v10023_v48 = vld [vmem:[%s10577_s23 + $0x20] sm:$0xff]   ;;  %v10024_v49 = vld [vmem:[%s10577_s23 + $0x28] sm:$0xff]   ;;  %s12185_s26 = sld [smem:[#allocation25_spill]] (!%p8621_p5)  ;;  %s10374_s7 = smov (!%p8621_p5), 16  }
 0x17b   : > { %v10025_v50 = vld [vmem:[%s10577_s23 + $0x30] sm:$0xff]   ;;  %v10026_v51 = vld [vmem:[%s10577_s23 + $0x38] sm:$0xff]   ;;  %v8439_v19 = vld [vmem:[%s10583_s1] ss:$0 sm:$0xff] }
 0x17c   : > { %v10011_v36 = vld [vmem:[%s12101_s18] sm:$0xff]   ;;  %v10012_v37 = vld [vmem:[%s12101_s18 + $0x8] sm:$0xff]   ;;  %v10013_v38 = vld [vmem:[%s12101_s18 + $0x10] sm:$0xff]  }
 0x17d   : > { %v10014_v39 = vld [vmem:[%s12101_s18 + $0x18] sm:$0xff]   ;;  %v10015_v40 = vld [vmem:[%s12101_s18 + $0x20] sm:$0xff]   ;;  %v10016_v41 = vld [vmem:[%s12101_s18 + $0x28] sm:$0xff]  }
 0x17e   : > { %v10017_v42 = vld [vmem:[%s12101_s18 + $0x30] sm:$0xff]   ;;  %v10018_v43 = vld [vmem:[%s12101_s18 + $0x38] sm:$0xff]   ;;  %v8440_v21 = vld [vmem:[%s10583_s1 + $0x1] ss:$0 sm:$0xff] }
 0x17f   : > { %9065 = vmatmul.mubr.bf16.vlgmr.msra.gmra.mxu0 %v10645_v29 }
 0x180   : > { %9071 = vmatmul.mubr.bf16.vlgmr.msra.gmra.mxu1 %v10645_v29  ;;  %9075 = vmatpush3.bf16.xpose.msra.mxu0 %v10005_v30  ;;  %v8423_v30 = vld [vmem:[%s12102_s22] ss:$0 sm:$0xff] }
 0x181   : > { %9081 = vmatpush3.bf16.xpose.msra.mxu1 %v10006_v31  ;;  %9076 = vmatprep.mubr.msk.bf16.mxu0 %vm10366_vm2, %v12048_v26 }
 0x182   : > { %9082 = vmatprep.mubr.msk.bf16.mxu1 %vm10366_vm2, %v12048_v26  ;;  %9086 = vmatprep.subr.bf16.mxu0 %v12048_v26 }
 0x183   : > { %9092 = vmatprep.subr.bf16.mxu1 %v12048_v26 }
 0x187   : > { %9077 = vmatmul.mubr.bf16.vlgmr.msra.gmra.mxu0 %v10645_v29 }
 0x188   : > { %9083 = vmatmul.mubr.bf16.vlgmr.msra.gmra.mxu1 %v10645_v29  ;;  %9087 = vmatpush3.bf16.xpose.msra.mxu0 %v10007_v32 }
 0x189   : > { %9093 = vmatpush3.bf16.xpose.msra.mxu1 %v10008_v33  ;;  %9088 = vmatprep.mubr.msk.bf16.mxu0 %vm10366_vm2, %v12048_v26  ;;  %v8424_v33 = vld [vmem:[%s12102_s22 + $0x1] ss:$0 sm:$0xff] }
 0x18a   : > { %9094 = vmatprep.mubr.msk.bf16.mxu1 %vm10366_vm2, %v12048_v26  ;;  %9098 = vmatprep.subr.bf16.mxu0 %v12048_v26 }
 0x18b   : > { %9104 = vmatprep.subr.bf16.mxu1 %v12048_v26 }
 0x18f   : > { %9089 = vmatmul.mubr.bf16.vlgmr.msra.gmra.mxu0 %v10645_v29 }
 0x190   : > { %9095 = vmatmul.mubr.bf16.vlgmr.msra.gmra.mxu1 %v10645_v29  ;;  %9099 = vmatpush3.bf16.xpose.msra.mxu0 %v10009_v34 }
 0x191   : > { %9105 = vmatpush3.bf16.xpose.msra.mxu1 %v10010_v35  ;;  %9100 = vmatprep.mubr.msk.bf16.mxu0 %vm10366_vm2, %v12048_v26 }
 0x192   : > { %9106 = vmatprep.mubr.msk.bf16.mxu1 %vm10366_vm2, %v12048_v26  ;;  %9110 = vmatprep.subr.bf16.mxu0 %v12048_v26 }
 0x193   : > { %9116 = vmatprep.subr.bf16.mxu1 %v12048_v26 }
 0x197   : > { %9101 = vmatmul.mubr.bf16.vlgmr.msra.gmra.mxu0 %v10645_v29 }
 0x198   : > { %9107 = vmatmul.mubr.bf16.vlgmr.msra.gmra.mxu1 %v10645_v29  ;;  %9111 = vmatpush3.bf16.xpose.msra.mxu0 %v10011_v36 }
 0x199   : > { %9117 = vmatpush3.bf16.xpose.msra.mxu1 %v10012_v37  ;;  %9112 = vmatprep.mubr.msk.bf16.mxu0 %vm10366_vm2, %v12048_v26 }
 0x19a   : > { %9118 = vmatprep.mubr.msk.bf16.mxu1 %vm10366_vm2, %v12048_v26  ;;  %9122 = vmatprep.subr.bf16.mxu0 %v12048_v26 }
 0x19b   : > { %9128 = vmatprep.subr.bf16.mxu1 %v12048_v26 }
 0x19f   : > { %9113 = vmatmul.mubr.bf16.vlgmr.msra.gmra.mxu0 %v10645_v29 }
 0x1a0   : > { %9119 = vmatmul.mubr.bf16.vlgmr.msra.gmra.mxu1 %v10645_v29  ;;  %9123 = vmatpush3.bf16.xpose.msra.mxu0 %v10013_v38  ;;  %v8441_v38 = vld [vmem:[%s10583_s1 + $0x2] ss:$0 sm:$0xff] }
 0x1a1   : > { %9129 = vmatpush3.bf16.xpose.msra.mxu1 %v10014_v39  ;;  %9124 = vmatprep.mubr.msk.bf16.mxu0 %vm10366_vm2, %v12048_v26 }
 0x1a2   : > { %9130 = vmatprep.mubr.msk.bf16.mxu1 %vm10366_vm2, %v12048_v26  ;;  %9134 = vmatprep.subr.bf16.mxu0 %v12048_v26 }
 0x1a3   : > { %9140 = vmatprep.subr.bf16.mxu1 %v12048_v26 }
 0x1a7   : > { %9125 = vmatmul.mubr.bf16.vlgmr.msra.gmra.mxu0 %v10645_v29 }
 0x1a8   : > { %9131 = vmatmul.mubr.bf16.vlgmr.msra.gmra.mxu1 %v10645_v29  ;;  %9135 = vmatpush3.bf16.xpose.msra.mxu0 %v10015_v40 }
 0x1a9   : > { %9141 = vmatpush3.bf16.xpose.msra.mxu1 %v10016_v41  ;;  %9136 = vmatprep.mubr.msk.bf16.mxu0 %vm10366_vm2, %v12048_v26  ;;  %v8442_v41 = vld [vmem:[%s10583_s1 + $0x3] ss:$0 sm:$0xff] }
 0x1aa   : > { %9142 = vmatprep.mubr.msk.bf16.mxu1 %vm10366_vm2, %v12048_v26  ;;  %9146 = vmatprep.subr.bf16.mxu0 %v12048_v26 }
 0x1ab   : > { %9152 = vmatprep.subr.bf16.mxu1 %v12048_v26 }
 0x1af   : > { %9137 = vmatmul.mubr.bf16.vlgmr.msra.gmra.mxu0 %v10645_v29 }
 0x1b0   : > { %9143 = vmatmul.mubr.bf16.vlgmr.msra.gmra.mxu1 %v10645_v29  ;;  %9147 = vmatpush3.bf16.xpose.msra.mxu0 %v10017_v42 }
 0x1b1   : > { %9153 = vmatpush3.bf16.xpose.msra.mxu1 %v10018_v43  ;;  %9148 = vmatprep.mubr.msk.bf16.mxu0 %vm10366_vm2, %v12048_v26 }
 0x1b2   : > { %9154 = vmatprep.mubr.msk.bf16.mxu1 %vm10366_vm2, %v12048_v26  ;;  %9158 = vmatprep.subr.bf16.mxu0 %v12048_v26 }
 0x1b3   : > { %9164 = vmatprep.subr.bf16.mxu1 %v12048_v26 }
 0x1b7   : > { %9149 = vmatmul.mubr.bf16.vlgmr.msra.gmra.mxu0 %v10645_v29 }
 0x1b8   : > { %9155 = vmatmul.mubr.bf16.vlgmr.msra.gmra.mxu1 %v10645_v29  ;;  %9160 = vmatprep.mubr.msk.bf16.mxu0 %vm10366_vm2, %v12048_v26 }
 0x1b9   : > { %9166 = vmatprep.mubr.msk.bf16.mxu1 %vm10366_vm2, %v12048_v26  ;;  %9159 = vmatpush3.bf16.xpose.msra.mxu0 %v10019_v44 }
 0x1ba   : > { %9170 = vmatprep.subr.bf16.mxu0 %v12048_v26  ;;  %9165 = vmatpush3.bf16.xpose.msra.mxu1 %v10020_v45 }
 0x1bb   : > { %9176 = vmatprep.subr.bf16.mxu1 %v12048_v26 }
 0x1c0   : > { %9161 = vmatmul.mubr.bf16.vlgmr.msra.gmra.mxu0 %v10645_v29 }
 0x1c1   : > { %9171 = vmatpush3.bf16.xpose.msra.mxu0 %v10021_v46  ;;  %9172 = vmatprep.mubr.msk.bf16.mxu0 %vm10366_vm2, %v12048_v26 }
 0x1c2   : > { %9182 = vmatprep.subr.bf16.mxu0 %v12048_v26  ;;  %9167 = vmatmul.mubr.bf16.vlgmr.msra.gmra.mxu1 %v10645_v29 }
 0x1c3   : > { %9177 = vmatpush3.bf16.xpose.msra.mxu1 %v10022_v47  ;;  %9178 = vmatprep.mubr.msk.bf16.mxu1 %vm10366_vm2, %v12048_v26 }
 0x1c4   : > { %9188 = vmatprep.subr.bf16.mxu1 %v12048_v26 }
 0x1c8   : > { %9173 = vmatmul.mubr.bf16.vlgmr.msra.gmra.mxu0 %v10645_v29 }
 0x1c9   : > { %9183 = vmatpush3.bf16.xpose.msra.mxu0 %v10023_v48  ;;  %9184 = vmatprep.mubr.msk.bf16.mxu0 %vm10366_vm2, %v12048_v26 }
 0x1ca   : > { %9194 = vmatprep.subr.bf16.mxu0 %v12048_v26  ;;  %9179 = vmatmul.mubr.bf16.vlgmr.msra.gmra.mxu1 %v10645_v29 }
 0x1cb   : > { %9189 = vmatpush3.bf16.xpose.msra.mxu1 %v10024_v49  ;;  %9190 = vmatprep.mubr.msk.bf16.mxu1 %vm10366_vm2, %v12048_v26 }
 0x1cc   : > { %9200 = vmatprep.subr.bf16.mxu1 %v12048_v26 }
 0x1d0   : > { %9185 = vmatmul.mubr.bf16.vlgmr.msra.gmra.mxu0 %v10645_v29 }
 0x1d1   : > { %9195 = vmatpush3.bf16.xpose.msra.mxu0 %v10025_v50  ;;  %9196 = vmatprep.mubr.msk.bf16.mxu0 %vm10366_vm2, %v12048_v26 }
 0x1d2   : > { %9206 = vmatprep.subr.bf16.mxu0 %v12048_v26  ;;  %9191 = vmatmul.mubr.bf16.vlgmr.msra.gmra.mxu1 %v10645_v29 }
 0x1d3   : > { %9201 = vmatpush3.bf16.xpose.msra.mxu1 %v10026_v51  ;;  %9202 = vmatprep.mubr.msk.bf16.mxu1 %vm10366_vm2, %v12048_v26 }
 0x1d4   : > { %9212 = vmatprep.subr.bf16.mxu1 %v12048_v26 }
 0x1d8   : > { %9197 = vmatmul.mubr.bf16.vlgmr.msra.gmra.mxu0 %v10645_v29 }
 0x1d9   : > { %9208 = vmatprep.mubr.msk.bf16.mxu0 %vm10366_vm2, %v12048_v26 }
 0x1da   : > { %9203 = vmatmul.mubr.bf16.vlgmr.msra.gmra.mxu1 %v10645_v29 }
 0x1db   : > { %9214 = vmatprep.mubr.msk.bf16.mxu1 %vm10366_vm2, %v12048_v26 }
 0x23f   : > { %v1696_v52 = vpop.f32.mrf.mxu0 }
 0x240   : > { %v1742_v53 = vpop.f32.mrf.mxu1  ;;  %v1697_v39 = vadd.f32 %v8423_v30, %v1696_v52  ;;  %v8425_v52 = vld [vmem:[%s12102_s22 + $0x2] ss:$0 sm:$0xff] }
 0x241   : > { %v9066_v54 = vpop.f32.mrf.mxu0  ;;  %v1743_v42 = vadd.f32 %v8424_v33, %v1742_v53 }
 0x242   : > { %v9072_v55 = vpop.f32.mrf.mxu1  ;;  %v2856_v48 = vpack.c.bf16 %v1697_v39, %v1697_v39 }
 0x243   : > { %v1699_v56 = vpop.f32.mrf.mxu0  ;;  %v2857_v51 = vpack.c.bf16 %v1743_v42, %v1743_v42 }
 0x244   : > { %v1745_v57 = vpop.f32.mrf.mxu1  ;;  %v8426_v56 = vld [vmem:[%s12102_s22 + $0x3] ss:$0 sm:$0xff] }
 0x245   : > { %v9067_v58 = vpop.f32.mrf.mxu0 }
 0x246   : > { %v9073_v59 = vpop.f32.mrf.mxu1 }
 0x247   : > { %v10763_v60 = vpop.f32.mrf.mxu0 }
 0x248   : > { %v10765_v61 = vpop.f32.mrf.mxu1 }
 0x249   : > { %v9078_v62 = vpop.f32.mrf.mxu0 }
 0x24a   : > { %v9084_v63 = vpop.f32.mrf.mxu1  ;;  %v8443_v62 = vld [vmem:[%s10583_s1 + $0x4] ss:$0 sm:$0xff] }
 0x24b   : > { %v1791_v0 = vpop.f32.mrf.mxu0  ;;  %v1789_v63 = vadd.f32 %v8425_v52, %v10763_v60 }
 0x24c   : > { %v1837_v1 = vpop.f32.mrf.mxu1 }
 0x24d   : > { %v9079_v2 = vpop.f32.mrf.mxu0  ;;  %v8444_v1 = vld [vmem:[%s10583_s1 + $0x5] ss:$0 sm:$0xff] }
 0x24e   : > { %v9085_v3 = vpop.f32.mrf.mxu1  ;;  %v1835_v2 = vadd.f32 %v8426_v56, %v10765_v61  ;;  %v8427_v61 = vld [vmem:[%s12102_s22 + $0x4] ss:$0 sm:$0xff] }
 0x24f   : > { %v10767_v4 = vpop.f32.mrf.mxu0 }
 0x250   : > { %v10769_v5 = vpop.f32.mrf.mxu1 }
 0x251   : > { %v9090_v6 = vpop.f32.mrf.mxu0 }
 0x252   : > { %v9096_v7 = vpop.f32.mrf.mxu1 }
 0x253   : > { %v1883_v8 = vpop.f32.mrf.mxu0 }
 0x254   : > { %v1929_v9 = vpop.f32.mrf.mxu1 }
 0x255   : > { %v9091_v10 = vpop.f32.mrf.mxu0  ;;  %v2858_v9 = vpack.c.bf16 %v1789_v63, %v1789_v63 }
 0x256   : > { %v9097_v11 = vpop.f32.mrf.mxu1 }
 0x257   : > { %v10771_v12 = vpop.f32.mrf.mxu0 }
 0x258   : > { %v10773_v13 = vpop.f32.mrf.mxu1 }
 0x259   : > { %v9102_v14 = vpop.f32.mrf.mxu0 }
 0x25a   : > { %v9108_v15 = vpop.f32.mrf.mxu1  ;;  %v2859_v14 = vpack.c.bf16 %v1835_v2, %v1835_v2 }
 0x25b   : > { %v1975_v16 = vpop.f32.mrf.mxu0 }
 0x25c   : > { %v2021_v17 = vpop.f32.mrf.mxu1 }
 0x25d   : > { %v9103_v18 = vpop.f32.mrf.mxu0  ;;  %v8428_v17 = vld [vmem:[%s12102_s22 + $0x5] ss:$0 sm:$0xff] }
 0x25e   : > { %v9109_v20 = vpop.f32.mrf.mxu1 }
 0x25f   : > { %v2112_v22 = vpop.f32.mrf.mxu0 }
 0x260   : > { %v2113_v23 = vadd.f32 %v8439_v19, %v2112_v22  ;;  %v2158_v24 = vpop.f32.mrf.mxu1  ;;  %v8445_v22 = vld [vmem:[%s10583_s1 + $0x6] ss:$0 sm:$0xff] }
 0x261   : > { %v2159_v25 = vadd.f32 %v8440_v21, %v2158_v24  ;;  %v9114_v27 = vpop.f32.mrf.mxu0 }
 0x262   : > { %v2864_v28 = vpack.c.bf16 %v2113_v23, %v2113_v23  ;;  %v9120_v29 = vpop.f32.mrf.mxu1  ;;  %v1881_v23 = vadd.f32 %v8427_v61, %v10767_v4  ;;  %v1927_v27 = vadd.f32 %v8428_v17, %v10769_v5 }
 0x263   : > { %v2865_v31 = vpack.c.bf16 %v2159_v25, %v2159_v25  ;;  %v2115_v32 = vpop.f32.mrf.mxu0  ;;  %v8446_v25 = vld [vmem:[%s10583_s1 + $0x7] ss:$0 sm:$0xff] }
 0x264   : > { %v2877_v34 = vsel %vm2872_vm3, %v2864_v28, 0  ;;  %v2161_v35 = vpop.f32.mrf.mxu1  ;;  %v2860_v32 = vpack.c.bf16 %v1881_v23, %v1881_v23 }
 0x265   : > { %v2923_v36 = vsel %vm2872_vm3, %v2865_v31, 0  ;;  %v9115_v37 = vpop.f32.mrf.mxu0  ;;  %9207 = vmatpush3.bf16.xpose.msra.mxu0 %v2877_v34  ;;  %v2861_v35 = vpack.c.bf16 %v1927_v27, %v1927_v27  ;;  %v1601_v27 = vlaneseq }
 0x266   : > { %v9121_v40 = vpop.f32.mrf.mxu1  ;;  %9213 = vmatpush3.bf16.xpose.msra.mxu1 %v2923_v36  ;;  %9218 = vmatprep.subr.bf16.mxu0 %v12048_v26  ;;  %v8429_v36 = vld [vmem:[%s12102_s22 + $0x6] ss:$0 sm:$0xff] }
 0x267   : > { %v2204_v43 = vpop.f32.mrf.mxu0  ;;  %9224 = vmatprep.subr.bf16.mxu1 %v12048_v26 }
 0x268   : > { %v2205_v44 = vadd.f32 %v8441_v38, %v2204_v43  ;;  %v2250_v45 = vpop.f32.mrf.mxu1  ;;  %v8430_v38 = vld [vmem:[%s12102_s22 + $0x7] ss:$0 sm:$0xff]  ;;  %v1973_v43 = vadd.f32 %v8429_v36, %v10771_v12  ;;  %v8455_v12 = vld [vmem:[%s10586_s2] ss:$0 sm:$0xff] }
 0x269   : > { %v2251_v46 = vadd.f32 %v8442_v41, %v2250_v45  ;;  %v9126_v47 = vpop.f32.mrf.mxu0  ;;  %v2019_v45 = vadd.f32 %v8430_v38, %v10773_v13 }
 0x26a   : > { %v2866_v49 = vpack.c.bf16 %v2205_v44, %v2205_v44  ;;  %v9132_v50 = vpop.f32.mrf.mxu1 }
 0x26b   : > { %v2867_v54 = vpack.c.bf16 %v2251_v46, %v2251_v46  ;;  %v2207_v55 = vpop.f32.mrf.mxu0  ;;  %v2862_v46 = vpack.c.bf16 %v1973_v43, %v1973_v43  ;;  %v2863_v47 = vpack.c.bf16 %v2019_v45, %v2019_v45  ;;  %v8456_v50 = vld [vmem:[%s10586_s2 + $0x1] ss:$0 sm:$0xff] }
 0x26c   : > { %v2969_v57 = vsel %vm2872_vm3, %v2866_v49, 0  ;;  %v2253_v53 = vpop.f32.mrf.mxu1  ;;  %9209 = vmatmul.mubr.msk.bf16.vlgmr.msra.gmra.mxu0 %vm2872_vm3, %v2856_v48 }
 0x26d   : > { %v3015_v58 = vsel %vm2872_vm3, %v2867_v54, 0  ;;  %9215 = vmatmul.mubr.msk.bf16.vlgmr.msra.gmra.mxu1 %vm2872_vm3, %v2857_v51  ;;  %v9127_v59 = vpop.f32.mrf.mxu0  ;;  %9219 = vmatpush3.bf16.xpose.msra.mxu0 %v2969_v57 }
 0x26e   : > { %v9133_v0 = vpop.f32.mrf.mxu1  ;;  %9225 = vmatpush3.bf16.xpose.msra.mxu1 %v3015_v58  ;;  %9220 = vmatprep.mubr.msk.bf16.mxu0 %vm10366_vm2, %v12048_v26 }
 0x26f   : > { %v2296_v3 = vpop.f32.mrf.mxu0  ;;  %9226 = vmatprep.mubr.msk.bf16.mxu1 %vm10366_vm2, %v12048_v26  ;;  %9230 = vmatprep.subr.bf16.mxu0 %v12048_v26 }
 0x270   : > { %v2297_v6 = vadd.f32 %v8443_v62, %v2296_v3  ;;  %v2342_v7 = vpop.f32.mrf.mxu1  ;;  %9236 = vmatprep.subr.bf16.mxu1 %v12048_v26 }
 0x271   : > { %v2343_v60 = vadd.f32 %v8444_v1, %v2342_v7  ;;  %v9138_v8 = vpop.f32.mrf.mxu0 }
 0x272   : > { %v2868_v10 = vpack.c.bf16 %v2297_v6, %v2297_v6  ;;  %v9144_v11 = vpop.f32.mrf.mxu1 }
 0x273   : > { %v2869_v15 = vpack.c.bf16 %v2343_v60, %v2343_v60  ;;  %v2299_v16 = vpop.f32.mrf.mxu0 }
 0x274   : > { %v3061_v18 = vsel %vm2872_vm3, %v2868_v10, 0  ;;  %v2345_v19 = vpop.f32.mrf.mxu1  ;;  %9221 = vmatmul.mubr.msk.bf16.vlgmr.msra.gmra.mxu0 %vm2872_vm3, %v2858_v9 }
 0x275   : > { %v3107_v20 = vsel %vm2872_vm3, %v2869_v15, 0  ;;  %9227 = vmatmul.mubr.msk.bf16.vlgmr.msra.gmra.mxu1 %vm2872_vm3, %v2859_v14  ;;  %v9139_v21 = vpop.f32.mrf.mxu0  ;;  %9231 = vmatpush3.bf16.xpose.msra.mxu0 %v3061_v18 }
 0x276   : > { %v9145_v24 = vpop.f32.mrf.mxu1  ;;  %9237 = vmatpush3.bf16.xpose.msra.mxu1 %v3107_v20  ;;  %9232 = vmatprep.mubr.msk.bf16.mxu0 %vm10366_vm2, %v12048_v26 }
 0x277   : > { %v2388_v28 = vpop.f32.mrf.mxu0  ;;  %9238 = vmatprep.mubr.msk.bf16.mxu1 %vm10366_vm2, %v12048_v26  ;;  %9242 = vmatprep.subr.bf16.mxu0 %v12048_v26 }
 0x278   : > { %v2389_v29 = vadd.f32 %v8445_v22, %v2388_v28  ;;  %v2434_v30 = vpop.f32.mrf.mxu1  ;;  %9248 = vmatprep.subr.bf16.mxu1 %v12048_v26  ;;  %v10855_v28 = vshrl.u32 %v1601_v27, 7 }
 0x279   : > { %v2435_v4 = vadd.f32 %v8446_v25, %v2434_v30  ;;  %v9150_v31 = vpop.f32.mrf.mxu0 }
 0x27a   : > { %v2870_v33 = vpack.c.bf16 %v2389_v29, %v2389_v29  ;;  %v9156_v34 = vpop.f32.mrf.mxu1  ;;  %12103 = vst [vmem:[#allocation34_spill] sm:$0xff] %v10855_v28  ;;  %v1604_v29 = vand.u32 127, %v1601_v27 }
 0x27b   : > { %v2871_v37 = vpack.c.bf16 %v2435_v4, %v2435_v4  ;;  %v2391_v5 = vpop.f32.mrf.mxu0  ;;  %v10367_v4 = vmov -1e+30  }
 0x27c   : > { %v3153_v39 = vsel %vm2872_vm3, %v2870_v33, 0  ;;  %9233 = vmatmul.mubr.msk.bf16.vlgmr.msra.gmra.mxu0 %vm2872_vm3, %v2860_v32  ;;  %v2437_v40 = vpop.f32.mrf.mxu1  ;;  %vm1605_vm5 = vcmp.le.s32.totalorder %v1604_v29, %v10855_v28 }
 0x27d   : > { %v3199_v41 = vsel %vm2872_vm3, %v2871_v37, 0  ;;  %9239 = vmatmul.mubr.msk.bf16.vlgmr.msra.gmra.mxu1 %vm2872_vm3, %v2861_v35  ;;  %9243 = vmatpush3.bf16.xpose.msra.mxu0 %v3153_v39  ;;  %v9151_v42 = vpop.f32.mrf.mxu0  ;;  %v10858_v31 = vsel %vm1605_vm5, 0.0, %v10367_v4 }
 0x27e   : > { %9249 = vmatpush3.bf16.xpose.msra.mxu1 %v3199_v41  ;;  %9244 = vmatprep.mubr.msk.bf16.mxu0 %vm10366_vm2, %v12048_v26  ;;  %v9157_v44 = vpop.f32.mrf.mxu1 }
 0x27f   : > { %9250 = vmatprep.mubr.msk.bf16.mxu1 %vm10366_vm2, %v12048_v26  ;;  %9254 = vmatprep.subr.bf16.mxu0 %v12048_v26 }
 0x280   : > { %9260 = vmatprep.subr.bf16.mxu1 %v12048_v26  ;;  %v2528_v13 = vpop.f32.mrf.mxu0 }
 0x281   : > { %v2529_v48 = vadd.f32 %v8455_v12, %v2528_v13 }
 0x282   : > { %v9162_v49 = vpop.f32.mrf.mxu0  ;;  %v2574_v54 = vpop.f32.mrf.mxu1 }
 0x283   : > { %v3354_v51 = vpack.c.bf16 %v2529_v48, %v2529_v48  ;;  %v2575_v56 = vadd.f32 %v8456_v50, %v2574_v54 }
 0x284   : > { %9245 = vmatmul.mubr.msk.bf16.vlgmr.msra.gmra.mxu0 %vm2872_vm3, %v2862_v46  ;;  %v2531_v52 = vpop.f32.mrf.mxu0  ;;  %v9168_v53 = vpop.f32.mrf.mxu1 }
 0x285   : > { %9251 = vmatmul.mubr.msk.bf16.vlgmr.msra.gmra.mxu1 %vm2872_vm3, %v2863_v47  ;;  %9256 = vmatprep.mubr.msk.bf16.mxu0 %vm10366_vm2, %v12048_v26  ;;  %v3367_v55 = vsel %vm3365_vm4, %v3354_v51, 0  ;;  %v3355_v58 = vpack.c.bf16 %v2575_v56, %v2575_v56 }
 0x286   : > { %9262 = vmatprep.mubr.msk.bf16.mxu1 %vm10366_vm2, %v12048_v26  ;;  %v9163_v57 = vpop.f32.mrf.mxu0  ;;  %9255 = vmatpush3.bf16.msra.mxu0 %v3367_v55  ;;  %v2577_v59 = vpop.f32.mrf.mxu1 }
 0x287   : > { %9266 = vmatprep.subr.bf16.mxu0 %v12048_v26  ;;  %v3413_v63 = vsel %vm3365_vm4, %v3355_v58, 0 }
 0x288   : > { %v10841_v62 = vpop.f32.mrf.mxu0  ;;  %v9169_v0 = vpop.f32.mrf.mxu1  ;;  %9261 = vmatpush3.bf16.msra.mxu1 %v3413_v63 }
 0x289   : > { %9272 = vmatprep.subr.bf16.mxu1 %v12048_v26 }
 0x28a   : > { %v9174_v1 = vpop.f32.mrf.mxu0  ;;  %v10845_v3 = vpop.f32.mrf.mxu1 }
 0x28c   : > { %v2623_v2 = vpop.f32.mrf.mxu0  ;;  %v9180_v7 = vpop.f32.mrf.mxu1 }
 0x28e   : > { %v9175_v6 = vpop.f32.mrf.mxu0  ;;  %v2669_v60 = vpop.f32.mrf.mxu1 }
 0x290   : > { %v10847_v8 = vpop.f32.mrf.mxu0  ;;  %v9181_v9 = vpop.f32.mrf.mxu1 }
 0x292   : > { %v9186_v10 = vpop.f32.mrf.mxu0  ;;  %v10849_v14 = vpop.f32.mrf.mxu1 }
 0x294   : > { %v2715_v11 = vpop.f32.mrf.mxu0  ;;  %v9192_v15 = vpop.f32.mrf.mxu1 }
 0x296   : > { %v9187_v61 = vpop.f32.mrf.mxu0  ;;  %v2761_v16 = vpop.f32.mrf.mxu1 }
 0x298   : > { %v10851_v17 = vpop.f32.mrf.mxu0  ;;  %v9193_v18 = vpop.f32.mrf.mxu1 }
 0x29a   : > { %v9198_v19 = vpop.f32.mrf.mxu0  ;;  %v10853_v21 = vpop.f32.mrf.mxu1 }
 0x29c   : > { %v2807_v20 = vpop.f32.mrf.mxu0  ;;  %v9204_v23 = vpop.f32.mrf.mxu1 }
 0x29e   : > { %v9199_v22 = vpop.f32.mrf.mxu0  ;;  %v2853_v24 = vpop.f32.mrf.mxu1 }
 0x2a0   : > { %v9205_v25 = vpop.f32.mrf.mxu1 }
 0x32c   : > { %v2913_v30 = vpop.f32.mrf.mxu0 }
 0x32d   : > { %v3241_v32 = vmul.f32 0.25, %v2913_v30  ;;  %v2959_v33 = vpop.f32.mrf.mxu1 }
 0x32e   : > { %v3242_v34 = vmul.f32 0.25, %v2959_v33  ;;  %v9210_v35 = vpop.f32.mrf.mxu0 }
 0x32f   : > { %v9216_v36 = vpop.f32.mrf.mxu1  ;;  %v3249_v37 = vadd.f32 %v3241_v32, %v10858_v31 }
 0x330   : > { %v2916_v5 = vpop.f32.mrf.mxu0  ;;  %v3250_v40 = vadd.f32 %v3242_v34, %v10858_v31 }
 0x331   : > { %v2962_v38 = vpop.f32.mrf.mxu1  ;;  %v3258_v39 = vsel %vm3257_vm6, %v3249_v37, -inf }
 0x332   : > { %3259 = vmax.xlane.f32.xlu0 %v3258_v39  ;;  %v9211_v41 = vpop.f32.mrf.mxu0  ;;  %v3261_v46 = vsel %vm3257_vm6, %v3250_v40, -inf }
 0x333   : > { %v9217_v42 = vpop.f32.mrf.mxu1 }
 0x334   : > { %v3005_v43 = vpop.f32.mrf.mxu0 }
 0x335   : > { %v3243_v44 = vmul.f32 0.25, %v3005_v43  ;;  %v3051_v45 = vpop.f32.mrf.mxu1 }
 0x336   : > { %v3244_v47 = vmul.f32 0.25, %v3051_v45  ;;  %3262 = vmax.xlane.f32.xlu0 %v3261_v46  ;;  %v9222_v12 = vpop.f32.mrf.mxu0 }
 0x337   : > { %v9228_v13 = vpop.f32.mrf.mxu1  ;;  %v3251_v48 = vadd.f32 %v3243_v44, %v10858_v31 }
 0x338   : > { %v3008_v49 = vpop.f32.mrf.mxu0  ;;  %v3252_v52 = vadd.f32 %v3244_v47, %v10858_v31 }
 0x339   : > { %v3054_v50 = vpop.f32.mrf.mxu1  ;;  %v3264_v51 = vsel %vm3257_vm6, %v3251_v48, -inf }
 0x33a   : > { %3265 = vmax.xlane.f32.xlu1 %v3264_v51  ;;  %v9223_v54 = vpop.f32.mrf.mxu0  ;;  %v3267_v53 = vsel %vm3257_vm6, %v3252_v52, -inf }
 0x33b   : > { %v9229_v55 = vpop.f32.mrf.mxu1  ;;  %v8457_v54 = vld [vmem:[%s10586_s2 + $0x2] ss:$0 sm:$0xff] }
 0x33c   : > { %v3097_v56 = vpop.f32.mrf.mxu0 }
 0x33d   : > { %v3143_v57 = vpop.f32.mrf.mxu1  ;;  %v3245_v4 = vmul.f32 0.25, %v3097_v56 }
 0x33e   : > { %3268 = vmax.xlane.f32.xlu1 %v3267_v53  ;;  %v9234_v58 = vpop.f32.mrf.mxu0  ;;  %v3246_v34 = vmul.f32 0.25, %v3143_v57 }
 0x33f   : > { %v9240_v59 = vpop.f32.mrf.mxu1 }
 0x340   : > { %v3100_v63 = vpop.f32.mrf.mxu0  ;;  %v3254_v38 = vadd.f32 %v3246_v34, %v10858_v31  ;;  %v2621_v59 = vadd.f32 %v8457_v54, %v10841_v62 }
 0x341   : > { %v3146_v0 = vpop.f32.mrf.mxu1 }
 0x342   : > { %v9235_v1 = vpop.f32.mrf.mxu0  ;;  %v3273_v43 = vsel %vm3257_vm6, %v3254_v38, -inf }
 0x343   : > { %v9241_v2 = vpop.f32.mrf.mxu1  ;;  %v8458_v1 = vld [vmem:[%s10586_s2 + $0x3] ss:$0 sm:$0xff] }
 0x344   : > { %v3189_v6 = vpop.f32.mrf.mxu0 }
 0x345   : > { %v3235_v7 = vpop.f32.mrf.mxu1  ;;  %v3247_v35 = vmul.f32 0.25, %v3189_v6 }
 0x346   : > { %v9246_v60 = vpop.f32.mrf.mxu0  ;;  %v3248_v39 = vmul.f32 0.25, %v3235_v7 }
 0x347   : > { %v9252_v9 = vpop.f32.mrf.mxu1  ;;  %v3255_v42 = vadd.f32 %v3247_v35, %v10858_v31 }
 0x348   : > { %v3192_v10 = vpop.f32.mrf.mxu0  ;;  %v3256_v45 = vadd.f32 %v3248_v39, %v10858_v31  ;;  %v3356_v9 = vpack.c.bf16 %v2621_v59, %v2621_v59 }
 0x349   : > { %v3238_v11 = vpop.f32.mrf.mxu1  ;;  %v3276_v44 = vsel %vm3257_vm6, %v3255_v42, -inf  ;;  %v2667_v10 = vadd.f32 %v8458_v1, %v10845_v3 }
 0x34a   : > { %v9247_v61 = vpop.f32.mrf.mxu0  ;;  %v3279_v47 = vsel %vm3257_vm6, %v3256_v45, -inf }
 0x34b   : > { %v9253_v15 = vpop.f32.mrf.mxu1 }
 0x3bb   : > { %v3260_v16 = vpop.xlane.xlu0 %3259 }
 0x3bc   : > { %v3282_v18 = vsub.f32 %v3249_v37, %v3260_v16  ;;  %v3253_v37 = vadd.f32 %v3245_v4, %v10858_v31 }
 0x3be   : > { %v3290_v19 = vmul.f32 1.442695, %v3282_v18  ;;  %v3270_v41 = vsel %vm3257_vm6, %v3253_v37, -inf  ;;  %v3459_v18 = vsel %vm3365_vm4, %v3356_v9, 0 }
 0x3bf   : > { %v3263_v20 = vpop.xlane.xlu0 %3262 }
 0x3c0   : > { %10131 = vpow2.f32 %v3290_v19  ;;  %v3283_v22 = vsub.f32 %v3250_v40, %v3263_v20  ;;  %v3357_v19 = vpack.c.bf16 %v2667_v10, %v2667_v10  ;;  %v10029_v10 = vld [vmem:[%s10592_s17 + $0x30] sm:$0xff]  }
 0x3c2   : > { %v3292_v23 = vmul.f32 1.442695, %v3283_v22 }
 0x3c3   : > { %v3266_v24 = vpop.xlane.xlu1 %3265 }
 0x3c4   : > { %10133 = vpow2.f32 %v3292_v23  ;;  %v3284_v25 = vsub.f32 %v3251_v48, %v3266_v24  ;;  %v8459_v23 = vld [vmem:[%s10586_s2 + $0x4] ss:$0 sm:$0xff]  ;;  %v3505_v24 = vsel %vm3365_vm4, %v3357_v19, 0 }
 0x3c6   : > { %v3294_v27 = vmul.f32 1.442695, %v3284_v25 }
 0x3c7   : > { %v3269_v29 = vpop.xlane.xlu1 %3268 }
 0x3c8   : > { %v3285_v30 = vsub.f32 %v3252_v52, %v3269_v29  ;;  %10135 = vpow2.f32 %v3294_v27  ;;  %v2713_v27 = vadd.f32 %v8459_v23, %v10847_v8  ;;  %v8460_v29 = vld [vmem:[%s10586_s2 + $0x5] ss:$0 sm:$0xff] }
 0x3c9   : > { %v2759_v34 = vadd.f32 %v8460_v29, %v10849_v14 }
 0x3ca   : > { %v3296_v32 = vmul.f32 1.442695, %v3285_v30 }
 0x3cc   : > { %10137 = vpow2.f32 %v3296_v32 }
 0x3cd   : > { %v10132_v33 = vpop.eup %10131 }
 0x3ce   : > { %v3306_v36 = vsel %vm3257_vm6, %v10132_v33, 0.0 }
 0x3cf   : > { %3307 = vadd.xlane.f32.xlu0 %v3306_v36  ;;  %v3358_v36 = vpack.c.bf16 %v2713_v27, %v2713_v27  ;;  %v10035_v27 = vld [vmem:[%s10592_s17 + $0x18] sm:$0xff]  }
 0x3d1   : > { %v10134_v5 = vpop.eup %10133 }
 0x3d2   : > { %v3309_v40 = vsel %vm3257_vm6, %v10134_v5, 0.0 }
 0x3d3   : > { %3310 = vadd.xlane.f32.xlu1 %v3309_v40  ;;  %3271 = vmax.xlane.f32.xlu0 %v3270_v41  ;;  %v3359_v40 = vpack.c.bf16 %v2759_v34, %v2759_v34  ;;  %v10036_v34 = vld [vmem:[%s10592_s17 + $0x58] sm:$0xff]  }
 0x3d5   : > { %v10877_v46 = vpop.eup %10135 }
 0x3d6   : > { %v3312_v12 = vsel %vm3257_vm6, %v10877_v46, 0.0 }
 0x3d7   : > { %3274 = vmax.xlane.f32.xlu1 %v3273_v43  ;;  %3277 = vmax.xlane.f32.xlu0 %v3276_v44  ;;  %v3597_v43 = vsel %vm3365_vm4, %v3359_v40, 0 }
 0x3d9   : > { %v10882_v13 = vpop.eup %10137 }
 0x3da   : > { %v3315_v48 = vsel %vm3257_vm6, %v10882_v13, 0.0 }
 0x3db   : > { %3280 = vmax.xlane.f32.xlu1 %v3279_v47  ;;  %3313 = vadd.xlane.f32.xlu0 %v3312_v12  ;;  %v8461_v47 = vld [vmem:[%s10586_s2 + $0x6] ss:$0 sm:$0xff] }
 0x3df   : > { %3316 = vadd.xlane.f32.xlu1 %v3315_v48  ;;  %v8462_v48 = vld [vmem:[%s10586_s2 + $0x7] ss:$0 sm:$0xff] }
 0x458   : > { %v3308_v49 = vpop.xlane.xlu0 %3307 }
 0x459   : > { %10139 = vrcp.f32 %v3308_v49 }
 0x45c   : > { %v3311_v50 = vpop.xlane.xlu1 %3310  ;;  %v3272_v51 = vpop.xlane.xlu0 %3271 }
 0x45d   : > { %10141 = vrcp.f32 %v3311_v50  ;;  %v3286_v52 = vsub.f32 %v3253_v37, %v3272_v51  ;;  %v2851_v51 = vadd.f32 %v8462_v48, %v10853_v21  ;;  %v10027_v21 = vld [vmem:[%s10592_s17 + $0x38] sm:$0xff]  }
 0x45f   : > { %v3298_v55 = vmul.f32 1.442695, %v3286_v52 }
 0x460   : > { %v3275_v56 = vpop.xlane.xlu1 %3274  ;;  %v3278_v57 = vpop.xlane.xlu0 %3277 }
 0x461   : > { %10143 = vpow2.f32 %v3298_v55  ;;  %v3287_v53 = vsub.f32 %v3254_v38, %v3275_v56  ;;  %v3288_v58 = vsub.f32 %v3255_v42, %v3278_v57  ;;  %v3551_v42 = vsel %vm3365_vm4, %v3358_v36, 0 }
 0x463   : > { %v3300_v63 = vmul.f32 1.442695, %v3287_v53  ;;  %v3302_v0 = vmul.f32 1.442695, %v3288_v58  ;;  %v3361_v53 = vpack.c.bf16 %v2851_v51, %v2851_v51  ;;  %v10042_v51 = vld [vmem:[%s10592_s17 + $0x40] sm:$0xff]  }
 0x464   : > { %v3281_v2 = vpop.xlane.xlu1 %3280  ;;  %v3314_v6 = vpop.xlane.xlu0 %3313 }
 0x465   : > { %10145 = vpow2.f32 %v3300_v63  ;;  %v3289_v7 = vsub.f32 %v3256_v45, %v3281_v2  ;;  %v10935_v2 = vsel %vm2872_vm3, %v10027_v21, 0  ;;  %v10046_v21 = vld [vmem:[%s10592_s17 + $0xf0] sm:$0xff]  }
 0x466   : > { %v10140_v60 = vpop.eup %10139  ;;  %10147 = vpow2.f32 %v3302_v0  ;;  %v3689_v0 = vsel %vm3365_vm4, %v3361_v53, 0 }
 0x467   : > { %v3304_v11 = vmul.f32 1.442695, %v3289_v7  ;;  %10149 = vrcp.f32 %v3314_v6  ;;  %v3338_v61 = vmul.f32 %v10140_v60, %v10132_v33  ;;  %v10028_v7 = vld [vmem:[%s10592_s17 + $0x78] sm:$0xff]  }
 0x468   : > { %v3317_v15 = vpop.xlane.xlu1 %3316  ;;  %v10944_v9 = vsel %vm2872_vm3, %v10028_v7, 0 }
 0x469   : > { %10151 = vpow2.f32 %v3304_v11  ;;  %v3346_v16 = vpack.c.bf16 %v3338_v61, %v3338_v61  ;;  %v10953_v11 = vsel %vm2872_vm3, %v10029_v10, 0  ;;  %v10030_v61 = vld [vmem:[%s10592_s17 + $0x70] sm:$0xff]  }
 0x46a   : > { %v10142_v62 = vpop.eup %10141  ;;  %10153 = vrcp.f32 %v3317_v15  ;;  %v10959_v15 = vsel %vm2872_vm3, %v10030_v61, 0  ;;  %v10050_v61 = vld [vmem:[%s10592_s17 + $0xe0] sm:$0xff]  }
 0x46b   : > { %9257 = vmatmul.mubr.msk.bf16.vlgmr.msra.gmra.mxu0 %vm3257_vm6, %v3346_v16  ;;  %v3339_v20 = vmul.f32 %v10142_v62, %v10134_v5  ;;  %v10031_v16 = vld [vmem:[%s10592_s17 + $0x28] sm:$0xff]  }
 0x46c   : > { %9267 = vmatpush3.bf16.msra.mxu0 %v3459_v18  ;;  %9268 = vmatprep.mubr.msk.bf16.mxu0 %vm10366_vm2, %v12048_v26  ;;  %v10965_v62 = vsel %vm2872_vm3, %v10031_v16, 0  ;;  %v10032_v18 = vld [vmem:[%s10592_s17 + $0x68] sm:$0xff]   ;;  %v11089_v16 = vsel %vm2872_vm3, %v10050_v61, 0  ;;  %v10068_v61 = vld [vmem:[%s10592_s17 + $0x158] sm:$0xff]  }
 0x46d   : > { %v3347_v3 = vpack.c.bf16 %v3339_v20, %v3339_v20  ;;  %9278 = vmatprep.subr.bf16.mxu0 %v12048_v26  ;;  %v10971_v19 = vsel %vm2872_vm3, %v10032_v18, 0  ;;  %v10033_v20 = vld [vmem:[%s10592_s17 + $0x20] sm:$0xff]   ;;  %v10051_v18 = vld [vmem:[%s10592_s17 + $0x98] sm:$0xff]  }
 0x46e   : > { %v10144_v22 = vpop.eup %10143 }
 0x46f   : > { %9263 = vmatmul.mubr.msk.bf16.vlgmr.msra.gmra.mxu1 %vm3257_vm6, %v3347_v3  ;;  %v3318_v25 = vsel %vm3257_vm6, %v10144_v22, 0.0  ;;  %v10977_v3 = vsel %vm2872_vm3, %v10033_v20, 0  ;;  %v11095_v20 = vsel %vm2872_vm3, %v10051_v18, 0  ;;  %v11207_v18 = vsel %vm2872_vm3, %v10068_v61, 0 }
 0x470   : > { %9273 = vmatpush3.bf16.msra.mxu1 %v3505_v24  ;;  %3319 = vadd.xlane.f32.xlu0 %v3318_v25  ;;  %12115 = vst [vmem:[#allocation46_spill] sm:$0xff] %v11207_v18 }
 0x471   : > { %9274 = vmatprep.mubr.msk.bf16.mxu1 %vm10366_vm2, %v12048_v26  ;;  %9284 = vmatprep.subr.bf16.mxu1 %v12048_v26 }
 0x472   : > { %v10146_v30 = vpop.eup %10145 }
 0x473   : > { %v10148_v4 = vpop.eup %10147  ;;  %v3321_v32 = vsel %vm3257_vm6, %v10146_v30, 0.0 }
 0x474   : > { %v10150_v33 = vpop.eup %10149  ;;  %3322 = vadd.xlane.f32.xlu1 %v3321_v32  ;;  %v3324_v35 = vsel %vm3257_vm6, %v10148_v4, 0.0 }
 0x475   : > { %3325 = vadd.xlane.f32.xlu0 %v3324_v35  ;;  %v3340_v8 = vmul.f32 %v10150_v33, %v10877_v46  ;;  %v10989_v33 = vsel %vm2872_vm3, %v10035_v27, 0 }
 0x476   : > { %v10152_v37 = vpop.eup %10151 }
 0x477   : > { %v10154_v5 = vpop.eup %10153  ;;  %v3348_v38 = vpack.c.bf16 %v3340_v8, %v3340_v8  ;;  %v3327_v39 = vsel %vm3257_vm6, %v10152_v37, 0.0  ;;  %v10995_v8 = vsel %vm2872_vm3, %v10036_v34, 0  ;;  %v10056_v34 = vld [vmem:[%s10592_s17 + $0xc8] sm:$0xff]  }
 0x478   : > { %3328 = vadd.xlane.f32.xlu1 %v3327_v39  ;;  %v3341_v41 = vmul.f32 %v10154_v5, %v10882_v13  ;;  %v2805_v13 = vadd.f32 %v8461_v47, %v10851_v17  ;;  %v10038_v39 = vld [vmem:[%s10592_s17 + $0x50] sm:$0xff]  }
 0x479   : > { %9269 = vmatmul.mubr.msk.bf16.vlgmr.msra.gmra.mxu0 %vm3257_vm6, %v3348_v38 }
 0x47a   : > { %9279 = vmatpush3.bf16.msra.mxu0 %v3551_v42  ;;  %v3349_v14 = vpack.c.bf16 %v3341_v41, %v3341_v41  ;;  %9280 = vmatprep.mubr.msk.bf16.mxu0 %vm10366_vm2, %v12048_v26  ;;  %v3360_v50 = vpack.c.bf16 %v2805_v13, %v2805_v13  ;;  %v10040_v13 = vld [vmem:[%s10592_s17 + $0x48] sm:$0xff]  }
 0x47b   : > { %9290 = vmatprep.subr.bf16.mxu0 %v12048_v26  ;;  %v11023_v48 = vsel %vm2872_vm3, %v10040_v13, 0 }
 0x47c   : > { %9275 = vmatmul.mubr.msk.bf16.vlgmr.msra.gmra.mxu1 %vm3257_vm6, %v3349_v14  ;;  %v3643_v57 = vsel %vm3365_vm4, %v3360_v50, 0 }
 0x47d   : > { %9285 = vmatpush3.bf16.msra.mxu1 %v3597_v43  ;;  %9286 = vmatprep.mubr.msk.bf16.mxu1 %vm10366_vm2, %v12048_v26  ;;  %v11011_v43 = vsel %vm2872_vm3, %v10038_v39, 0  ;;  %v10058_v39 = vld [vmem:[%s10592_s17 + $0xc0] sm:$0xff]  }
 0x47e   : > { %9296 = vmatprep.subr.bf16.mxu1 %v12048_v26 }
 0x4f9   : > { %v3320_v44 = vpop.xlane.xlu0 %3319 }
 0x4fa   : > { %10155 = vrcp.f32 %v3320_v44  ;;  %v10039_v44 = vld [vmem:[%s10592_s17 + $0x8] sm:$0xff]  }
 0x4fd   : > { %v3323_v45 = vpop.xlane.xlu1 %3322 }
 0x4fe   : > { %10157 = vrcp.f32 %v3323_v45  ;;  %v3326_v46 = vpop.xlane.xlu0 %3325 }
 0x4ff   : > { %10159 = vrcp.f32 %v3326_v46 }
 0x501   : > { %v3329_v12 = vpop.xlane.xlu1 %3328 }
 0x502   : > { %10161 = vrcp.f32 %v3329_v12  ;;  %v11017_v12 = vsel %vm2872_vm3, %v10039_v44, 0 }
 0x507   : > { %v10156_v49 = vpop.eup %10155 }
 0x508   : > { %v3342_v52 = vmul.f32 %v10156_v49, %v10144_v22  ;;  %v10034_v22 = vld [vmem:[%s10592_s17 + $0x60] sm:$0xff]  }
 0x509   : > { %v10983_v25 = vsel %vm2872_vm3, %v10034_v22, 0  ;;  %v10041_v49 = vld [vmem:[%s10592_s17] sm:$0xff]   ;;  %v10052_v22 = vld [vmem:[%s10592_s17 + $0xd8] sm:$0xff]  }
 0x50a   : > { %v3350_v54 = vpack.c.bf16 %v3342_v52, %v3342_v52  ;;  %v11029_v50 = vsel %vm2872_vm3, %v10041_v49, 0  ;;  %v11035_v52 = vsel %vm2872_vm3, %v10042_v51, 0  ;;  %v10063_v51 = vld [vmem:[%s10592_s17 + $0x128] sm:$0xff]  }
 0x50b   : > { %v10158_v55 = vpop.eup %10157 }
 0x50c   : > { %v10160_v56 = vpop.eup %10159  ;;  %9281 = vmatmul.mubr.msk.bf16.vlgmr.msra.gmra.mxu0 %vm3257_vm6, %v3350_v54  ;;  %v3343_v58 = vmul.f32 %v10158_v55, %v10146_v30  ;;  %v10043_v54 = vld [vmem:[%s10592_s17 + $0xb8] sm:$0xff]  }
 0x50d   : > { %9291 = vmatpush3.bf16.msra.mxu0 %v3643_v57  ;;  %9292 = vmatprep.mubr.msk.bf16.mxu0 %vm10366_vm2, %v12048_v26  ;;  %v3344_v59 = vmul.f32 %v10160_v56, %v10148_v4  ;;  %v11041_v56 = vsel %vm2872_vm3, %v10043_v54, 0  ;;  %v10044_v57 = vld [vmem:[%s10592_s17 + $0xf8] sm:$0xff]   ;;  %v11177_v54 = vsel %vm2872_vm3, %v10063_v51, 0 }
 0x50e   : > { %v3351_v17 = vpack.c.bf16 %v3343_v58, %v3343_v58  ;;  %9302 = vmatprep.subr.bf16.mxu0 %v12048_v26  ;;  %v11050_v58 = vsel %vm2872_vm3, %v10044_v57, 0  ;;  %12110 = vst [vmem:[#allocation41_spill] sm:$0xff] %v11177_v54 }
 0x50f   : > { %v10162_v63 = vpop.eup %10161  ;;  %v3352_v1 = vpack.c.bf16 %v3344_v59, %v3344_v59 }
 0x510   : > { %9287 = vmatmul.mubr.msk.bf16.vlgmr.msra.gmra.mxu1 %vm3257_vm6, %v3351_v17  ;;  %v3345_v6 = vmul.f32 %v10162_v63, %v10152_v37  ;;  %v10037_v37 = vld [vmem:[%s10592_s17 + $0x10] sm:$0xff]   ;;  %v11065_v63 = vsel %vm2872_vm3, %v10046_v21, 0  ;;  %v10066_v21 = vld [vmem:[%s10592_s17 + $0x160] sm:$0xff]  }
 0x511   : > { %9297 = vmatpush3.bf16.msra.mxu1 %v3689_v0  ;;  %9298 = vmatprep.mubr.msk.bf16.mxu1 %vm10366_vm2, %v12048_v26  ;;  %v11003_v38 = vsel %vm2872_vm3, %v10037_v37, 0  ;;  %v10045_v17 = vld [vmem:[%s10592_s17 + $0xb0] sm:$0xff]   ;;  %v10047_v0 = vld [vmem:[%s10592_s17 + $0xa8] sm:$0xff]  }
 0x512   : > { %9322 = vmatprep.subr.bf16.mxu1 %v12048_v26  ;;  %v3353_v60 = vpack.c.bf16 %v3345_v6, %v3345_v6  ;;  %v11059_v59 = vsel %vm2872_vm3, %v10045_v17, 0  ;;  %v10048_v6 = vld [vmem:[%s10592_s17 + $0xe8] sm:$0xff]  }
 0x513   : > { %v11077_v7 = vsel %vm2872_vm3, %v10048_v6, 0  ;;  %v10067_v6 = vld [vmem:[%s10592_s17 + $0x118] sm:$0xff]  }
 0x514   : > { %9293 = vmatmul.mubr.msk.bf16.vlgmr.msra.gmra.mxu0 %vm3257_vm6, %v3352_v1  ;;  %v11071_v1 = vsel %vm2872_vm3, %v10047_v0, 0  ;;  %v11195_v0 = vsel %vm2872_vm3, %v10066_v21, 0 }
 0x515   : > { %9303 = vmatpush3.bf16.xpose.msra.mxu0 %v10935_v2  ;;  %9318 = vmatprep.mubr.msk.bf16.mxu0 %vm10366_vm2, %v12048_v26  ;;  %12113 = vst [vmem:[#allocation44_spill] sm:$0xff] %v11195_v0 }
 0x516   : > { %9304 = vmatprep.subr.bf16.mxu0 %v12048_v26 }
 0x518   : > { %9299 = vmatmul.mubr.msk.bf16.vlgmr.msra.gmra.mxu1 %vm3257_vm6, %v3353_v60  ;;  %v10049_v60 = vld [vmem:[%s10592_s17 + $0xa0] sm:$0xff]  }
 0x519   : > { %9323 = vmatpush3.bf16.xpose.msra.mxu1 %v10944_v9  ;;  %9338 = vmatprep.mubr.msk.bf16.mxu1 %vm10366_vm2, %v12048_v26  ;;  %v11083_v10 = vsel %vm2872_vm3, %v10049_v60, 0  ;;  %v11201_v60 = vsel %vm2872_vm3, %v10067_v6, 0 }
 0x51a   : > { %9324 = vmatprep.subr.bf16.mxu1 %v12048_v26  ;;  %12114 = vst [vmem:[#allocation45_spill] sm:$0xff] %v11201_v60 }
 0x51d   : > { %9305 = vmatpush3.bf16.xpose.msra.mxu0 %v10953_v11 }
 0x51e   : > { %9306 = vmatprep.subr.bf16.mxu0 %v12048_v26 }
 0x521   : > { %9325 = vmatpush3.bf16.xpose.msra.mxu1 %v10959_v15 }
 0x522   : > { %9326 = vmatprep.subr.bf16.mxu1 %v12048_v26 }
 0x525   : > { %9307 = vmatpush3.bf16.xpose.msra.mxu0 %v10965_v62 }
 0x526   : > { %9308 = vmatprep.subr.bf16.mxu0 %v12048_v26 }
 0x529   : > { %9327 = vmatpush3.bf16.xpose.msra.mxu1 %v10971_v19 }
 0x52a   : > { %9328 = vmatprep.subr.bf16.mxu1 %v12048_v26 }
 0x52b   : > { %v3403_v23 = vpop.f32.mrf.mxu0 }
 0x52c   : > { %v3731_v55 = vpack.c.bf16 %v3403_v23, %v3403_v23  ;;  %v11101_v23 = vsel %vm2872_vm3, %v10052_v22, 0  ;;  %v10069_v22 = vld [vmem:[%s10592_s17 + $0x110] sm:$0xff]  }
 0x52d   : > { %9309 = vmatpush3.bf16.xpose.msra.mxu0 %v10977_v3  ;;  %v9258_v24 = vpop.f32.mrf.mxu0 }
 0x52e   : > { %9310 = vmatprep.subr.bf16.mxu0 %v12048_v26  ;;  %v10053_v24 = vld [vmem:[%s10592_s17 + $0x90] sm:$0xff]  }
 0x52f   : > { %v3406_v29 = vpop.f32.mrf.mxu0  ;;  %v3449_v30 = vpop.f32.mrf.mxu1  ;;  %v11107_v27 = vsel %vm2872_vm3, %v10053_v24, 0  ;;  %v11213_v24 = vsel %vm2872_vm3, %v10069_v22, 0 }
 0x530   : > { %v3732_v53 = vpack.c.bf16 %v3449_v30, %v3449_v30  ;;  %v10054_v29 = vld [vmem:[%s10592_s17 + $0xd0] sm:$0xff]   ;;  %12116 = vst [vmem:[#allocation47_spill] sm:$0xff] %v11213_v24 }
 0x531   : > { %9329 = vmatpush3.bf16.xpose.msra.mxu1 %v10983_v25  ;;  %v9259_v4 = vpop.f32.mrf.mxu0  ;;  %v9264_v32 = vpop.f32.mrf.mxu1  ;;  %v11113_v30 = vsel %vm2872_vm3, %v10054_v29, 0  ;;  %v10070_v29 = vld [vmem:[%s10592_s17 + $0x150] sm:$0xff]  }
 0x532   : > { %9330 = vmatprep.subr.bf16.mxu1 %v12048_v26  ;;  %v10055_v4 = vld [vmem:[%s10592_s17 + $0x88] sm:$0xff]  }
 0x533   : > { %v3452_v35 = vpop.f32.mrf.mxu1  ;;  %v11119_v32 = vsel %vm2872_vm3, %v10055_v4, 0  ;;  %v11219_v4 = vsel %vm2872_vm3, %v10070_v29, 0 }
 0x534   : > { %v11125_v35 = vsel %vm2872_vm3, %v10056_v34, 0  ;;  %12117 = vst [vmem:[#allocation48_spill] sm:$0xff] %v11219_v4  ;;  %v10071_v34 = vld [vmem:[%s10592_s17 + $0x108] sm:$0xff]  }
 0x535   : > { %9311 = vmatpush3.bf16.xpose.msra.mxu0 %v10989_v33  ;;  %v9265_v36 = vpop.f32.mrf.mxu1 }
 0x536   : > { %9312 = vmatprep.subr.bf16.mxu0 %v12048_v26  ;;  %v10057_v36 = vld [vmem:[%s10592_s17 + $0x80] sm:$0xff]  }
 0x537   : > { %v11131_v37 = vsel %vm2872_vm3, %v10057_v36, 0  ;;  %v11225_v36 = vsel %vm2872_vm3, %v10071_v34, 0  ;;  %v10076_v34 = vld [vmem:[%s10592_s17 + $0x1f8] sm:$0xff]  }
 0x538   : > { %12104 = vst [vmem:[#allocation35_spill] sm:$0xff] %v11131_v37  ;;  %12118 = vst [vmem:[#allocation49_spill] sm:$0xff] %v11225_v36 }
 0x539   : > { %v10999_v5 = vpop.f32.mrf.mxu0  ;;  %9331 = vmatpush3.bf16.xpose.msra.mxu1 %v10995_v8 }
 0x53a   : > { %9332 = vmatprep.subr.bf16.mxu1 %v12048_v26 }
 0x53b   : > { %v9270_v40 = vpop.f32.mrf.mxu0 }
 0x53c   : > { %v11007_v41 = vpop.f32.mrf.mxu1  ;;  %v11137_v40 = vsel %vm2872_vm3, %v10058_v39, 0  ;;  %v10072_v39 = vld [vmem:[%s10592_s17 + $0x148] sm:$0xff]  }
 0x53d   : > { %v3498_v42 = vpop.f32.mrf.mxu0  ;;  %9313 = vmatpush3.bf16.xpose.msra.mxu0 %v11003_v38  ;;  %12105 = vst [vmem:[#allocation36_spill] sm:$0xff] %v11137_v40 }
 0x53e   : > { %v9276_v14 = vpop.f32.mrf.mxu1  ;;  %9314 = vmatprep.subr.bf16.mxu0 %v12048_v26  ;;  %v10059_v42 = vld [vmem:[%s10592_s17 + $0x138] sm:$0xff]  }
 0x53f   : > { %v9271_v45 = vpop.f32.mrf.mxu0  ;;  %v3733_v14 = vpack.c.bf16 %v10999_v5, %v10999_v5  ;;  %v11145_v44 = vsel %vm2872_vm3, %v10059_v42, 0  ;;  %v11231_v42 = vsel %vm2872_vm3, %v10072_v39, 0 }
 0x540   : > { %v3544_v46 = vpop.f32.mrf.mxu1  ;;  %12106 = vst [vmem:[#allocation37_spill] sm:$0xff] %v11145_v44  ;;  %v10060_v45 = vld [vmem:[%s10592_s17 + $0x178] sm:$0xff]   ;;  %12119 = vst [vmem:[#allocation50_spill] sm:$0xff] %v11231_v42 }
 0x541   : > { %9333 = vmatpush3.bf16.xpose.msra.mxu1 %v11011_v43  ;;  %v3734_v46 = vpack.c.bf16 %v11007_v41, %v11007_v41  ;;  %v11156_v5 = vsel %vm2872_vm3, %v10060_v45, 0  ;;  %v10062_v41 = vld [vmem:[%s10592_s17 + $0x170] sm:$0xff]  }
 0x542   : > { %v9277_v47 = vpop.f32.mrf.mxu1  ;;  %9334 = vmatprep.subr.bf16.mxu1 %v12048_v26  ;;  %12107 = vst [vmem:[#allocation38_spill] sm:$0xff] %v11156_v5  ;;  %v11171_v49 = vsel %vm2872_vm3, %v10062_v41, 0 }
 0x543   : > { %v10061_v47 = vld [vmem:[%s10592_s17 + $0x130] sm:$0xff]   ;;  %12109 = vst [vmem:[#allocation40_spill] sm:$0xff] %v11171_v49 }
 0x544   : > { %v11165_v13 = vsel %vm2872_vm3, %v10061_v47, 0 }
 0x545   : > { %9315 = vmatpush3.bf16.xpose.msra.mxu0 %v11017_v12  ;;  %12108 = vst [vmem:[#allocation39_spill] sm:$0xff] %v11165_v13 }
 0x546   : > { %9316 = vmatprep.subr.bf16.mxu0 %v12048_v26 }
 0x549   : > { %9335 = vmatpush3.bf16.xpose.msra.mxu1 %v11023_v48 }
 0x54a   : > { %9336 = vmatprep.subr.bf16.mxu1 %v12048_v26 }
 0x54d   : > { %9317 = vmatpush3.bf16.xpose.msra.mxu0 %v11029_v50 }
 0x54e   : > { %9342 = vmatprep.subr.bf16.mxu0 %v12048_v26 }
 0x551   : > { %9337 = vmatpush3.bf16.xpose.msra.mxu1 %v11035_v52 }
 0x552   : > { %9362 = vmatprep.subr.bf16.mxu1 %v12048_v26 }
 0x554   : > { %9319 = vmatmul.mubr.msk.bf16.vlgmr.msra.gmra.mxu0 %vm2872_vm3, %v3731_v55  ;;  %v10064_v55 = vld [vmem:[%s10592_s17 + $0x168] sm:$0xff]  }
 0x555   : > { %9343 = vmatpush3.bf16.xpose.msra.mxu0 %v11041_v56  ;;  %9358 = vmatprep.mubr.msk.bf16.mxu0 %vm10366_vm2, %v12048_v26  ;;  %v11183_v57 = vsel %vm2872_vm3, %v10064_v55, 0  ;;  %v10075_v55 = vld [vmem:[%s10592_s17 + $0x1b8] sm:$0xff]  }
 0x556   : > { %9344 = vmatprep.subr.bf16.mxu0 %v12048_v26  ;;  %12111 = vst [vmem:[#allocation42_spill] sm:$0xff] %v11183_v57  ;;  %v11249_v29 = vsel %vm2872_vm3, %v10075_v55, 0  ;;  %v11260_v55 = vsel %vm2872_vm3, %v10076_v34, 0 }
 0x557   : > { %12122 = vst [vmem:[#allocation53_spill] sm:$0xff] %v11249_v29  ;;  %12123 = vst [vmem:[#allocation54_spill] sm:$0xff] %v11260_v55 }
 0x558   : > { %9339 = vmatmul.mubr.msk.bf16.vlgmr.msra.gmra.mxu1 %vm2872_vm3, %v3732_v53  ;;  %v10065_v53 = vld [vmem:[%s10592_s17 + $0x120] sm:$0xff]  }
 0x559   : > { %9363 = vmatpush3.bf16.xpose.msra.mxu1 %v11050_v58  ;;  %9378 = vmatprep.mubr.msk.bf16.mxu1 %vm10366_vm2, %v12048_v26  ;;  %v11189_v17 = vsel %vm2872_vm3, %v10065_v53, 0 }
 0x55a   : > { %9364 = vmatprep.subr.bf16.mxu1 %v12048_v26  ;;  %12112 = vst [vmem:[#allocation43_spill] sm:$0xff] %v11189_v17 }
 0x55d   : > { %9345 = vmatpush3.bf16.xpose.msra.mxu0 %v11059_v59 }
 0x55e   : > { %9346 = vmatprep.subr.bf16.mxu0 %v12048_v26 }
 0x561   : > { %9365 = vmatpush3.bf16.xpose.msra.mxu1 %v11065_v63 }
 0x562   : > { %9366 = vmatprep.subr.bf16.mxu1 %v12048_v26 }
 0x565   : > { %9347 = vmatpush3.bf16.xpose.msra.mxu0 %v11071_v1 }
 0x566   : > { %9348 = vmatprep.subr.bf16.mxu0 %v12048_v26 }
 0x569   : > { %9367 = vmatpush3.bf16.xpose.msra.mxu1 %v11077_v7 }
 0x56a   : > { %9368 = vmatprep.subr.bf16.mxu1 %v12048_v26 }
 0x56d   : > { %9349 = vmatpush3.bf16.xpose.msra.mxu0 %v11083_v10 }
 0x56e   : > { %9350 = vmatprep.subr.bf16.mxu0 %v12048_v26 }
 0x571   : > { %9369 = vmatpush3.bf16.xpose.msra.mxu1 %v11089_v16 }
 0x572   : > { %9370 = vmatprep.subr.bf16.mxu1 %v12048_v26 }
 0x575   : > { %9351 = vmatpush3.bf16.xpose.msra.mxu0 %v11095_v20 }
 0x576   : > { %9352 = vmatprep.subr.bf16.mxu0 %v12048_v26 }
 0x579   : > { %9371 = vmatpush3.bf16.xpose.msra.mxu1 %v11101_v23 }
 0x57a   : > { %9372 = vmatprep.subr.bf16.mxu1 %v12048_v26 }
 0x57d   : > { %9353 = vmatpush3.bf16.xpose.msra.mxu0 %v11107_v27 }
 0x57e   : > { %9354 = vmatprep.subr.bf16.mxu0 %v12048_v26 }
 0x581   : > { %9373 = vmatpush3.bf16.xpose.msra.mxu1 %v11113_v30 }
 0x582   : > { %9374 = vmatprep.subr.bf16.mxu1 %v12048_v26 }
 0x585   : > { %9355 = vmatpush3.bf16.xpose.msra.mxu0 %v11119_v32 }
 0x586   : > { %9356 = vmatprep.subr.bf16.mxu0 %v12048_v26 }
 0x589   : > { %9375 = vmatpush3.bf16.xpose.msra.mxu1 %v11125_v35 }
 0x58a   : > { %9376 = vmatprep.subr.bf16.mxu1 %v12048_v26 }
 0x58d   : > { %9357 = vmatpush3.bf16.xpose.msra.mxu0 %v11131_v37 }
 0x58e   : > { %9382 = vmatprep.subr.bf16.mxu0 %v12048_v26 }
 0x591   : > { %9377 = vmatpush3.bf16.xpose.msra.mxu1 %v11137_v40 }
 0x592   : > { %9402 = vmatprep.subr.bf16.mxu1 %v12048_v26 }
 0x594   : > { %9359 = vmatmul.mubr.msk.bf16.vlgmr.msra.gmra.mxu0 %vm2872_vm3, %v3733_v14  ;;  %v10073_v14 = vld [vmem:[%s10592_s17 + $0x100] sm:$0xff]  }
 0x595   : > { %9383 = vmatpush3.bf16.xpose.msra.mxu0 %v11145_v44  ;;  %9398 = vmatprep.mubr.msk.bf16.mxu0 %vm10366_vm2, %v12048_v26  ;;  %v11237_v45 = vsel %vm2872_vm3, %v10073_v14, 0 }
 0x596   : > { %9384 = vmatprep.subr.bf16.mxu0 %v12048_v26  ;;  %12120 = vst [vmem:[#allocation51_spill] sm:$0xff] %v11237_v45 }
 0x598   : > { %9379 = vmatmul.mubr.msk.bf16.vlgmr.msra.gmra.mxu1 %vm2872_vm3, %v3734_v46  ;;  %v10074_v46 = vld [vmem:[%s10592_s17 + $0x140] sm:$0xff]  }
 0x599   : > { %9403 = vmatpush3.bf16.xpose.msra.mxu1 %v11156_v5  ;;  %9418 = vmatprep.mubr.msk.bf16.mxu1 %vm10366_vm2, %v12048_v26  ;;  %v11243_v51 = vsel %vm2872_vm3, %v10074_v46, 0 }
 0x59a   : > { %9404 = vmatprep.subr.bf16.mxu1 %v12048_v26  ;;  %12121 = vst [vmem:[#allocation52_spill] sm:$0xff] %v11243_v51 }
 0x59d   : > { %9385 = vmatpush3.bf16.xpose.msra.mxu0 %v11165_v13 }
 0x59e   : > { %9386 = vmatprep.subr.bf16.mxu0 %v12048_v26 }
 0x5a1   : > { %9405 = vmatpush3.bf16.xpose.msra.mxu1 %v11171_v49 }
 0x5a2   : > { %9406 = vmatprep.subr.bf16.mxu1 %v12048_v26 }
 0x5a5   : > { %9387 = vmatpush3.bf16.xpose.msra.mxu0 %v11177_v54 }
 0x5a6   : > { %9388 = vmatprep.subr.bf16.mxu0 %v12048_v26 }
 0x5a9   : > { %9407 = vmatpush3.bf16.xpose.msra.mxu1 %v11183_v57  ;;  %v12138_v57 = vmov 0.0  }
 0x5aa   : > { %9408 = vmatprep.subr.bf16.mxu1 %v12048_v26 }
 0x5ad   : > { %9389 = vmatpush3.bf16.xpose.msra.mxu0 %v11189_v17 }
 0x5ae   : > { %9390 = vmatprep.subr.bf16.mxu0 %v12048_v26 }
 0x5b1   : > { %9409 = vmatpush3.bf16.xpose.msra.mxu1 %v11195_v0  ;;  %v10228_v0 = vld [vmem:[%s10583_s1 + $0x1] ss:$0 sm:$0xff] }
 0x5b2   : > { %9410 = vmatprep.subr.bf16.mxu1 %v12048_v26 }
 0x5b5   : > { %9391 = vmatpush3.bf16.xpose.msra.mxu0 %v11201_v60 }
 0x5b6   : > { %9392 = vmatprep.subr.bf16.mxu0 %v12048_v26 }
 0x5b9   : > { %9411 = vmatpush3.bf16.xpose.msra.mxu1 %v11207_v18 }
 0x5ba   : > { %9412 = vmatprep.subr.bf16.mxu1 %v12048_v26 }
 0x5bd   : > { %9393 = vmatpush3.bf16.xpose.msra.mxu0 %v11213_v24 }
 0x5be   : > { %9394 = vmatprep.subr.bf16.mxu0 %v12048_v26 }
 0x5c1   : > { %9413 = vmatpush3.bf16.xpose.msra.mxu1 %v11219_v4 }
 0x5c2   : > { %9414 = vmatprep.subr.bf16.mxu1 %v12048_v26 }
 0x5c5   : > { %9395 = vmatpush3.bf16.xpose.msra.mxu0 %v11225_v36 }
 0x5c6   : > { %9396 = vmatprep.subr.bf16.mxu0 %v12048_v26 }
 0x5c9   : > { %9415 = vmatpush3.bf16.xpose.msra.mxu1 %v11231_v42 }
 0x5ca   : > { %9416 = vmatprep.subr.bf16.mxu1 %v12048_v26 }
 0x5cc   : > { %v3587_v47 = vpop.f32.mrf.mxu0 }
 0x5cd   : > { %9397 = vmatpush3.bf16.xpose.msra.mxu0 %v11237_v45  ;;  %v3735_v6 = vpack.c.bf16 %v3587_v47, %v3587_v47 }
 0x5ce   : > { %v9282_v41 = vpop.f32.mrf.mxu0  ;;  %9422 = vmatprep.subr.bf16.mxu0 %v12048_v26 }
 0x5d0   : > { %v3590_v53 = vpop.f32.mrf.mxu0  ;;  %v3633_v21 = vpop.f32.mrf.mxu1 }
 0x5d1   : > { %9417 = vmatpush3.bf16.xpose.msra.mxu1 %v11243_v51  ;;  %v3736_v46 = vpack.c.bf16 %v3633_v21, %v3633_v21  ;;  %v10077_v53 = vld [vmem:[%s10592_s17 + $0x1b0] sm:$0xff]  }
 0x5d2   : > { %v9283_v61 = vpop.f32.mrf.mxu0  ;;  %v9288_v22 = vpop.f32.mrf.mxu1  ;;  %9442 = vmatprep.subr.bf16.mxu1 %v12048_v26  ;;  %v11271_v34 = vsel %vm2872_vm3, %v10077_v53, 0 }
 0x5d3   : > { %12124 = vst [vmem:[#allocation55_spill] sm:$0xff] %v11271_v34 }
 0x5d4   : > { %9399 = vmatmul.mubr.msk.bf16.vlgmr.msra.gmra.mxu0 %vm2872_vm3, %v3735_v6  ;;  %v3636_v39 = vpop.f32.mrf.mxu1  ;;  %v11254_v14 = vpop.f32.mrf.mxu0 }
 0x5d5   : > { %9423 = vmatpush3.bf16.xpose.msra.mxu0 %v11249_v29  ;;  %9438 = vmatprep.mubr.msk.bf16.mxu0 %vm10366_vm2, %v12048_v26  ;;  %v10078_v39 = vld [vmem:[%s10592_s17 + $0x1f0] sm:$0xff]  }
 0x5d6   : > { %v9289_v47 = vpop.f32.mrf.mxu1  ;;  %v9294_v41 = vpop.f32.mrf.mxu0  ;;  %9424 = vmatprep.subr.bf16.mxu0 %v12048_v26 }
 0x5d7   : > { %v11277_v41 = vsel %vm2872_vm3, %v10078_v39, 0  ;;  %v10081_v39 = vld [vmem:[%s10592_s17 + $0x1a0] sm:$0xff]  }
 0x5d8   : > { %9419 = vmatmul.mubr.msk.bf16.vlgmr.msra.gmra.mxu1 %vm2872_vm3, %v3736_v46  ;;  %v3682_v6 = vpop.f32.mrf.mxu0  ;;  %v11265_v61 = vpop.f32.mrf.mxu1  ;;  %12125 = vst [vmem:[#allocation56_spill] sm:$0xff] %v11277_v41 }
 0x5d9   : > { %9443 = vmatpush3.bf16.xpose.msra.mxu1 %v11260_v55  ;;  %9458 = vmatprep.mubr.msk.bf16.mxu1 %vm10366_vm2, %v12048_v26  ;;  %v10079_v6 = vld [vmem:[%s10592_s17 + $0x1a8] sm:$0xff]  }
 0x5da   : > { %v9295_v21 = vpop.f32.mrf.mxu0  ;;  %v9300_v22 = vpop.f32.mrf.mxu1  ;;  %9444 = vmatprep.subr.bf16.mxu1 %v12048_v26  ;;  %v11283_v53 = vsel %vm2872_vm3, %v10079_v6, 0 }
 0x5db   : > { %12126 = vst [vmem:[#allocation57_spill] sm:$0xff] %v11283_v53  ;;  %v10080_v21 = vld [vmem:[%s10592_s17 + $0x1e8] sm:$0xff]  }
 0x5dc   : > { %v3728_v47 = vpop.f32.mrf.mxu1  ;;  %v11289_v22 = vsel %vm2872_vm3, %v10080_v21, 0  ;;  %v10083_v21 = vld [vmem:[%s10592_s17 + $0x198] sm:$0xff]  }
 0x5dd   : > { %9425 = vmatpush3.bf16.xpose.msra.mxu0 %v11271_v34  ;;  %12127 = vst [vmem:[#allocation58_spill] sm:$0xff] %v11289_v22  ;;  %v11295_v47 = vsel %vm2872_vm3, %v10081_v39, 0  ;;  %v11307_v28 = vsel %vm2872_vm3, %v10083_v21, 0  ;;  %v10084_v39 = vld [vmem:[%s10592_s17 + $0x1d8] sm:$0xff]   ;;  %v10086_v21 = vld [vmem:[%s10592_s17 + $0x1d0] sm:$0xff]  }
 0x5de   : > { %v9301_v46 = vpop.f32.mrf.mxu1  ;;  %9426 = vmatprep.subr.bf16.mxu0 %v12048_v26  ;;  %12128 = vst [vmem:[#allocation59_spill] sm:$0xff] %v11295_v47  ;;  %12130 = vst [vmem:[#allocation61_spill] sm:$0xff] %v11307_v28 }
 0x5df   : > { %v10082_v46 = vld [vmem:[%s10592_s17 + $0x1e0] sm:$0xff]  }
 0x5e0   : > { %v11301_v6 = vsel %vm2872_vm3, %v10082_v46, 0  ;;  %v10085_v46 = vld [vmem:[%s10592_s17 + $0x190] sm:$0xff]  }
 0x5e1   : > { %9445 = vmatpush3.bf16.xpose.msra.mxu1 %v11277_v41  ;;  %12129 = vst [vmem:[#allocation60_spill] sm:$0xff] %v11301_v6 }
 0x5e2   : > { %9446 = vmatprep.subr.bf16.mxu1 %v12048_v26 }
 0x5e5   : > { %9427 = vmatpush3.bf16.xpose.msra.mxu0 %v11283_v53 }
 0x5e6   : > { %9428 = vmatprep.subr.bf16.mxu0 %v12048_v26 }
 0x5e9   : > { %9447 = vmatpush3.bf16.xpose.msra.mxu1 %v11289_v22 }
 0x5ea   : > { %9448 = vmatprep.subr.bf16.mxu1 %v12048_v26 }
 0x5ed   : > { %9429 = vmatpush3.bf16.xpose.msra.mxu0 %v11295_v47  ;;  %v11313_v47 = vsel %vm2872_vm3, %v10084_v39, 0  ;;  %v10087_v39 = vld [vmem:[%s10592_s17 + $0x188] sm:$0xff]  }
 0x5ee   : > { %9430 = vmatprep.subr.bf16.mxu0 %v12048_v26  ;;  %12131 = vst [vmem:[#allocation62_spill] sm:$0xff] %v11313_v47  ;;  %v11331_v22 = vsel %vm2872_vm3, %v10087_v39, 0  ;;  %v10090_v39 = vld [vmem:[%s10592_s17 + $0x1c0] sm:$0xff]  }
 0x5ef   : > { %12134 = vst [vmem:[#allocation65_spill] sm:$0xff] %v11331_v22 }
 0x5f1   : > { %9449 = vmatpush3.bf16.xpose.msra.mxu1 %v11301_v6  ;;  %v11319_v6 = vsel %vm2872_vm3, %v10085_v46, 0  ;;  %v10088_v46 = vld [vmem:[%s10592_s17 + $0x1c8] sm:$0xff]  }
 0x5f2   : > { %9450 = vmatprep.subr.bf16.mxu1 %v12048_v26  ;;  %12132 = vst [vmem:[#allocation63_spill] sm:$0xff] %v11319_v6 }
 0x5f5   : > { %9431 = vmatpush3.bf16.xpose.msra.mxu0 %v11307_v28  ;;  %v11325_v28 = vsel %vm2872_vm3, %v10086_v21, 0  ;;  %v10089_v21 = vld [vmem:[%s10592_s17 + $0x180] sm:$0xff]   ;;  %s12177_s17 = sld [smem:[#allocation18_spill]] (!%p8621_p5) }
 0x5f6   : > { %9432 = vmatprep.subr.bf16.mxu0 %v12048_v26  ;;  %12133 = vst [vmem:[#allocation64_spill] sm:$0xff] %v11325_v28 }
 0x5f9   : > { %9451 = vmatpush3.bf16.xpose.msra.mxu1 %v11313_v47  ;;  %v11337_v47 = vsel %vm2872_vm3, %v10088_v46, 0  ;;  %v3737_v46 = vpack.c.bf16 %v11254_v14, %v11254_v14 }
 0x5fa   : > { %9452 = vmatprep.subr.bf16.mxu1 %v12048_v26  ;;  %12135 = vst [vmem:[#allocation66_spill] sm:$0xff] %v11337_v47 }
 0x5fd   : > { %9433 = vmatpush3.bf16.xpose.msra.mxu0 %v11319_v6  ;;  %v11343_v6 = vsel %vm2872_vm3, %v10089_v21, 0 }
 0x5fe   : > { %9434 = vmatprep.subr.bf16.mxu0 %v12048_v26  ;;  %12136 = vst [vmem:[#allocation67_spill] sm:$0xff] %v11343_v6 }
 0x601   : > { %9453 = vmatpush3.bf16.xpose.msra.mxu1 %v11325_v28  ;;  %v11349_v28 = vsel %vm2872_vm3, %v10090_v39, 0  ;;  %v1400_v39 = vld [vmem:[#allocation2 + $0x8] sm:$0xff] }
 0x602   : > { %9454 = vmatprep.subr.bf16.mxu1 %v12048_v26  ;;  %12137 = vst [vmem:[#allocation68_spill] sm:$0xff] %v11349_v28  ;;  %v11364_v53 = vpack.c.bf16 %v1400_v39, %v1400_v39  ;;  %v10209_v39 = vld [vmem:[%s10571_s16 + $0x30] sm:$0xff]  }
 0x605   : > { %9435 = vmatpush3.bf16.xpose.msra.mxu0 %v11331_v22 }
 0x606   : > { %9436 = vmatprep.subr.bf16.mxu0 %v12048_v26 }
 0x609   : > { %9455 = vmatpush3.bf16.xpose.msra.mxu1 %v11337_v47  ;;  %v10203_v47 = vld [vmem:[%s10571_s16] sm:$0xff]  }
 0x60a   : > { %9456 = vmatprep.subr.bf16.mxu1 %v12048_v26 }
 0x60d   : > { %9437 = vmatpush3.bf16.xpose.msra.mxu0 %v11343_v6  ;;  %v3738_v6 = vpack.c.bf16 %v11265_v61, %v11265_v61 }
 0x60e   : > { %9462 = vmatprep.subr.bf16.mxu0 %v12048_v26 }
 0x611   : > { %9457 = vmatpush3.bf16.xpose.msra.mxu1 %v11349_v28 }
 0x612   : > { %9468 = vmatprep.subr.bf16.mxu1 %v12048_v26 }
 0x614   : > { %v3840_v21 = vpop.f32.mrf.mxu0  ;;  %9439 = vmatmul.mubr.msk.bf16.vlgmr.msra.gmra.mxu0 %vm2872_vm3, %v3737_v46 }
 0x615   : > { %9463 = vmatpush3.bf16.xpose.msra.mxu0 %v10203_v47  ;;  %9464 = vmatprep.mubr.msk.bf16.mxu0 %vm10366_vm2, %v12048_v26  ;;  %v10204_v47 = vld [vmem:[%s10571_s16 + $0x8] sm:$0xff]  }
 0x616   : > { %v9320_v28 = vpop.f32.mrf.mxu0  ;;  %9474 = vmatprep.subr.bf16.mxu0 %v12048_v26 }
 0x618   : > { %v3843_v14 = vpop.f32.mrf.mxu0  ;;  %v3947_v22 = vpop.f32.mrf.mxu1  ;;  %9459 = vmatmul.mubr.msk.bf16.vlgmr.msra.gmra.mxu1 %vm2872_vm3, %v3738_v6  ;;  %v10207_v6 = vld [vmem:[%s10571_s16 + $0x20] sm:$0xff]  }
 0x619   : > { %v11366_v46 = vadd.f32 %v3947_v22, %v3840_v21  ;;  %9469 = vmatpush3.bf16.xpose.msra.mxu1 %v10204_v47  ;;  %9470 = vmatprep.mubr.msk.bf16.mxu1 %vm10366_vm2, %v12048_v26  ;;  %v10205_v14 = vld [vmem:[%s10571_s16 + $0x10] sm:$0xff]   ;;  %v10208_v21 = vld [vmem:[%s10571_s16 + $0x28] sm:$0xff]   ;;  %v10210_v47 = vld [vmem:[%s10571_s16 + $0x38] sm:$0xff]  }
 0x61a   : > { %v9321_v41 = vpop.f32.mrf.mxu0  ;;  %v9340_v61 = vpop.f32.mrf.mxu1  ;;  %9480 = vmatprep.subr.bf16.mxu1 %v12048_v26 }
 0x61b   : > { %v10206_v41 = vld [vmem:[%s10571_s16 + $0x18] sm:$0xff]   ;;  %v10211_v61 = vld [vmem:[%s12101_s18] sm:$0xff]   ;;  %s12183_s16 = sld [smem:[#allocation19_spill]] (!%p8621_p5) }
 0x61c   : > { %v3950_v28 = vpop.f32.mrf.mxu1  ;;  %9465 = vmatmul.mubr.bf16.vlgmr.msra.gmra.mxu0 %v11364_v53 }
 0x61d   : > { %9475 = vmatpush3.bf16.xpose.msra.mxu0 %v10205_v14  ;;  %9476 = vmatprep.mubr.msk.bf16.mxu0 %vm10366_vm2, %v12048_v26  ;;  %v10212_v28 = vld [vmem:[%s12101_s18 + $0x8] sm:$0xff]   ;;  %v10213_v14 = vld [vmem:[%s12101_s18 + $0x10] sm:$0xff]  }
 0x61e   : > { %v9341_v22 = vpop.f32.mrf.mxu1  ;;  %9486 = vmatprep.subr.bf16.mxu0 %v12048_v26 }
 0x61f   : > { %v10214_v22 = vld [vmem:[%s12101_s18 + $0x18] sm:$0xff]  }
 0x620   : > { %9471 = vmatmul.mubr.bf16.vlgmr.msra.gmra.mxu1 %v11364_v53 }
 0x621   : > { %9481 = vmatpush3.bf16.xpose.msra.mxu1 %v10206_v41  ;;  %9482 = vmatprep.mubr.msk.bf16.mxu1 %vm10366_vm2, %v12048_v26  ;;  %v10215_v41 = vld [vmem:[%s12101_s18 + $0x20] sm:$0xff]  }
 0x622   : > { %9492 = vmatprep.subr.bf16.mxu1 %v12048_v26 }
 0x624   : > { %9477 = vmatmul.mubr.bf16.vlgmr.msra.gmra.mxu0 %v11364_v53 }
 0x625   : > { %9487 = vmatpush3.bf16.xpose.msra.mxu0 %v10207_v6  ;;  %9488 = vmatprep.mubr.msk.bf16.mxu0 %vm10366_vm2, %v12048_v26  ;;  %v10216_v6 = vld [vmem:[%s12101_s18 + $0x28] sm:$0xff]  }
 0x626   : > { %9498 = vmatprep.subr.bf16.mxu0 %v12048_v26 }
 0x628   : > { %9483 = vmatmul.mubr.bf16.vlgmr.msra.gmra.mxu1 %v11364_v53 }
 0x629   : > { %9493 = vmatpush3.bf16.xpose.msra.mxu1 %v10208_v21  ;;  %9494 = vmatprep.mubr.msk.bf16.mxu1 %vm10366_vm2, %v12048_v26  ;;  %v10217_v21 = vld [vmem:[%s12101_s18 + $0x30] sm:$0xff]  }
 0x62a   : > { %9504 = vmatprep.subr.bf16.mxu1 %v12048_v26 }
 0x62c   : > { %9489 = vmatmul.mubr.bf16.vlgmr.msra.gmra.mxu0 %v11364_v53 }
 0x62d   : > { %9499 = vmatpush3.bf16.xpose.msra.mxu0 %v10209_v39  ;;  %9500 = vmatprep.mubr.msk.bf16.mxu0 %vm10366_vm2, %v12048_v26  ;;  %v10218_v39 = vld [vmem:[%s12101_s18 + $0x38] sm:$0xff]   ;;  %s10375_s18 = smov (!%p8621_p5), 32  }
 0x62e   : > { %9510 = vmatprep.subr.bf16.mxu0 %v12048_v26 }
 0x630   : > { %9495 = vmatmul.mubr.bf16.vlgmr.msra.gmra.mxu1 %v11364_v53 }
 0x631   : > { %9505 = vmatpush3.bf16.xpose.msra.mxu1 %v10210_v47  ;;  %9506 = vmatprep.mubr.msk.bf16.mxu1 %vm10366_vm2, %v12048_v26 }
 0x632   : > { %9516 = vmatprep.subr.bf16.mxu1 %v12048_v26 }
 0x634   : > { %9501 = vmatmul.mubr.bf16.vlgmr.msra.gmra.mxu0 %v11364_v53 }
 0x635   : > { %9511 = vmatpush3.bf16.xpose.msra.mxu0 %v10211_v61  ;;  %9512 = vmatprep.mubr.msk.bf16.mxu0 %vm10366_vm2, %v12048_v26 }
 0x636   : > { %9522 = vmatprep.subr.bf16.mxu0 %v12048_v26 }
 0x638   : > { %9507 = vmatmul.mubr.bf16.vlgmr.msra.gmra.mxu1 %v11364_v53 }
 0x639   : > { %9517 = vmatpush3.bf16.xpose.msra.mxu1 %v10212_v28  ;;  %9518 = vmatprep.mubr.msk.bf16.mxu1 %vm10366_vm2, %v12048_v26  ;;  %v10219_v28 = vld [vmem:[%s10577_s23] sm:$0xff]  }
 0x63a   : > { %9528 = vmatprep.subr.bf16.mxu1 %v12048_v26 }
 0x63c   : > { %9513 = vmatmul.mubr.bf16.vlgmr.msra.gmra.mxu0 %v11364_v53 }
 0x63d   : > { %9523 = vmatpush3.bf16.xpose.msra.mxu0 %v10213_v14  ;;  %9524 = vmatprep.mubr.msk.bf16.mxu0 %vm10366_vm2, %v12048_v26 }
 0x63e   : > { %9534 = vmatprep.subr.bf16.mxu0 %v12048_v26 }
 0x640   : > { %9519 = vmatmul.mubr.bf16.vlgmr.msra.gmra.mxu1 %v11364_v53 }
 0x641   : > { %9529 = vmatpush3.bf16.xpose.msra.mxu1 %v10214_v22  ;;  %9530 = vmatprep.mubr.msk.bf16.mxu1 %vm10366_vm2, %v12048_v26 }
 0x642   : > { %9540 = vmatprep.subr.bf16.mxu1 %v12048_v26 }
 0x644   : > { %9525 = vmatmul.mubr.bf16.vlgmr.msra.gmra.mxu0 %v11364_v53 }
 0x645   : > { %9535 = vmatpush3.bf16.xpose.msra.mxu0 %v10215_v41  ;;  %9536 = vmatprep.mubr.msk.bf16.mxu0 %vm10366_vm2, %v12048_v26 }
 0x646   : > { %9546 = vmatprep.subr.bf16.mxu0 %v12048_v26 }
 0x648   : > { %9531 = vmatmul.mubr.bf16.vlgmr.msra.gmra.mxu1 %v11364_v53 }
 0x649   : > { %9541 = vmatpush3.bf16.xpose.msra.mxu1 %v10216_v6  ;;  %9542 = vmatprep.mubr.msk.bf16.mxu1 %vm10366_vm2, %v12048_v26 }
 0x64a   : > { %9552 = vmatprep.subr.bf16.mxu1 %v12048_v26 }
 0x64c   : > { %9537 = vmatmul.mubr.bf16.vlgmr.msra.gmra.mxu0 %v11364_v53 }
 0x64d   : > { %9547 = vmatpush3.bf16.xpose.msra.mxu0 %v10217_v21  ;;  %9548 = vmatprep.mubr.msk.bf16.mxu0 %vm10366_vm2, %v12048_v26  ;;  %v10220_v21 = vld [vmem:[%s10577_s23 + $0x8] sm:$0xff]  }
 0x64e   : > { %9558 = vmatprep.subr.bf16.mxu0 %v12048_v26 }
 0x650   : > { %9543 = vmatmul.mubr.bf16.vlgmr.msra.gmra.mxu1 %v11364_v53 }
 0x651   : > { %9553 = vmatpush3.bf16.xpose.msra.mxu1 %v10218_v39  ;;  %9554 = vmatprep.mubr.msk.bf16.mxu1 %vm10366_vm2, %v12048_v26 }
 0x652   : > { %9564 = vmatprep.subr.bf16.mxu1 %v12048_v26 }
 0x654   : > { %v4054_v47 = vpop.f32.mrf.mxu0  ;;  %9549 = vmatmul.mubr.bf16.vlgmr.msra.gmra.mxu0 %v11364_v53 }
 0x655   : > { %v4596_v61 = vadd.f32 %v11366_v46, %v4054_v47  ;;  %9559 = vmatpush3.bf16.xpose.msra.mxu0 %v10219_v28  ;;  %9560 = vmatprep.mubr.msk.bf16.mxu0 %vm10366_vm2, %v12048_v26  ;;  %v10221_v28 = vld [vmem:[%s10577_s23 + $0x10] sm:$0xff]  }
 0x656   : > { %v9360_v14 = vpop.f32.mrf.mxu0  ;;  %9570 = vmatprep.subr.bf16.mxu0 %v12048_v26 }
 0x657   : > { %v10222_v14 = vld [vmem:[%s10577_s23 + $0x18] sm:$0xff]  }
 0x658   : > { %v4057_v22 = vpop.f32.mrf.mxu0  ;;  %v4161_v41 = vpop.f32.mrf.mxu1  ;;  %9555 = vmatmul.mubr.bf16.vlgmr.msra.gmra.mxu1 %v11364_v53 }
 0x659   : > { %v4597_v6 = vadd.f32 %v4596_v61, %v4161_v41  ;;  %9565 = vmatpush3.bf16.xpose.msra.mxu1 %v10220_v21  ;;  %9566 = vmatprep.mubr.msk.bf16.mxu1 %vm10366_vm2, %v12048_v26  ;;  %v10223_v22 = vld [vmem:[%s10577_s23 + $0x20] sm:$0xff]   ;;  %v10224_v41 = vld [vmem:[%s10577_s23 + $0x28] sm:$0xff]   ;;  %v10225_v21 = vld [vmem:[%s10577_s23 + $0x30] sm:$0xff]  }
 0x65a   : > { %v9361_v46 = vpop.f32.mrf.mxu0  ;;  %v9380_v39 = vpop.f32.mrf.mxu1  ;;  %9576 = vmatprep.subr.bf16.mxu1 %v12048_v26 }
 0x65b   : > { %v10226_v46 = vld [vmem:[%s10577_s23 + $0x38] sm:$0xff]   ;;  %s12184_s23 = sld [smem:[#allocation22_spill]] (!%p8621_p5) }
 0x65c   : > { %v4164_v47 = vpop.f32.mrf.mxu1  ;;  %9561 = vmatmul.mubr.bf16.vlgmr.msra.gmra.mxu0 %v11364_v53 }
 0x65d   : > { %9571 = vmatpush3.bf16.xpose.msra.mxu0 %v10221_v28  ;;  %9572 = vmatprep.mubr.msk.bf16.mxu0 %vm10366_vm2, %v12048_v26 }
 0x65e   : > { %v9381_v61 = vpop.f32.mrf.mxu1  ;;  %9582 = vmatprep.subr.bf16.mxu0 %v12048_v26 }
 0x660   : > { %9567 = vmatmul.mubr.bf16.vlgmr.msra.gmra.mxu1 %v11364_v53 }
 0x661   : > { %9577 = vmatpush3.bf16.xpose.msra.mxu1 %v10222_v14  ;;  %9578 = vmatprep.mubr.msk.bf16.mxu1 %vm10366_vm2, %v12048_v26 }
 0x662   : > { %9588 = vmatprep.subr.bf16.mxu1 %v12048_v26 }
 0x664   : > { %9573 = vmatmul.mubr.bf16.vlgmr.msra.gmra.mxu0 %v11364_v53 }
 0x665   : > { %9583 = vmatpush3.bf16.xpose.msra.mxu0 %v10223_v22  ;;  %9584 = vmatprep.mubr.msk.bf16.mxu0 %vm10366_vm2, %v12048_v26 }
 0x666   : > { %9594 = vmatprep.subr.bf16.mxu0 %v12048_v26 }
 0x668   : > { %9579 = vmatmul.mubr.bf16.vlgmr.msra.gmra.mxu1 %v11364_v53 }
 0x669   : > { %9589 = vmatpush3.bf16.xpose.msra.mxu1 %v10224_v41  ;;  %9590 = vmatprep.mubr.msk.bf16.mxu1 %vm10366_vm2, %v12048_v26 }
 0x66a   : > { %9600 = vmatprep.subr.bf16.mxu1 %v12048_v26 }
 0x66c   : > { %9585 = vmatmul.mubr.bf16.vlgmr.msra.gmra.mxu0 %v11364_v53 }
 0x66d   : > { %9595 = vmatpush3.bf16.xpose.msra.mxu0 %v10225_v21  ;;  %9596 = vmatprep.mubr.msk.bf16.mxu0 %vm10366_vm2, %v12048_v26 }
 0x66e   : > { %9606 = vmatprep.subr.bf16.mxu0 %v12048_v26 }
 0x670   : > { %9591 = vmatmul.mubr.bf16.vlgmr.msra.gmra.mxu1 %v11364_v53 }
 0x671   : > { %9601 = vmatpush3.bf16.xpose.msra.mxu1 %v10226_v46  ;;  %9602 = vmatprep.mubr.msk.bf16.mxu1 %vm10366_vm2, %v12048_v26 }
 0x672   : > { %9612 = vmatprep.subr.bf16.mxu1 %v12048_v26 }
 0x674   : > { %9597 = vmatmul.mubr.bf16.vlgmr.msra.gmra.mxu0 %v11364_v53 }
 0x675   : > { %9608 = vmatprep.mubr.msk.bf16.mxu0 %vm10366_vm2, %v12048_v26 }
 0x678   : > { %9603 = vmatmul.mubr.bf16.vlgmr.msra.gmra.mxu1 %v11364_v53 }
 0x679   : > { %9614 = vmatprep.mubr.msk.bf16.mxu1 %vm10366_vm2, %v12048_v26 }
 0x694   : > { %v4268_v39 = vpop.f32.mrf.mxu0 }
 0x695   : > { %v4598_v47 = vadd.f32 %v4597_v6, %v4268_v39 }
 0x696   : > { %v9400_v28 = vpop.f32.mrf.mxu0 }
 0x698   : > { %v4271_v61 = vpop.f32.mrf.mxu0  ;;  %v4375_v14 = vpop.f32.mrf.mxu1 }
 0x699   : > { %v4599_v22 = vadd.f32 %v4598_v47, %v4375_v14 }
 0x69a   : > { %v9401_v41 = vpop.f32.mrf.mxu0  ;;  %v9420_v21 = vpop.f32.mrf.mxu1 }
 0x69c   : > { %v4378_v46 = vpop.f32.mrf.mxu1 }
 0x69e   : > { %v9421_v34 = vpop.f32.mrf.mxu1 }
 0x6d4   : > { %v4482_v55 = vpop.f32.mrf.mxu0 }
 0x6d5   : > { %v4600_v29 = vadd.f32 %v4599_v22, %v4482_v55 }
 0x6d6   : > { %v9440_v51 = vpop.f32.mrf.mxu0 }
 0x6d8   : > { %v4485_v45 = vpop.f32.mrf.mxu0  ;;  %v4589_v42 = vpop.f32.mrf.mxu1 }
 0x6d9   : > { %v11489_v36 = vadd.f32 %v4600_v29, %v4589_v42 }
 0x6da   : > { %v9441_v53 = vpop.f32.mrf.mxu0  ;;  %v9460_v4 = vpop.f32.mrf.mxu1 }
 0x6dc   : > { %v4592_v26 = vpop.f32.mrf.mxu1  ;;  %v4637_v24 = vpop.f32.mrf.mxu0 }
 0x6de   : > { %v9461_v6 = vpop.f32.mrf.mxu1  ;;  %v9466_v39 = vpop.f32.mrf.mxu0 }
 0x6e0   : > { %v4640_v28 = vpop.f32.mrf.mxu0  ;;  %v4677_v61 = vpop.f32.mrf.mxu1 }
 0x6e2   : > { %v9467_v47 = vpop.f32.mrf.mxu0  ;;  %v9472_v14 = vpop.f32.mrf.mxu1 }
 0x6e4   : > { %v4680_v41 = vpop.f32.mrf.mxu1  ;;  %v11491_v21 = vpop.f32.mrf.mxu0 }
 0x6e6   : > { %v9473_v34 = vpop.f32.mrf.mxu1  ;;  %v9478_v55 = vpop.f32.mrf.mxu0 }
 0x6e8   : > { %v4720_v51 = vpop.f32.mrf.mxu0  ;;  %v11493_v45 = vpop.f32.mrf.mxu1 }
 0x6ea   : > { %v9479_v42 = vpop.f32.mrf.mxu0  ;;  %v9484_v29 = vpop.f32.mrf.mxu1 }
 0x6ec   : > { %v4760_v22 = vpop.f32.mrf.mxu1  ;;  %v11495_v4 = vpop.f32.mrf.mxu0 }
 0x6ee   : > { %v9485_v26 = vpop.f32.mrf.mxu1  ;;  %v9490_v46 = vpop.f32.mrf.mxu0 }
 0x6ef   : > { %v10227_v46 = vld [vmem:[%s10583_s1] ss:$0 sm:$0xff] }
 0x6f0   : > { %v4800_v53 = vpop.f32.mrf.mxu0  ;;  %v11497_v6 = vpop.f32.mrf.mxu1 }
 0x6f2   : > { %v9491_v39 = vpop.f32.mrf.mxu0  ;;  %v9496_v28 = vpop.f32.mrf.mxu1 }
 0x6f4   : > { %v4840_v47 = vpop.f32.mrf.mxu1  ;;  %v11499_v14 = vpop.f32.mrf.mxu0 }
 0x6f6   : > { %v9497_v41 = vpop.f32.mrf.mxu1  ;;  %v9502_v34 = vpop.f32.mrf.mxu0 }
 0x6f8   : > { %v4880_v55 = vpop.f32.mrf.mxu0  ;;  %v11501_v51 = vpop.f32.mrf.mxu1 }
 0x6fa   : > { %v9503_v42 = vpop.f32.mrf.mxu0  ;;  %v9508_v29 = vpop.f32.mrf.mxu1 }
 0x6fb   : > { %v10229_v42 = vld [vmem:[%s12102_s22] ss:$0 sm:$0xff] }
 0x6fc   : > { %v4920_v22 = vpop.f32.mrf.mxu1  ;;  %v4957_v26 = vpop.f32.mrf.mxu0  ;;  %v4638_v29 = vadd.f32 %v10229_v42, %v4637_v24  ;;  %v10232_v42 = vld [vmem:[%s10583_s1 + $0x3] ss:$0 sm:$0xff] }
 0x6fd   : > { %v4958_v53 = vadd.f32 %v10227_v46, %v4957_v26  ;;  %v10230_v46 = vld [vmem:[%s10583_s1 + $0x2] ss:$0 sm:$0xff] }
 0x6fe   : > { %v9509_v18 = vpop.f32.mrf.mxu1  ;;  %v9514_v60 = vpop.f32.mrf.mxu0 }
 0x6ff   : > { %v5571_v39 = vpack.c.bf16 %v4958_v53, %v4958_v53 }
 0x700   : > { %v4960_v28 = vpop.f32.mrf.mxu0  ;;  %v4997_v47 = vpop.f32.mrf.mxu1 }
 0x701   : > { %v5583_v41 = vsel %vm2872_vm3, %v5571_v39, 0  ;;  %v4998_v34 = vadd.f32 %v10228_v0, %v4997_v47  ;;  %v5563_v0 = vpack.c.bf16 %v4638_v29, %v4638_v29  ;;  %v10231_v47 = vld [vmem:[%s12102_s22 + $0x1] ss:$0 sm:$0xff] }
 0x702   : > { %v9515_v55 = vpop.f32.mrf.mxu0  ;;  %v9520_v17 = vpop.f32.mrf.mxu1  ;;  %9607 = vmatpush3.bf16.xpose.msra.mxu0 %v5583_v41 }
 0x703   : > { %v5572_v22 = vpack.c.bf16 %v4998_v34, %v4998_v34  ;;  %9618 = vmatprep.subr.bf16.mxu0 %v12138_v57  ;;  %v4678_v17 = vadd.f32 %v10231_v47, %v4677_v61  ;;  %v10233_v61 = vld [vmem:[%s12102_s22 + $0x2] ss:$0 sm:$0xff] }
 0x704   : > { %v5000_v26 = vpop.f32.mrf.mxu1  ;;  %v5037_v60 = vpop.f32.mrf.mxu0 }
 0x705   : > { %v5629_v18 = vsel %vm2872_vm3, %v5572_v22, 0  ;;  %v5038_v53 = vadd.f32 %v10230_v46, %v5037_v60  ;;  %v5564_v29 = vpack.c.bf16 %v4678_v17, %v4678_v17 }
 0x706   : > { %v9521_v28 = vpop.f32.mrf.mxu1  ;;  %v9526_v39 = vpop.f32.mrf.mxu0  ;;  %9613 = vmatpush3.bf16.xpose.msra.mxu1 %v5629_v18  ;;  %v4718_v18 = vadd.f32 %v10233_v61, %v11491_v21  ;;  %v10235_v21 = vld [vmem:[%s12102_s22 + $0x3] ss:$0 sm:$0xff] }
 0x707   : > { %v5573_v41 = vpack.c.bf16 %v5038_v53, %v5038_v53  ;;  %9624 = vmatprep.subr.bf16.mxu1 %v12138_v57 }
 0x708   : > { %v5040_v24 = vpop.f32.mrf.mxu0  ;;  %v5077_v34 = vpop.f32.mrf.mxu1  ;;  %v5565_v17 = vpack.c.bf16 %v4718_v18, %v4718_v18 }
 0x709   : > { %v5675_v55 = vsel %vm2872_vm3, %v5573_v41, 0  ;;  %v5078_v26 = vadd.f32 %v10232_v42, %v5077_v34  ;;  %9609 = vmatmul.mubr.msk.bf16.vlgmr.msra.gmra.mxu0 %vm2872_vm3, %v5563_v0  ;;  %v10234_v0 = vld [vmem:[%s10583_s1 + $0x4] ss:$0 sm:$0xff]  ;;  %v4758_v34 = vadd.f32 %v10235_v21, %v11493_v45 }
 0x70a   : > { %v9527_v22 = vpop.f32.mrf.mxu0  ;;  %v9532_v60 = vpop.f32.mrf.mxu1  ;;  %9619 = vmatpush3.bf16.xpose.msra.mxu0 %v5675_v55  ;;  %9620 = vmatprep.mubr.msk.bf16.mxu0 %vm10366_vm2, %v12138_v57  ;;  %v10237_v45 = vld [vmem:[%s12102_s22 + $0x4] ss:$0 sm:$0xff] }
 0x70b   : > { %v5574_v46 = vpack.c.bf16 %v5078_v26, %v5078_v26  ;;  %9630 = vmatprep.subr.bf16.mxu0 %v12138_v57  ;;  %v10236_v60 = vld [vmem:[%s10583_s1 + $0x5] ss:$0 sm:$0xff]  ;;  %v5566_v18 = vpack.c.bf16 %v4758_v34, %v4758_v34 }
 0x70c   : > { %v5080_v53 = vpop.f32.mrf.mxu1  ;;  %v5117_v28 = vpop.f32.mrf.mxu0 }
 0x70d   : > { %v5721_v39 = vsel %vm2872_vm3, %v5574_v46, 0  ;;  %v5118_v47 = vadd.f32 %v10234_v0, %v5117_v28  ;;  %9615 = vmatmul.mubr.msk.bf16.vlgmr.msra.gmra.mxu1 %vm2872_vm3, %v5564_v29  ;;  %v4798_v53 = vadd.f32 %v10237_v45, %v11495_v4  ;;  %v10239_v4 = vld [vmem:[%s12102_s22 + $0x5] ss:$0 sm:$0xff] }
 0x70e   : > { %v9533_v41 = vpop.f32.mrf.mxu1  ;;  %v9538_v24 = vpop.f32.mrf.mxu0  ;;  %9625 = vmatpush3.bf16.xpose.msra.mxu1 %v5721_v39  ;;  %9626 = vmatprep.mubr.msk.bf16.mxu1 %vm10366_vm2, %v12138_v57 }
 0x70f   : > { %v5575_v55 = vpack.c.bf16 %v5118_v47, %v5118_v47  ;;  %9636 = vmatprep.subr.bf16.mxu1 %v12138_v57  ;;  %v10238_v41 = vld [vmem:[%s10583_s1 + $0x6] ss:$0 sm:$0xff]  ;;  %v5567_v34 = vpack.c.bf16 %v4798_v53, %v4798_v53 }
 0x710   : > { %v5120_v42 = vpop.f32.mrf.mxu0  ;;  %v5157_v26 = vpop.f32.mrf.mxu1 }
 0x711   : > { %v5767_v22 = vsel %vm2872_vm3, %v5575_v55, 0  ;;  %v5158_v29 = vadd.f32 %v10236_v60, %v5157_v26  ;;  %9621 = vmatmul.mubr.msk.bf16.vlgmr.msra.gmra.mxu0 %vm2872_vm3, %v5565_v17  ;;  %v4838_v55 = vadd.f32 %v10239_v4, %v11497_v6  ;;  %v10241_v6 = vld [vmem:[%s12102_s22 + $0x6] ss:$0 sm:$0xff] }
 0x712   : > { %v9539_v61 = vpop.f32.mrf.mxu0  ;;  %v9544_v46 = vpop.f32.mrf.mxu1  ;;  %9631 = vmatpush3.bf16.xpose.msra.mxu0 %v5767_v22  ;;  %9632 = vmatprep.mubr.msk.bf16.mxu0 %vm10366_vm2, %v12138_v57  ;;  %v4878_v53 = vadd.f32 %v10241_v6, %v11499_v14  ;;  %v10243_v14 = vld [vmem:[%s12102_s22 + $0x7] ss:$0 sm:$0xff] }
 0x713   : > { %v5576_v28 = vpack.c.bf16 %v5158_v29, %v5158_v29  ;;  %9642 = vmatprep.subr.bf16.mxu0 %v12138_v57  ;;  %v10240_v29 = vld [vmem:[%s10583_s1 + $0x7] ss:$0 sm:$0xff]  ;;  %v5568_v45 = vpack.c.bf16 %v4838_v55, %v4838_v55  ;;  %v4918_v4 = vadd.f32 %v10243_v14, %v11501_v51  ;;  %s12187_s1 = sld [smem:[#allocation23_spill]] (!%p8621_p5) }
 0x714   : > { %v5160_v39 = vpop.f32.mrf.mxu1  ;;  %v5197_v0 = vpop.f32.mrf.mxu0 }
 0x715   : > { %v5813_v47 = vsel %vm2872_vm3, %v5576_v28, 0  ;;  %v5198_v24 = vadd.f32 %v10238_v41, %v5197_v0  ;;  %9627 = vmatmul.mubr.msk.bf16.vlgmr.msra.gmra.mxu1 %vm2872_vm3, %v5566_v18  ;;  %v10242_v41 = vld [vmem:[%s10586_s2] ss:$0 sm:$0xff] }
 0x716   : > { %v9545_v17 = vpop.f32.mrf.mxu1  ;;  %9637 = vmatpush3.bf16.xpose.msra.mxu1 %v5813_v47  ;;  %9638 = vmatprep.mubr.msk.bf16.mxu1 %vm10366_vm2, %v12138_v57  ;;  %v9550_v21 = vpop.f32.mrf.mxu0 }
 0x717   : > { %v5577_v42 = vpack.c.bf16 %v5198_v24, %v5198_v24  ;;  %9648 = vmatprep.subr.bf16.mxu1 %v12138_v57 }
 0x718   : > { %v5237_v26 = vpop.f32.mrf.mxu1  ;;  %v5200_v22 = vpop.f32.mrf.mxu0 }
 0x719   : > { %v5859_v60 = vsel %vm2872_vm3, %v5577_v42, 0  ;;  %v5238_v61 = vadd.f32 %v10240_v29, %v5237_v26  ;;  %9633 = vmatmul.mubr.msk.bf16.vlgmr.msra.gmra.mxu0 %vm2872_vm3, %v5567_v34  ;;  %v5569_v34 = vpack.c.bf16 %v4878_v53, %v4878_v53 }
 0x71a   : > { %9643 = vmatpush3.bf16.xpose.msra.mxu0 %v5859_v60  ;;  %9644 = vmatprep.mubr.msk.bf16.mxu0 %vm10366_vm2, %v12138_v57  ;;  %v9556_v46 = vpop.f32.mrf.mxu1  ;;  %v9551_v18 = vpop.f32.mrf.mxu0  ;;  %v10244_v60 = vld [vmem:[%s10586_s2 + $0x1] ss:$0 sm:$0xff] }
 0x71b   : > { %v5578_v28 = vpack.c.bf16 %v5238_v61, %v5238_v61  ;;  %9654 = vmatprep.subr.bf16.mxu0 %v12138_v57  ;;  %v5570_v18 = vpack.c.bf16 %v4918_v4, %v4918_v4 }
 0x71c   : > { %v5240_v39 = vpop.f32.mrf.mxu1  ;;  %v5277_v0 = vpop.f32.mrf.mxu0 }
 0x71d   : > { %v5905_v47 = vsel %vm2872_vm3, %v5578_v28, 0  ;;  %9639 = vmatmul.mubr.msk.bf16.vlgmr.msra.gmra.mxu1 %vm2872_vm3, %v5568_v45  ;;  %v5278_v24 = vadd.f32 %v10242_v41, %v5277_v0 }
 0x71e   : > { %9649 = vmatpush3.bf16.xpose.msra.mxu1 %v5905_v47  ;;  %9650 = vmatprep.mubr.msk.bf16.mxu1 %vm10366_vm2, %v12138_v57  ;;  %v9557_v17 = vpop.f32.mrf.mxu1  ;;  %v9562_v21 = vpop.f32.mrf.mxu0 }
 0x71f   : > { %v6059_v55 = vpack.c.bf16 %v5278_v24, %v5278_v24  ;;  %9660 = vmatprep.subr.bf16.mxu1 %v12138_v57 }
 0x720   : > { %v5317_v42 = vpop.f32.mrf.mxu1  ;;  %v5280_v26 = vpop.f32.mrf.mxu0 }
 0x721   : > { %9645 = vmatmul.mubr.msk.bf16.vlgmr.msra.gmra.mxu0 %vm2872_vm3, %v5569_v34  ;;  %v6071_v22 = vsel %vm3365_vm4, %v6059_v55, 0  ;;  %v5318_v29 = vadd.f32 %v10244_v60, %v5317_v42 }
 0x722   : > { %v9568_v61 = vpop.f32.mrf.mxu1  ;;  %v9563_v46 = vpop.f32.mrf.mxu0  ;;  %9655 = vmatpush3.bf16.msra.mxu0 %v6071_v22  ;;  %9656 = vmatprep.mubr.msk.bf16.mxu0 %vm10366_vm2, %v12138_v57 }
 0x723   : > { %v6060_v45 = vpack.c.bf16 %v5318_v29, %v5318_v29  ;;  %9666 = vmatprep.subr.bf16.mxu0 %v12138_v57 }
 0x724   : > { %v5320_v51 = vpop.f32.mrf.mxu1  ;;  %v11566_v6 = vpop.f32.mrf.mxu0 }
 0x725   : > { %9651 = vmatmul.mubr.msk.bf16.vlgmr.msra.gmra.mxu1 %vm2872_vm3, %v5570_v18  ;;  %v6117_v53 = vsel %vm3365_vm4, %v6060_v45, 0 }
 0x726   : > { %v9569_v28 = vpop.f32.mrf.mxu1  ;;  %v9574_v39 = vpop.f32.mrf.mxu0  ;;  %9661 = vmatpush3.bf16.msra.mxu1 %v6117_v53  ;;  %9662 = vmatprep.mubr.msk.bf16.mxu1 %vm10366_vm2, %v12138_v57 }
 0x727   : > { %9672 = vmatprep.subr.bf16.mxu1 %v12138_v57 }
 0x728   : > { %v11573_v0 = vpop.f32.mrf.mxu1  ;;  %v5360_v47 = vpop.f32.mrf.mxu0 }
 0x72a   : > { %v9580_v41 = vpop.f32.mrf.mxu1  ;;  %v9575_v24 = vpop.f32.mrf.mxu0 }
 0x72c   : > { %v5400_v17 = vpop.f32.mrf.mxu1  ;;  %v11575_v21 = vpop.f32.mrf.mxu0 }
 0x72e   : > { %v9581_v34 = vpop.f32.mrf.mxu1  ;;  %v9586_v14 = vpop.f32.mrf.mxu0 }
 0x730   : > { %v11577_v4 = vpop.f32.mrf.mxu1  ;;  %v5440_v55 = vpop.f32.mrf.mxu0 }
 0x732   : > { %v9592_v42 = vpop.f32.mrf.mxu1  ;;  %v9587_v26 = vpop.f32.mrf.mxu0 }
 0x734   : > { %v5480_v22 = vpop.f32.mrf.mxu1  ;;  %v11579_v60 = vpop.f32.mrf.mxu0 }
 0x736   : > { %v9593_v29 = vpop.f32.mrf.mxu1  ;;  %v9598_v61 = vpop.f32.mrf.mxu0 }
 0x738   : > { %v11581_v46 = vpop.f32.mrf.mxu1  ;;  %v5520_v18 = vpop.f32.mrf.mxu0 }
 0x73a   : > { %v9604_v45 = vpop.f32.mrf.mxu1  ;;  %v9599_v51 = vpop.f32.mrf.mxu0 }
 0x73c   : > { %v5560_v53 = vpop.f32.mrf.mxu1 }
 0x73e   : > { %v9605_v28 = vpop.f32.mrf.mxu1 }
 0x7c9   : > { %v5619_v39 = vpop.f32.mrf.mxu0 }
 0x7ca   : > { %v5947_v47 = vmul.f32 0.25, %v5619_v39 }
 0x7cb   : > { %v9610_v41 = vpop.f32.mrf.mxu0 }
 0x7cc   : > { %v5955_v24 = vadd.f32 %v5947_v47, %v10858_v31 }
 0x7cd   : > { %v5622_v17 = vpop.f32.mrf.mxu0  ;;  %v5665_v34 = vpop.f32.mrf.mxu1 }
 0x7ce   : > { %v5948_v14 = vmul.f32 0.25, %v5665_v34  ;;  %v5963_v55 = vsel %vm3257_vm6, %v5955_v24, -inf }
 0x7cf   : > { %v9616_v42 = vpop.f32.mrf.mxu1  ;;  %5964 = vmax.xlane.f32.xlu0 %v5963_v55  ;;  %v9611_v26 = vpop.f32.mrf.mxu0 }
 0x7d0   : > { %v5956_v22 = vadd.f32 %v5948_v14, %v10858_v31 }
 0x7d1   : > { %v5668_v29 = vpop.f32.mrf.mxu1  ;;  %v5711_v61 = vpop.f32.mrf.mxu0 }
 0x7d2   : > { %v5949_v18 = vmul.f32 0.25, %v5711_v61  ;;  %v5966_v45 = vsel %vm3257_vm6, %v5956_v22, -inf }
 0x7d3   : > { %5967 = vmax.xlane.f32.xlu1 %v5966_v45  ;;  %v9617_v51 = vpop.f32.mrf.mxu1  ;;  %v9622_v53 = vpop.f32.mrf.mxu0 }
 0x7d4   : > { %v5957_v28 = vadd.f32 %v5949_v18, %v10858_v31 }
 0x7d5   : > { %v5714_v39 = vpop.f32.mrf.mxu0  ;;  %v5757_v47 = vpop.f32.mrf.mxu1 }
 0x7d6   : > { %v5950_v41 = vmul.f32 0.25, %v5757_v47  ;;  %v5969_v17 = vsel %vm3257_vm6, %v5957_v28, -inf }
 0x7d7   : > { %v9628_v34 = vpop.f32.mrf.mxu1  ;;  %5970 = vmax.xlane.f32.xlu0 %v5969_v17  ;;  %v9623_v55 = vpop.f32.mrf.mxu0 }
 0x7d8   : > { %v5958_v14 = vadd.f32 %v5950_v41, %v10858_v31 }
 0x7d9   : > { %v5760_v42 = vpop.f32.mrf.mxu1  ;;  %v5803_v26 = vpop.f32.mrf.mxu0 }
 0x7da   : > { %v5972_v29 = vsel %vm3257_vm6, %v5958_v14, -inf }
 0x7db   : > { %5973 = vmax.xlane.f32.xlu1 %v5972_v29  ;;  %v9629_v61 = vpop.f32.mrf.mxu1  ;;  %v9634_v45 = vpop.f32.mrf.mxu0 }
 0x7dd   : > { %v5806_v51 = vpop.f32.mrf.mxu0  ;;  %v5849_v53 = vpop.f32.mrf.mxu1 }
 0x7df   : > { %v9635_v18 = vpop.f32.mrf.mxu0  ;;  %v9640_v39 = vpop.f32.mrf.mxu1 }
 0x7e1   : > { %v5852_v54 = vpop.f32.mrf.mxu1  ;;  %v5895_v47 = vpop.f32.mrf.mxu0 }
 0x7e3   : > { %v9641_v49 = vpop.f32.mrf.mxu1  ;;  %v9646_v13 = vpop.f32.mrf.mxu0 }
 0x7e4   : > { %v5951_v13 = vmul.f32 0.25, %v5803_v26 }
 0x7e5   : > { %v5898_v34 = vpop.f32.mrf.mxu0  ;;  %v5941_v17 = vpop.f32.mrf.mxu1 }
 0x7e7   : > { %v9647_v55 = vpop.f32.mrf.mxu0  ;;  %v9652_v5 = vpop.f32.mrf.mxu1 }
 0x7e8   : > { %v5959_v5 = vadd.f32 %v5951_v13, %v10858_v31 }
 0x7e9   : > { %v5944_v41 = vpop.f32.mrf.mxu1 }
 0x7ea   : > { %v5952_v41 = vmul.f32 0.25, %v5849_v53 }
 0x7eb   : > { %v9653_v42 = vpop.f32.mrf.mxu1 }
 0x7ec   : > { %v5953_v42 = vmul.f32 0.25, %v5895_v47 }
 0x858   : > { %v5965_v44 = vpop.xlane.xlu0 %5964 }
 0x859   : > { %v5987_v40 = vsub.f32 %v5955_v24, %v5965_v44  ;;  %v5975_v44 = vsel %vm3257_vm6, %v5959_v5, -inf  ;;  %v5954_v24 = vmul.f32 0.25, %v5941_v17 }
 0x85b   : > { %v5995_v37 = vmul.f32 1.442695, %v5987_v40  ;;  %v5962_v47 = vadd.f32 %v5954_v24, %v10858_v31 }
 0x85c   : > { %v5968_v29 = vpop.xlane.xlu1 %5967 }
 0x85d   : > { %10163 = vpow2.f32 %v5995_v37  ;;  %v5988_v61 = vsub.f32 %v5956_v22, %v5968_v29  ;;  %v5984_v17 = vsel %vm3257_vm6, %v5962_v47, -inf }
 0x85f   : > { %v5997_v45 = vmul.f32 1.442695, %v5988_v61 }
 0x860   : > { %v5971_v51 = vpop.xlane.xlu0 %5970 }
 0x861   : > { %10165 = vpow2.f32 %v5997_v45  ;;  %v5989_v18 = vsub.f32 %v5957_v28, %v5971_v51  ;;  %v5960_v28 = vadd.f32 %v5952_v41, %v10858_v31 }
 0x863   : > { %v5999_v54 = vmul.f32 1.442695, %v5989_v18  ;;  %v5978_v26 = vsel %vm3257_vm6, %v5960_v28, -inf }
 0x864   : > { %v5974_v39 = vpop.xlane.xlu1 %5973 }
 0x865   : > { %v5990_v49 = vsub.f32 %v5958_v14, %v5974_v39  ;;  %10167 = vpow2.f32 %v5999_v54  ;;  %v5961_v14 = vadd.f32 %v5953_v42, %v10858_v31 }
 0x867   : > { %v6001_v34 = vmul.f32 1.442695, %v5990_v49  ;;  %v5981_v53 = vsel %vm3257_vm6, %v5961_v14, -inf }
 0x869   : > { %10169 = vpow2.f32 %v6001_v34 }
 0x86a   : > { %v10164_v55 = vpop.eup %10163 }
 0x86b   : > { %v6011_v40 = vsel %vm3257_vm6, %v10164_v55, 0.0 }
 0x86c   : > { %6012 = vadd.xlane.f32.xlu0 %v6011_v40  ;;  %v10245_v40 = vld [vmem:[%s10586_s2 + $0x2] ss:$0 sm:$0xff] }
 0x86e   : > { %v10166_v37 = vpop.eup %10165 }
 0x86f   : > { %v6014_v22 = vsel %vm3257_vm6, %v10166_v37, 0.0 }
 0x870   : > { %6015 = vadd.xlane.f32.xlu1 %v6014_v22  ;;  %5976 = vmax.xlane.f32.xlu0 %v5975_v44  ;;  %v5358_v44 = vadd.f32 %v10245_v40, %v11566_v6 }
 0x872   : > { %v11600_v29 = vpop.eup %10167 }
 0x873   : > { %v6017_v61 = vsel %vm3257_vm6, %v11600_v29, 0.0 }
 0x874   : > { %5979 = vmax.xlane.f32.xlu1 %v5978_v26  ;;  %5982 = vmax.xlane.f32.xlu0 %v5981_v53 }
 0x876   : > { %v11605_v45 = vpop.eup %10169 }
 0x877   : > { %v6020_v51 = vsel %vm3257_vm6, %v11605_v45, 0.0 }
 0x878   : > { %5985 = vmax.xlane.f32.xlu1 %v5984_v17  ;;  %6018 = vadd.xlane.f32.xlu0 %v6017_v61 }
 0x87c   : > { %6021 = vadd.xlane.f32.xlu1 %v6020_v51  ;;  %v6061_v51 = vpack.c.bf16 %v5358_v44, %v5358_v44 }
 0x8f5   : > { %v6013_v18 = vpop.xlane.xlu0 %6012 }
 0x8f6   : > { %10171 = vrcp.f32 %v6013_v18 }
 0x8f9   : > { %v6016_v31 = vpop.xlane.xlu1 %6015  ;;  %v5977_v54 = vpop.xlane.xlu0 %5976 }
 0x8fa   : > { %10173 = vrcp.f32 %v6016_v31  ;;  %v5991_v39 = vsub.f32 %v5959_v5, %v5977_v54  ;;  %v10246_v5 = vld [vmem:[%s10586_s2 + $0x3] ss:$0 sm:$0xff] }
 0x8fb   : > { %v5398_v18 = vadd.f32 %v10246_v5, %v11573_v0 }
 0x8fc   : > { %v6003_v49 = vmul.f32 1.442695, %v5991_v39  ;;  %v6163_v39 = vsel %vm3365_vm4, %v6061_v51, 0 }
 0x8fd   : > { %v5980_v13 = vpop.xlane.xlu1 %5979  ;;  %v5983_v34 = vpop.xlane.xlu0 %5982 }
 0x8fe   : > { %10175 = vpow2.f32 %v6003_v49  ;;  %v5992_v41 = vsub.f32 %v5960_v28, %v5980_v13  ;;  %v5993_v42 = vsub.f32 %v5961_v14, %v5983_v34 }
 0x900   : > { %v6005_v24 = vmul.f32 1.442695, %v5992_v41  ;;  %v6007_v22 = vmul.f32 1.442695, %v5993_v42  ;;  %v11624_v41 = vld [vmem:[%s1223_s4] ss:$0 sm:$0xff] }
 0x901   : > { %v5986_v26 = vpop.xlane.xlu1 %5985  ;;  %v6019_v53 = vpop.xlane.xlu0 %6018  ;;  %s12181_s4 = sld [smem:[#allocation24_spill]] (!%p8621_p5) }
 0x902   : > { %10177 = vpow2.f32 %v6005_v24  ;;  %v5994_v17 = vsub.f32 %v5962_v47, %v5986_v26  ;;  %v6062_v47 = vpack.c.bf16 %v5398_v18, %v5398_v18  ;;  %v6801_v24 = vadd.f32 %v11624_v41, %v11489_v36 }
 0x903   : > { %v10172_v61 = vpop.eup %10171  ;;  %10179 = vpow2.f32 %v6007_v22 }
 0x904   : > { %v6043_v31 = vmul.f32 %v10172_v61, %v10164_v55  ;;  %v6009_v54 = vmul.f32 1.442695, %v5994_v17  ;;  %10181 = vrcp.f32 %v6019_v53  ;;  %v6209_v13 = vsel %vm3365_vm4, %v6062_v47, 0  ;;  %v10248_v53 = vld [vmem:[%s10586_s2 + $0x5] ss:$0 sm:$0xff] }
 0x905   : > { %v6022_v28 = vpop.xlane.xlu1 %6021  ;;  %v5478_v17 = vadd.f32 %v10248_v53, %v11577_v4 }
 0x906   : > { %v6051_v14 = vpack.c.bf16 %v6043_v31, %v6043_v31  ;;  %10183 = vpow2.f32 %v6009_v54 }
 0x907   : > { %v10174_v6 = vpop.eup %10173  ;;  %10185 = vrcp.f32 %v6022_v28  ;;  %v10249_v28 = vld [vmem:[#allocation2] sm:$0xff] }
 0x908   : > { %v6044_v49 = vmul.f32 %v10174_v6, %v10166_v37  ;;  %9657 = vmatmul.mubr.msk.bf16.vlgmr.msra.gmra.mxu0 %vm3257_vm6, %v6051_v14  ;;  %v10247_v37 = vld [vmem:[%s10586_s2 + $0x4] ss:$0 sm:$0xff]  ;;  %v6803_v36 = vadd.f32 %v10249_v28, %v6801_v24  ;;  %v6064_v14 = vpack.c.bf16 %v5478_v17, %v5478_v17  ;;  %v10251_v17 = vld [vmem:[%s10586_s2 + $0x7] ss:$0 sm:$0xff] }
 0x909   : > { %9667 = vmatpush3.bf16.msra.mxu0 %v6163_v39  ;;  %9668 = vmatprep.mubr.msk.bf16.mxu0 %vm10366_vm2, %v12138_v57  ;;  %v5438_v42 = vadd.f32 %v10247_v37, %v11575_v21  ;;  %v10250_v37 = vld [vmem:[%s10586_s2 + $0x6] ss:$0 sm:$0xff]  ;;  %s12188_s2 = sld [smem:[#allocation26_spill]] (!%p8621_p5) }
 0x90a   : > { %v6052_v0 = vpack.c.bf16 %v6044_v49, %v6044_v49  ;;  %9678 = vmatprep.subr.bf16.mxu0 %v12138_v57 }
 0x90b   : > { %v10176_v55 = vpop.eup %10175  ;;  %v6063_v21 = vpack.c.bf16 %v5438_v42, %v5438_v42  ;;  %v5518_v42 = vadd.f32 %v10250_v37, %v11579_v60 }
 0x90c   : > { %9663 = vmatmul.mubr.msk.bf16.vlgmr.msra.gmra.mxu1 %vm3257_vm6, %v6052_v0  ;;  %v6023_v34 = vsel %vm3257_vm6, %v10176_v55, 0.0 }
 0x90d   : > { %9673 = vmatpush3.bf16.msra.mxu1 %v6209_v13  ;;  %6024 = vadd.xlane.f32.xlu0 %v6023_v34  ;;  %v6255_v4 = vsel %vm3365_vm4, %v6063_v21, 0  ;;  %v6065_v53 = vpack.c.bf16 %v5518_v42, %v5518_v42  ;;  %v12156_v42 = vld [vmem:[#allocation52_spill] sm:$0xff] }
 0x90e   : > { %9674 = vmatprep.mubr.msk.bf16.mxu1 %vm10366_vm2, %v12138_v57  ;;  %9684 = vmatprep.subr.bf16.mxu1 %v12138_v57 }
 0x90f   : > { %v10178_v40 = vpop.eup %10177 }
 0x910   : > { %v10180_v44 = vpop.eup %10179  ;;  %v6026_v22 = vsel %vm3257_vm6, %v10178_v40, 0.0 }
 0x911   : > { %v10182_v26 = vpop.eup %10181  ;;  %6027 = vadd.xlane.f32.xlu1 %v6026_v22  ;;  %v6029_v61 = vsel %vm3257_vm6, %v10180_v44, 0.0 }
 0x912   : > { %v6045_v51 = vmul.f32 %v10182_v26, %v11600_v29  ;;  %6030 = vadd.xlane.f32.xlu0 %v6029_v61  ;;  %v6301_v29 = vsel %vm3365_vm4, %v6064_v14, 0  ;;  %v5558_v61 = vadd.f32 %v10251_v17, %v11581_v46 }
 0x913   : > { %v10184_v5 = vpop.eup %10183 }
 0x914   : > { %v10186_v18 = vpop.eup %10185  ;;  %v6053_v31 = vpack.c.bf16 %v6045_v51, %v6045_v51  ;;  %v6032_v54 = vsel %vm3257_vm6, %v10184_v5, 0.0  ;;  %v6066_v28 = vpack.c.bf16 %v5558_v61, %v5558_v61 }
 0x915   : > { %v6046_v6 = vmul.f32 %v10186_v18, %v11605_v45  ;;  %6033 = vadd.xlane.f32.xlu1 %v6032_v54  ;;  %v6347_v54 = vsel %vm3365_vm4, %v6065_v53, 0 }
 0x916   : > { %9669 = vmatmul.mubr.msk.bf16.vlgmr.msra.gmra.mxu0 %vm3257_vm6, %v6053_v31  ;;  %6807 = vadd.xlane.f32.xlu0 %v6803_v36 }
 0x917   : > { %v6054_v39 = vpack.c.bf16 %v6046_v6, %v6046_v6  ;;  %9679 = vmatpush3.bf16.msra.mxu0 %v6255_v4  ;;  %9680 = vmatprep.mubr.msk.bf16.mxu0 %vm10366_vm2, %v12138_v57 }
 0x918   : > { %9690 = vmatprep.subr.bf16.mxu0 %v12138_v57 }
 0x919   : > { %9675 = vmatmul.mubr.msk.bf16.vlgmr.msra.gmra.mxu1 %vm3257_vm6, %v6054_v39 }
 0x91a   : > { %9685 = vmatpush3.bf16.msra.mxu1 %v6301_v29  ;;  %9686 = vmatprep.mubr.msk.bf16.mxu1 %vm10366_vm2, %v12138_v57 }
 0x91b   : > { %9696 = vmatprep.subr.bf16.mxu1 %v12138_v57 }
 0x996   : > { %v6025_v45 = vpop.xlane.xlu0 %6024 }
 0x997   : > { %10187 = vrcp.f32 %v6025_v45 }
 0x99a   : > { %v6028_v47 = vpop.xlane.xlu1 %6027 }
 0x99b   : > { %10189 = vrcp.f32 %v6028_v47  ;;  %v6031_v49 = vpop.xlane.xlu0 %6030 }
 0x99c   : > { %10191 = vrcp.f32 %v6031_v49 }
 0x99e   : > { %v6034_v0 = vpop.xlane.xlu1 %6033 }
 0x99f   : > { %10193 = vrcp.f32 %v6034_v0  ;;  %v6808_v13 = vpop.xlane.xlu0 %6807  ;;  %v12155_v0 = vld [vmem:[#allocation51_spill] sm:$0xff] }
 0x9a0   : > { %v6812_v34 = vmul.f32 0.0078125, %v6808_v13 }
 0x9a2   : > { %v11652_v24 = vsub.f32 %v6803_v36, %v6812_v34 }
 0x9a4   : > { %v10188_v22 = vpop.eup %10187  ;;  %v6816_v26 = vmul.f32 %v11652_v24, %v11652_v24 }
 0x9a5   : > { %v6047_v21 = vmul.f32 %v10188_v22, %v10176_v55  ;;  %v6393_v55 = vsel %vm3365_vm4, %v6066_v28, 0 }
 0x9a6   : > { %6818 = vadd.xlane.f32.xlu0 %v6816_v26 }
 0x9a7   : > { %v6055_v51 = vpack.c.bf16 %v6047_v21, %v6047_v21  ;;  %v12157_v21 = vld [vmem:[#allocation53_spill] sm:$0xff] }
 0x9a8   : > { %v10190_v18 = vpop.eup %10189 }
 0x9a9   : > { %v10192_v31 = vpop.eup %10191  ;;  %v6048_v14 = vmul.f32 %v10190_v18, %v10178_v40  ;;  %9681 = vmatmul.mubr.msk.bf16.vlgmr.msra.gmra.mxu0 %vm3257_vm6, %v6055_v51 }
 0x9aa   : > { %9691 = vmatpush3.bf16.msra.mxu0 %v6347_v54  ;;  %9692 = vmatprep.mubr.msk.bf16.mxu0 %vm10366_vm2, %v12138_v57  ;;  %v6049_v36 = vmul.f32 %v10192_v31, %v10180_v44 }
 0x9ab   : > { %v6056_v60 = vpack.c.bf16 %v6048_v14, %v6048_v14  ;;  %9702 = vmatprep.subr.bf16.mxu0 %v12138_v57  ;;  %v12158_v14 = vld [vmem:[#allocation54_spill] sm:$0xff] }
 0x9ac   : > { %v10194_v46 = vpop.eup %10193  ;;  %v6057_v40 = vpack.c.bf16 %v6049_v36, %v6049_v36 }
 0x9ad   : > { %9687 = vmatmul.mubr.msk.bf16.vlgmr.msra.gmra.mxu1 %vm3257_vm6, %v6056_v60  ;;  %v6050_v6 = vmul.f32 %v10194_v46, %v10184_v5 }
 0x9ae   : > { %9697 = vmatpush3.bf16.msra.mxu1 %v6393_v55  ;;  %9698 = vmatprep.mubr.msk.bf16.mxu1 %vm10366_vm2, %v12138_v57  ;;  %v12159_v55 = vld [vmem:[#allocation55_spill] sm:$0xff] }
 0x9af   : > { %9722 = vmatprep.subr.bf16.mxu1 %v12138_v57  ;;  %v6058_v44 = vpack.c.bf16 %v6050_v6, %v6050_v6  ;;  %v12160_v6 = vld [vmem:[#allocation56_spill] sm:$0xff] }
 0x9b1   : > { %9693 = vmatmul.mubr.msk.bf16.vlgmr.msra.gmra.mxu0 %vm3257_vm6, %v6057_v40 }
 0x9b2   : > { %9703 = vmatpush3.bf16.xpose.msra.mxu0 %v10935_v2  ;;  %9718 = vmatprep.mubr.msk.bf16.mxu0 %vm10366_vm2, %v12138_v57 }
 0x9b3   : > { %9704 = vmatprep.subr.bf16.mxu0 %v12138_v57 }
 0x9b5   : > { %9699 = vmatmul.mubr.msk.bf16.vlgmr.msra.gmra.mxu1 %vm3257_vm6, %v6058_v44  ;;  %v12161_v44 = vld [vmem:[#allocation57_spill] sm:$0xff] }
 0x9b6   : > { %9723 = vmatpush3.bf16.xpose.msra.mxu1 %v10944_v9  ;;  %9738 = vmatprep.mubr.msk.bf16.mxu1 %vm10366_vm2, %v12138_v57 }
 0x9b7   : > { %9724 = vmatprep.subr.bf16.mxu1 %v12138_v57 }
 0x9ba   : > { %9705 = vmatpush3.bf16.xpose.msra.mxu0 %v10953_v11 }
 0x9bb   : > { %9706 = vmatprep.subr.bf16.mxu0 %v12138_v57 }
 0x9be   : > { %9725 = vmatpush3.bf16.xpose.msra.mxu1 %v10959_v15 }
 0x9bf   : > { %9726 = vmatprep.subr.bf16.mxu1 %v12138_v57 }
 0x9c2   : > { %9707 = vmatpush3.bf16.xpose.msra.mxu0 %v10965_v62 }
 0x9c3   : > { %9708 = vmatprep.subr.bf16.mxu0 %v12138_v57 }
 0x9c6   : > { %9727 = vmatpush3.bf16.xpose.msra.mxu1 %v10971_v19 }
 0x9c7   : > { %9728 = vmatprep.subr.bf16.mxu1 %v12138_v57 }
 0x9c8   : > { %v6107_v2 = vpop.f32.mrf.mxu0 }
 0x9ca   : > { %9709 = vmatpush3.bf16.xpose.msra.mxu0 %v10977_v3  ;;  %v9658_v9 = vpop.f32.mrf.mxu0 }
 0x9cb   : > { %9710 = vmatprep.subr.bf16.mxu0 %v12138_v57  ;;  %v12163_v9 = vld [vmem:[#allocation59_spill] sm:$0xff] }
 0x9cc   : > { %v6110_v11 = vpop.f32.mrf.mxu0  ;;  %v6153_v5 = vpop.f32.mrf.mxu1 }
 0x9cd   : > { %v12164_v11 = vld [vmem:[#allocation60_spill] sm:$0xff] }
 0x9ce   : > { %9729 = vmatpush3.bf16.xpose.msra.mxu1 %v10983_v25  ;;  %v9659_v15 = vpop.f32.mrf.mxu0  ;;  %v9664_v4 = vpop.f32.mrf.mxu1 }
 0x9cf   : > { %9730 = vmatprep.subr.bf16.mxu1 %v12138_v57  ;;  %v12166_v15 = vld [vmem:[#allocation62_spill] sm:$0xff]  ;;  %v12167_v4 = vld [vmem:[#allocation63_spill] sm:$0xff] }
 0x9d0   : > { %v6156_v62 = vpop.f32.mrf.mxu1 }
 0x9d1   : > { %v12168_v62 = vld [vmem:[#allocation64_spill] sm:$0xff] }
 0x9d2   : > { %9711 = vmatpush3.bf16.xpose.msra.mxu0 %v10989_v33  ;;  %v9665_v19 = vpop.f32.mrf.mxu1 }
 0x9d3   : > { %9712 = vmatprep.subr.bf16.mxu0 %v12138_v57  ;;  %v12169_v19 = vld [vmem:[#allocation65_spill] sm:$0xff] }
 0x9d6   : > { %v6199_v39 = vpop.f32.mrf.mxu0  ;;  %9731 = vmatpush3.bf16.xpose.msra.mxu1 %v10995_v8  ;;  %v6435_v8 = vpack.c.bf16 %v6107_v2, %v6107_v2  ;;  %v12162_v2 = vld [vmem:[#allocation58_spill] sm:$0xff] }
 0x9d7   : > { %9732 = vmatprep.subr.bf16.mxu1 %v12138_v57 }
 0x9d8   : > { %v9670_v3 = vpop.f32.mrf.mxu0 }
 0x9d9   : > { %v11694_v29 = vpop.f32.mrf.mxu1  ;;  %v12171_v3 = vld [vmem:[#allocation67_spill] sm:$0xff] }
 0x9da   : > { %v6202_v45 = vpop.f32.mrf.mxu0  ;;  %9713 = vmatpush3.bf16.xpose.msra.mxu0 %v11003_v38  ;;  %v6436_v38 = vpack.c.bf16 %v6153_v5, %v6153_v5  ;;  %v12165_v5 = vld [vmem:[#allocation61_spill] sm:$0xff] }
 0x9db   : > { %v9676_v25 = vpop.f32.mrf.mxu1  ;;  %9714 = vmatprep.subr.bf16.mxu0 %v12138_v57 }
 0x9dc   : > { %v9671_v47 = vpop.f32.mrf.mxu0 }
 0x9dd   : > { %v6248_v49 = vpop.f32.mrf.mxu1 }
 0x9de   : > { %9733 = vmatpush3.bf16.xpose.msra.mxu1 %v11011_v43  ;;  %v12139_v43 = vld [vmem:[#allocation35_spill] sm:$0xff] }
 0x9df   : > { %v9677_v33 = vpop.f32.mrf.mxu1  ;;  %9734 = vmatprep.subr.bf16.mxu1 %v12138_v57 }
 0x9e2   : > { %9715 = vmatpush3.bf16.xpose.msra.mxu0 %v11017_v12  ;;  %v12140_v12 = vld [vmem:[#allocation36_spill] sm:$0xff] }
 0x9e3   : > { %9716 = vmatprep.subr.bf16.mxu0 %v12138_v57 }
 0x9e6   : > { %9735 = vmatpush3.bf16.xpose.msra.mxu1 %v11023_v48  ;;  %v6437_v48 = vpack.c.bf16 %v6199_v39, %v6199_v39  ;;  %v12170_v39 = vld [vmem:[#allocation66_spill] sm:$0xff] }
 0x9e7   : > { %9736 = vmatprep.subr.bf16.mxu1 %v12138_v57 }
 0x9ea   : > { %9717 = vmatpush3.bf16.xpose.msra.mxu0 %v11029_v50  ;;  %v12141_v50 = vld [vmem:[#allocation37_spill] sm:$0xff] }
 0x9eb   : > { %9742 = vmatprep.subr.bf16.mxu0 %v12138_v57 }
 0x9ee   : > { %9737 = vmatpush3.bf16.xpose.msra.mxu1 %v11035_v52  ;;  %v6438_v52 = vpack.c.bf16 %v11694_v29, %v11694_v29  ;;  %v12172_v29 = vld [vmem:[#allocation68_spill] sm:$0xff] }
 0x9ef   : > { %9762 = vmatprep.subr.bf16.mxu1 %v12138_v57 }
 0x9f1   : > { %9719 = vmatmul.mubr.msk.bf16.vlgmr.msra.gmra.mxu0 %vm2872_vm3, %v6435_v8 }
 0x9f2   : > { %9743 = vmatpush3.bf16.xpose.msra.mxu0 %v11041_v56  ;;  %9758 = vmatprep.mubr.msk.bf16.mxu0 %vm10366_vm2, %v12138_v57  ;;  %v12142_v56 = vld [vmem:[#allocation38_spill] sm:$0xff] }
 0x9f3   : > { %9744 = vmatprep.subr.bf16.mxu0 %v12138_v57 }
 0x9f5   : > { %9739 = vmatmul.mubr.msk.bf16.vlgmr.msra.gmra.mxu1 %vm2872_vm3, %v6436_v38 }
 0x9f6   : > { %9763 = vmatpush3.bf16.xpose.msra.mxu1 %v11050_v58  ;;  %9778 = vmatprep.mubr.msk.bf16.mxu1 %vm10366_vm2, %v12138_v57  ;;  %v12143_v58 = vld [vmem:[#allocation39_spill] sm:$0xff] }
 0x9f7   : > { %9764 = vmatprep.subr.bf16.mxu1 %v12138_v57 }
 0x9fa   : > { %9745 = vmatpush3.bf16.xpose.msra.mxu0 %v11059_v59  ;;  %v12144_v59 = vld [vmem:[#allocation40_spill] sm:$0xff] }
 0x9fb   : > { %9746 = vmatprep.subr.bf16.mxu0 %v12138_v57 }
 0x9fe   : > { %9765 = vmatpush3.bf16.xpose.msra.mxu1 %v11065_v63  ;;  %v12145_v63 = vld [vmem:[#allocation41_spill] sm:$0xff] }
 0x9ff   : > { %9766 = vmatprep.subr.bf16.mxu1 %v12138_v57 }
 0xa02   : > { %9747 = vmatpush3.bf16.xpose.msra.mxu0 %v11071_v1  ;;  %v12146_v1 = vld [vmem:[#allocation42_spill] sm:$0xff] }
 0xa03   : > { %9748 = vmatprep.subr.bf16.mxu0 %v12138_v57 }
 0xa06   : > { %9767 = vmatpush3.bf16.xpose.msra.mxu1 %v11077_v7  ;;  %v12147_v7 = vld [vmem:[#allocation43_spill] sm:$0xff] }
 0xa07   : > { %9768 = vmatprep.subr.bf16.mxu1 %v12138_v57 }
 0xa0a   : > { %9749 = vmatpush3.bf16.xpose.msra.mxu0 %v11083_v10  ;;  %v12148_v10 = vld [vmem:[#allocation44_spill] sm:$0xff] }
 0xa0b   : > { %9750 = vmatprep.subr.bf16.mxu0 %v12138_v57 }
 0xa0e   : > { %9769 = vmatpush3.bf16.xpose.msra.mxu1 %v11089_v16  ;;  %v12149_v16 = vld [vmem:[#allocation45_spill] sm:$0xff] }
 0xa0f   : > { %9770 = vmatprep.subr.bf16.mxu1 %v12138_v57 }
 0xa12   : > { %9751 = vmatpush3.bf16.xpose.msra.mxu0 %v11095_v20  ;;  %v12150_v20 = vld [vmem:[#allocation46_spill] sm:$0xff] }
 0xa13   : > { %9752 = vmatprep.subr.bf16.mxu0 %v12138_v57 }
 0xa16   : > { %9771 = vmatpush3.bf16.xpose.msra.mxu1 %v11101_v23  ;;  %v12151_v23 = vld [vmem:[#allocation47_spill] sm:$0xff] }
 0xa17   : > { %9772 = vmatprep.subr.bf16.mxu1 %v12138_v57 }
 0xa1a   : > { %9753 = vmatpush3.bf16.xpose.msra.mxu0 %v11107_v27  ;;  %v12152_v27 = vld [vmem:[#allocation48_spill] sm:$0xff] }
 0xa1b   : > { %9754 = vmatprep.subr.bf16.mxu0 %v12138_v57 }
 0xa1e   : > { %9773 = vmatpush3.bf16.xpose.msra.mxu1 %v11113_v30  ;;  %v12153_v30 = vld [vmem:[#allocation49_spill] sm:$0xff] }
 0xa1f   : > { %9774 = vmatprep.subr.bf16.mxu1 %v12138_v57 }
 0xa22   : > { %9755 = vmatpush3.bf16.xpose.msra.mxu0 %v11119_v32  ;;  %v12154_v32 = vld [vmem:[#allocation50_spill] sm:$0xff] }
 0xa23   : > { %9756 = vmatprep.subr.bf16.mxu0 %v12138_v57 }
 0xa26   : > { %9775 = vmatpush3.bf16.xpose.msra.mxu1 %v11125_v35 }
 0xa27   : > { %9776 = vmatprep.subr.bf16.mxu1 %v12138_v57 }
 0xa2a   : > { %9757 = vmatpush3.bf16.xpose.msra.mxu0 %v12139_v43 }
 0xa2b   : > { %9782 = vmatprep.subr.bf16.mxu0 %v12138_v57 }
 0xa2e   : > { %9777 = vmatpush3.bf16.xpose.msra.mxu1 %v12140_v12 }
 0xa2f   : > { %9802 = vmatprep.subr.bf16.mxu1 %v12138_v57 }
 0xa31   : > { %9759 = vmatmul.mubr.msk.bf16.vlgmr.msra.gmra.mxu0 %vm2872_vm3, %v6437_v48 }
 0xa32   : > { %9783 = vmatpush3.bf16.xpose.msra.mxu0 %v12141_v50  ;;  %9798 = vmatprep.mubr.msk.bf16.mxu0 %vm10366_vm2, %v12138_v57 }
 0xa33   : > { %9784 = vmatprep.subr.bf16.mxu0 %v12138_v57 }
 0xa35   : > { %9779 = vmatmul.mubr.msk.bf16.vlgmr.msra.gmra.mxu1 %vm2872_vm3, %v6438_v52 }
 0xa36   : > { %9803 = vmatpush3.bf16.xpose.msra.mxu1 %v12142_v56  ;;  %9818 = vmatprep.mubr.msk.bf16.mxu1 %vm10366_vm2, %v12138_v57 }
 0xa37   : > { %9804 = vmatprep.subr.bf16.mxu1 %v12138_v57 }
 0xa3a   : > { %9785 = vmatpush3.bf16.xpose.msra.mxu0 %v12143_v58 }
 0xa3b   : > { %9786 = vmatprep.subr.bf16.mxu0 %v12138_v57 }
 0xa3e   : > { %9805 = vmatpush3.bf16.xpose.msra.mxu1 %v12144_v59 }
 0xa3f   : > { %9806 = vmatprep.subr.bf16.mxu1 %v12138_v57 }
 0xa42   : > { %9787 = vmatpush3.bf16.xpose.msra.mxu0 %v12145_v63 }
 0xa43   : > { %9788 = vmatprep.subr.bf16.mxu0 %v12138_v57 }
 0xa46   : > { %9807 = vmatpush3.bf16.xpose.msra.mxu1 %v12146_v1 }
 0xa47   : > { %9808 = vmatprep.subr.bf16.mxu1 %v12138_v57 }
 0xa4a   : > { %9789 = vmatpush3.bf16.xpose.msra.mxu0 %v12147_v7 }
 0xa4b   : > { %9790 = vmatprep.subr.bf16.mxu0 %v12138_v57 }
 0xa4e   : > { %9809 = vmatpush3.bf16.xpose.msra.mxu1 %v12148_v10 }
 0xa4f   : > { %9810 = vmatprep.subr.bf16.mxu1 %v12138_v57 }
 0xa52   : > { %9791 = vmatpush3.bf16.xpose.msra.mxu0 %v12149_v16 }
 0xa53   : > { %9792 = vmatprep.subr.bf16.mxu0 %v12138_v57 }
 0xa56   : > { %9811 = vmatpush3.bf16.xpose.msra.mxu1 %v12150_v20 }
 0xa57   : > { %9812 = vmatprep.subr.bf16.mxu1 %v12138_v57 }
 0xa5a   : > { %9793 = vmatpush3.bf16.xpose.msra.mxu0 %v12151_v23 }
 0xa5b   : > { %9794 = vmatprep.subr.bf16.mxu0 %v12138_v57 }
 0xa5e   : > { %9813 = vmatpush3.bf16.xpose.msra.mxu1 %v12152_v27 }
 0xa5f   : > { %9814 = vmatprep.subr.bf16.mxu1 %v12138_v57 }
 0xa62   : > { %9795 = vmatpush3.bf16.xpose.msra.mxu0 %v12153_v30 }
 0xa63   : > { %9796 = vmatprep.subr.bf16.mxu0 %v12138_v57 }
 0xa66   : > { %9815 = vmatpush3.bf16.xpose.msra.mxu1 %v12154_v32 }
 0xa67   : > { %9816 = vmatprep.subr.bf16.mxu1 %v12138_v57 }
 0xa69   : > { %v6291_v35 = vpop.f32.mrf.mxu0 }
 0xa6a   : > { %9797 = vmatpush3.bf16.xpose.msra.mxu0 %v12155_v0  ;;  %v6439_v22 = vpack.c.bf16 %v6291_v35, %v6291_v35 }
 0xa6b   : > { %v9682_v13 = vpop.f32.mrf.mxu0  ;;  %9822 = vmatprep.subr.bf16.mxu0 %v12138_v57 }
 0xa6d   : > { %v6294_v34 = vpop.f32.mrf.mxu0  ;;  %v6337_v37 = vpop.f32.mrf.mxu1 }
 0xa6e   : > { %9817 = vmatpush3.bf16.xpose.msra.mxu1 %v12156_v42  ;;  %v6440_v51 = vpack.c.bf16 %v6337_v37, %v6337_v37 }
 0xa6f   : > { %v9683_v26 = vpop.f32.mrf.mxu0  ;;  %v9688_v53 = vpop.f32.mrf.mxu1  ;;  %9842 = vmatprep.subr.bf16.mxu1 %v12138_v57 }
 0xa71   : > { %9799 = vmatmul.mubr.msk.bf16.vlgmr.msra.gmra.mxu0 %vm2872_vm3, %v6439_v22  ;;  %v6340_v17 = vpop.f32.mrf.mxu1  ;;  %v6383_v61 = vpop.f32.mrf.mxu0 }
 0xa72   : > { %9823 = vmatpush3.bf16.xpose.msra.mxu0 %v12157_v21  ;;  %9838 = vmatprep.mubr.msk.bf16.mxu0 %vm10366_vm2, %v12138_v57  ;;  %v6441_v45 = vpack.c.bf16 %v6383_v61, %v6383_v61 }
 0xa73   : > { %v9689_v18 = vpop.f32.mrf.mxu1  ;;  %v9694_v31 = vpop.f32.mrf.mxu0  ;;  %9824 = vmatprep.subr.bf16.mxu0 %v12138_v57 }
 0xa75   : > { %9819 = vmatmul.mubr.msk.bf16.vlgmr.msra.gmra.mxu1 %vm2872_vm3, %v6440_v51  ;;  %v6386_v54 = vpop.f32.mrf.mxu0  ;;  %v6429_v28 = vpop.f32.mrf.mxu1 }
 0xa76   : > { %9843 = vmatpush3.bf16.xpose.msra.mxu1 %v12158_v14  ;;  %9858 = vmatprep.mubr.msk.bf16.mxu1 %vm10366_vm2, %v12138_v57  ;;  %v6442_v47 = vpack.c.bf16 %v6429_v28, %v6429_v28  ;;  %v10252_v54 = vld [vmem:[#allocation2 + $0x8] sm:$0xff] }
 0xa77   : > { %v9695_v60 = vpop.f32.mrf.mxu0  ;;  %v9700_v36 = vpop.f32.mrf.mxu1  ;;  %9844 = vmatprep.subr.bf16.mxu1 %v12138_v57 }
 0xa78   : > { %v10091_v60 = vld [vmem:[%s10600_s13 + $0x78] sm:$0xff]  }
 0xa79   : > { %v6432_v46 = vpop.f32.mrf.mxu1  ;;  %v10092_v36 = vld [vmem:[%s10600_s13 + $0x38] sm:$0xff]  }
 0xa7a   : > { %9825 = vmatpush3.bf16.xpose.msra.mxu0 %v12159_v55  ;;  %v10093_v46 = vld [vmem:[%s10600_s13 + $0x70] sm:$0xff]  }
 0xa7b   : > { %v9701_v40 = vpop.f32.mrf.mxu1  ;;  %9826 = vmatprep.subr.bf16.mxu0 %v12138_v57  ;;  %v10094_v55 = vld [vmem:[%s10600_s13 + $0x30] sm:$0xff]  }
 0xa7c   : > { %v10095_v40 = vld [vmem:[%s10600_s13 + $0x68] sm:$0xff]  }
 0xa7e   : > { %9845 = vmatpush3.bf16.xpose.msra.mxu1 %v12160_v6  ;;  %v10097_v6 = vld [vmem:[%s10600_s13 + $0x60] sm:$0xff]  }
 0xa7f   : > { %9846 = vmatprep.subr.bf16.mxu1 %v12138_v57 }
 0xa82   : > { %9827 = vmatpush3.bf16.xpose.msra.mxu0 %v12161_v44  ;;  %v10098_v44 = vld [vmem:[%s10600_s13 + $0x20] sm:$0xff]  }
 0xa83   : > { %9828 = vmatprep.subr.bf16.mxu0 %v12138_v57 }
 0xa86   : > { %9847 = vmatpush3.bf16.xpose.msra.mxu1 %v12162_v2  ;;  %v10099_v2 = vld [vmem:[%s10600_s13 + $0x58] sm:$0xff]  }
 0xa87   : > { %9848 = vmatprep.subr.bf16.mxu1 %v12138_v57 }
 0xa8a   : > { %9829 = vmatpush3.bf16.xpose.msra.mxu0 %v12163_v9  ;;  %v10100_v9 = vld [vmem:[%s10600_s13 + $0x18] sm:$0xff]  }
 0xa8b   : > { %9830 = vmatprep.subr.bf16.mxu0 %v12138_v57 }
 0xa8e   : > { %9849 = vmatpush3.bf16.xpose.msra.mxu1 %v12164_v11 }
 0xa8f   : > { %9850 = vmatprep.subr.bf16.mxu1 %v12138_v57 }
 0xa92   : > { %9831 = vmatpush3.bf16.xpose.msra.mxu0 %v12165_v5 }
 0xa93   : > { %9832 = vmatprep.subr.bf16.mxu0 %v12138_v57 }
 0xa96   : > { %9851 = vmatpush3.bf16.xpose.msra.mxu1 %v12166_v15 }
 0xa97   : > { %9852 = vmatprep.subr.bf16.mxu1 %v12138_v57 }
 0xa9a   : > { %9833 = vmatpush3.bf16.xpose.msra.mxu0 %v12167_v4 }
 0xa9b   : > { %9834 = vmatprep.subr.bf16.mxu0 %v12138_v57 }
 0xa9e   : > { %9853 = vmatpush3.bf16.xpose.msra.mxu1 %v12168_v62  ;;  %v10101_v62 = vld [vmem:[%s10600_s13 + $0x50] sm:$0xff]  }
 0xa9f   : > { %9854 = vmatprep.subr.bf16.mxu1 %v12138_v57 }
 0xaa2   : > { %9835 = vmatpush3.bf16.xpose.msra.mxu0 %v12169_v19  ;;  %v10102_v19 = vld [vmem:[%s10600_s13 + $0x10] sm:$0xff]  }
 0xaa3   : > { %9836 = vmatprep.subr.bf16.mxu0 %v12138_v57 }
 0xaa6   : > { %9855 = vmatpush3.bf16.xpose.msra.mxu1 %v12170_v39  ;;  %v10103_v39 = vld [vmem:[%s10600_s13 + $0x48] sm:$0xff]  }
 0xaa7   : > { %9856 = vmatprep.subr.bf16.mxu1 %v12138_v57 }
 0xaaa   : > { %9837 = vmatpush3.bf16.xpose.msra.mxu0 %v12171_v3  ;;  %v10104_v3 = vld [vmem:[%s10600_s13 + $0x8] sm:$0xff]  }
 0xaab   : > { %8987 = vmatprep.subr.bf16.mxu0 %v10091_v60 }
 0xaae   : > { %9857 = vmatpush3.bf16.xpose.msra.mxu1 %v12172_v29  ;;  %v10105_v29 = vld [vmem:[%s10600_s13 + $0x40] sm:$0xff]  }
 0xab1   : > { %v6480_v25 = vpop.f32.mrf.mxu0  ;;  %9839 = vmatmul.mubr.msk.bf16.vlgmr.msra.gmra.mxu0 %vm2872_vm3, %v6441_v45  ;;  %v10106_v45 = vld [vmem:[%s10600_s13] sm:$0xff]  }
 0xab2   : > { %8988 = vmatpush3.bf16.xpose.msra.mxu0 %v10092_v36 }
 0xab3   : > { %v9720_v49 = vpop.f32.mrf.mxu0  ;;  %8989 = vmatprep.subr.bf16.mxu0 %v10093_v46 }
 0xab4   : > { %v10112_v49 = vld [vmem:[%s10607_s25 + $0x64] ss:$8 sps:$4 sm:$0xff]  }
 0xab5   : > { %v6483_v33 = vpop.f32.mrf.mxu0  ;;  %v6523_v8 = vpop.f32.mrf.mxu1  ;;  %9859 = vmatmul.mubr.msk.bf16.vlgmr.msra.gmra.mxu1 %vm2872_vm3, %v6442_v47  ;;  %v10109_v47 = vld [vmem:[%s10607_s25 + $0x74] ss:$8 sps:$4 sm:$0xff]  }
 0xab6   : > { %v6787_v38 = vadd.f32 %v6523_v8, %v6480_v25  ;;  %v10107_v25 = vld [vmem:[%s10607_s25 + $0x70] ss:$8 sps:$4 sm:$0xff]   ;;  %7139 = vmatprep.subr.bf16.mxu1 %v10109_v47  ;;  %v10110_v33 = vld [vmem:[%s10607_s25 + $0x60] ss:$8 sps:$4 sm:$0xff]   ;;  %v10115_v8 = vld [vmem:[%s10607_s25 + $0x54] ss:$8 sps:$4 sm:$0xff]  }
 0xab7   : > { %v9721_v43 = vpop.f32.mrf.mxu0  ;;  %v9740_v12 = vpop.f32.mrf.mxu1  ;;  %7140 = vmatpush1.bf16.xpose.msra.mxu1 %v10107_v25 }
 0xab8   : > { %7141 = vmatprep.subr.bf16.mxu1 %v10112_v49  ;;  %v10118_v43 = vld [vmem:[%s10607_s25 + $0x44] ss:$8 sps:$4 sm:$0xff]   ;;  %v10116_v12 = vld [vmem:[%s10607_s25 + $0x40] ss:$8 sps:$4 sm:$0xff]  }
 0xab9   : > { %v6526_v48 = vpop.f32.mrf.mxu1 }
 0xaba   : > { %8990 = vmatpush3.bf16.xpose.msra.mxu0 %v10094_v55  ;;  %v10121_v48 = vld [vmem:[%s10607_s25 + $0x34] ss:$8 sps:$4 sm:$0xff]  }
 0xabb   : > { %v9741_v50 = vpop.f32.mrf.mxu1  ;;  %8991 = vmatprep.subr.bf16.mxu0 %v10095_v40 }
 0xabc   : > { %v10119_v50 = vld [vmem:[%s10607_s25 + $0x30] ss:$8 sps:$4 sm:$0xff]  }
 0xabf   : > { %7142 = vmatpush1.bf16.xpose.msra.mxu1 %v10110_v33 }
 0xac0   : > { %7143 = vmatprep.subr.bf16.mxu1 %v10115_v8 }
 0xaf1   : > { %v6566_v57 = vpop.f32.mrf.mxu0 }
 0xaf2   : > { %v6788_v52 = vadd.f32 %v6787_v38, %v6566_v57  ;;  %v10113_v38 = vld [vmem:[%s10607_s25 + $0x50] ss:$8 sps:$4 sm:$0xff]   ;;  %v10124_v57 = vld [vmem:[%s10607_s25 + $0x24] ss:$8 sps:$4 sm:$0xff]  }
 0xaf3   : > { %v9760_v56 = vpop.f32.mrf.mxu0  ;;  %7144 = vmatpush1.bf16.xpose.msra.mxu1 %v10113_v38 }
 0xaf4   : > { %7145 = vmatprep.subr.bf16.mxu1 %v10118_v43  ;;  %v10127_v56 = vld [vmem:[%s10607_s25 + $0x14] ss:$8 sps:$4 sm:$0xff]  }
 0xaf5   : > { %v6569_v58 = vpop.f32.mrf.mxu0  ;;  %v6609_v59 = vpop.f32.mrf.mxu1 }
 0xaf6   : > { %v6789_v63 = vadd.f32 %v6788_v52, %v6609_v59  ;;  %v10122_v52 = vld [vmem:[%s10607_s25 + $0x20] ss:$8 sps:$4 sm:$0xff]   ;;  %v10125_v58 = vld [vmem:[%s10607_s25 + $0x10] ss:$8 sps:$4 sm:$0xff]   ;;  %v6819_v59 = vpop.xlane.xlu0 %6818 }
 0xaf7   : > { %v9761_v1 = vpop.f32.mrf.mxu0  ;;  %v9780_v7 = vpop.f32.mrf.mxu1 }
 0xaf9   : > { %v6612_v10 = vpop.f32.mrf.mxu1 }
 0xafb   : > { %v9781_v16 = vpop.f32.mrf.mxu1  ;;  %7146 = vmatpush1.bf16.xpose.msra.mxu1 %v10116_v12 }
 0xafc   : > { %7147 = vmatprep.subr.bf16.mxu1 %v10121_v48 }
 0xb03   : > { %7148 = vmatpush1.bf16.xpose.msra.mxu1 %v10119_v50 }
 0xb04   : > { %7149 = vmatprep.subr.bf16.mxu1 %v10124_v57 }
 0xb0b   : > { %7150 = vmatpush1.bf16.xpose.msra.mxu1 %v10122_v52 }
 0xb0c   : > { %7151 = vmatprep.subr.bf16.mxu1 %v10127_v56 }
 0xb13   : > { %7152 = vmatpush1.bf16.xpose.msra.mxu1 %v10125_v58  ;;  %v8619_v58 = vld [vmem:[%s1249_s28] ss:$0 sm:$0xff]  ;;  %s12186_s28 = sld [smem:[#allocation20_spill]] (!%p8621_p5) }
 0xb31   : > { %v6652_v20 = vpop.f32.mrf.mxu0 }
 0xb32   : > { %v6790_v34 = vadd.f32 %v6789_v63, %v6652_v20  ;;  %v6822_v63 = vmul.f32 0.0078125, %v6819_v59 }
 0xb33   : > { %v9800_v23 = vpop.f32.mrf.mxu0 }
 0xb34   : > { %v6824_v1 = vadd.f32 1e-05, %v6822_v63  ;;  %v8620_v63 = vld [vmem:[%s1252_s3] ss:$0 sm:$0xff]  ;;  %s12180_s3 = sld [smem:[#allocation27_spill]] (!%p8621_p5) }
 0xb35   : > { %v6655_v27 = vpop.f32.mrf.mxu0  ;;  %v6695_v30 = vpop.f32.mrf.mxu1 }
 0xb36   : > { %v6791_v42 = vadd.f32 %v6790_v34, %v6695_v30  ;;  %10195 = vrsqrt.f32 %v6824_v1  ;;  %v8584_v27 = vld [vmem:[%s1226_s9] ss:$0 sm:$0xff] }
 0xb37   : > { %v9801_v32 = vpop.f32.mrf.mxu0  ;;  %v9820_v35 = vpop.f32.mrf.mxu1 }
 0xb39   : > { %v6698_v0 = vpop.f32.mrf.mxu1 }
 0xb3a   : > { %v8585_v0 = vld [vmem:[%s1229_s5] ss:$0 sm:$0xff] }
 0xb3b   : > { %v9821_v13 = vpop.f32.mrf.mxu1 }
 0xb43   : > { %v10196_v20 = vpop.eup %10195 }
 0xb44   : > { %v6828_v23 = vmul.f32 %v10196_v20, %v11652_v24 }
 0xb46   : > { %v6836_v35 = vmul.f32 %v8584_v27, %v6828_v23 }
 0xb48   : > { %v6844_v34 = vadd.f32 %v8585_v0, %v6836_v35 }
 0xb71   : > { %v6738_v37 = vpop.f32.mrf.mxu0 }
 0xb72   : > { %v6792_v26 = vadd.f32 %v6791_v42, %v6738_v37 }
 0xb73   : > { %v9840_v22 = vpop.f32.mrf.mxu0 }
 0xb74   : > { %v10130_v22 = vld [vmem:[%s10607_s25 + $0x4] ss:$8 sps:$4 sm:$0xff]  }
 0xb75   : > { %v6741_v53 = vpop.f32.mrf.mxu0  ;;  %v6781_v17 = vpop.f32.mrf.mxu1  ;;  %7153 = vmatprep.subr.bf16.mxu1 %v10130_v22 }
 0xb76   : > { %v6793_v61 = vadd.f32 %v6792_v26, %v6781_v17  ;;  %v10128_v26 = vld [vmem:[%s10607_s25] ss:$8 sps:$4 sm:$0xff]   ;;  %s12178_s25 = sld [smem:[#allocation21_spill]] (!%p8621_p5) }
 0xb77   : > { %v9841_v21 = vpop.f32.mrf.mxu0  ;;  %v9860_v51 = vpop.f32.mrf.mxu1  ;;  %7154 = vmatpush1.bf16.xpose.msra.mxu1 %v10128_v26  ;;  %v12173_v53 = vld [vmem:[#allocation34_spill] sm:$0xff] }
 0xb78   : > { %v6802_v18 = vadd.f32 %v11624_v41, %v6793_v61  ;;  %v10096_v41 = vld [vmem:[%s10600_s13 + $0x28] sm:$0xff]   ;;  %v6887_v24 = vsub.s32 1, %v12173_v53  ;;  %v6883_v17 = vsub.s32 0, %v12173_v53  ;;  %v6879_v61 = vld [vmem:[%s10604_s11] sm:$0x3]  ;;  %s12176_s13 = sld [smem:[#allocation16_spill]] (!%p8621_p5) }
 0xb79   : > { %v6784_v31 = vpop.f32.mrf.mxu1  ;;  %8992 = vmatpush3.bf16.xpose.msra.mxu0 %v10096_v41  ;;  %s12189_s11 = sld [smem:[#allocation29_spill]] (!%p8621_p5) }
 0xb7a   : > { %v6804_v28 = vadd.f32 %v10252_v54, %v6802_v18  ;;  %8993 = vmatprep.subr.bf16.mxu0 %v10097_v6  ;;  %v6888_v51 = vrot.slane %v6879_v61, %v6887_v24  ;;  %v6884_v18 = vrot.slane %v6879_v61, %v6883_v17 }
 0xb7b   : > { %v9861_v14 = vpop.f32.mrf.mxu1 }
 0xb7c   : > { %6809 = vadd.xlane.f32.xlu1 %v6804_v28 }
 0xb81   : > { %8994 = vmatpush3.bf16.xpose.msra.mxu0 %v10098_v44 }
 0xb82   : > { %8995 = vmatprep.subr.bf16.mxu0 %v10099_v2 }
 0xb89   : > { %8996 = vmatpush3.bf16.xpose.msra.mxu0 %v10100_v9  ;;  %v8602_v9 = vld [vmem:[%s1246_s29] ss:$0 sm:$0xff]  ;;  %s12179_s29 = sld [smem:[#allocation17_spill]] (!%p8621_p5) }
 0xb8a   : > { %8997 = vmatprep.subr.bf16.mxu0 %v10101_v62 }
 0xb91   : > { %8998 = vmatpush3.bf16.xpose.msra.mxu0 %v10102_v19 }
 0xb92   : > { %8999 = vmatprep.subr.bf16.mxu0 %v10103_v39 }
 0xb99   : > { %9000 = vmatpush3.bf16.xpose.msra.mxu0 %v10104_v3 }
 0xb9a   : > { %9001 = vmatprep.subr.bf16.mxu0 %v10105_v29 }
 0xba1   : > { %9002 = vmatpush3.bf16.xpose.msra.mxu0 %v10106_v45 }
 0xc05   : > { %v6810_v11 = vpop.xlane.xlu1 %6809 }
 0xc06   : > { %v6813_v5 = vmul.f32 0.0078125, %v6810_v11 }
 0xc08   : > { %v6815_v15 = vsub.f32 %v6804_v28, %v6813_v5 }
 0xc0a   : > { %v6817_v4 = vmul.f32 %v6815_v15, %v6815_v15 }
 0xc0c   : > { %6820 = vadd.xlane.f32.xlu1 %v6817_v4 }
 0xc95   : > { %v6821_v7 = vpop.xlane.xlu1 %6820 }
 0xc96   : > { %v6823_v10 = vmul.f32 0.0078125, %v6821_v7 }
 0xc98   : > { %v6825_v16 = vadd.f32 1e-05, %v6823_v10 }
 0xc9a   : > { %10197 = vrsqrt.f32 %v6825_v16 }
 0xca7   : > { %v10198_v30 = vpop.eup %10197 }
 0xca8   : > { %v6829_v32 = vmul.f32 %v10198_v30, %v6815_v15 }
 0xcaa   : > { %v6837_v13 = vmul.f32 %v8584_v27, %v6829_v32 }
 0xcac   : > { %v6845_v37 = vadd.f32 %v8585_v0, %v6837_v13 }
 0xcae   : > { %v6846_v42 = vpack.c.bf16 %v6845_v37, %v6844_v34 }
 0xcb0   : > { %9003 = vmatprep.mubr.bf16.mxu0 %v6846_v42 }
 0xcb1   : > { %9004 = vmatmul.mubr.bf16.vlgmr.msra.gmra.mxu0 %v6846_v42 }
 0xd71   : > { %v7021_v21 = vpop.f32.mrf.mxu0 }
 0xd72   : > { %v7022_v60 = vadd.f32 %v7021_v21, %v6884_v18 }
 0xd73   : > { %v7023_v31 = vpop.f32.mrf.mxu0 }
 0xd74   : > { %v7024_v28 = vadd.f32 %v7023_v31, %v6888_v51  ;;  %v7030_v6 = vmax.f32 %v7022_v60, 0.0 }
 0xd75   : > { %v7025_v54 = vpop.f32.mrf.mxu0 }
 0xd76   : > { %v7026_v14 = vadd.f32 %v7025_v54, %v6884_v18  ;;  %v7031_v40 = vmax.f32 %v7024_v28, 0.0 }
 0xd77   : > { %v7027_v36 = vpop.f32.mrf.mxu0 }
 0xd78   : > { %v7028_v46 = vadd.f32 %v7027_v36, %v6888_v51  ;;  %v7032_v55 = vmax.f32 %v7026_v14, 0.0 }
 0xd7a   : > { %v7033_v41 = vmax.f32 %v7028_v46, 0.0  ;;  %v7034_v2 = vpack.c.bf16 %v7032_v55, %v7030_v6 }
 0xd7c   : > { %v7035_v44 = vpack.c.bf16 %v7033_v41, %v7031_v40 }
 0xd7e   : > { %7171 = vmatprep.mubr.bf16.mxu1 %v7035_v44 }
 0xd7f   : > { %7172 = vmatmul.mubr.bf16.vlgmr.msra.gmra.mxu1 %v7034_v2 }
 0xe3f   : > { %v7173_v11 = vpop.f32.mrf.mxu1 }
 0xe40   : > { %v7174_v5 = vadd.f32 %v8602_v9, %v7173_v11 }
 0xe41   : > { %v7175_v15 = vpop.f32.mrf.mxu1 }
 0xe42   : > { %v7180_v4 = vadd.f32 %v7174_v5, %v6844_v34 }
 0xe43   : > { %v7176_v62 = vpop.f32.mrf.mxu1 }
 0xe44   : > { %v7177_v19 = vadd.f32 %v8602_v9, %v7176_v62  ;;  %7184 = vadd.xlane.f32.xlu0 %v7180_v4 }
 0xe45   : > { %v7178_v39 = vpop.f32.mrf.mxu1 }
 0xe46   : > { %v7181_v3 = vadd.f32 %v7177_v19, %v6845_v37 }
 0xe48   : > { %7186 = vadd.xlane.f32.xlu1 %v7181_v3 }
 0xecd   : > { %v7185_v29 = vpop.xlane.xlu0 %7184 }
 0xece   : > { %v7188_v45 = vmul.f32 0.0078125, %v7185_v29 }
 0xed0   : > { %v7190_v25 = vsub.f32 %v7180_v4, %v7188_v45 }
 0xed1   : > { %v7187_v47 = vpop.xlane.xlu1 %7186 }
 0xed2   : > { %v7189_v49 = vmul.f32 0.0078125, %v7187_v47  ;;  %v7192_v33 = vmul.f32 %v7190_v25, %v7190_v25 }
 0xed4   : > { %v7191_v8 = vsub.f32 %v7181_v3, %v7189_v49  ;;  %7194 = vadd.xlane.f32.xlu0 %v7192_v33 }
 0xed6   : > { %v7193_v38 = vmul.f32 %v7191_v8, %v7191_v8 }
 0xed8   : > { %7196 = vadd.xlane.f32.xlu1 %v7193_v38 }
 0xf5d   : > { %v7195_v43 = vpop.xlane.xlu0 %7194 }
 0xf5e   : > { %v7198_v12 = vmul.f32 0.0078125, %v7195_v43 }
 0xf60   : > { %v7200_v48 = vadd.f32 1e-05, %v7198_v12 }
 0xf61   : > { %v7197_v50 = vpop.xlane.xlu1 %7196 }
 0xf62   : > { %10199 = vrsqrt.f32 %v7200_v48  ;;  %v7199_v57 = vmul.f32 0.0078125, %v7197_v50 }
 0xf64   : > { %v7201_v52 = vadd.f32 1e-05, %v7199_v57 }
 0xf66   : > { %10201 = vrsqrt.f32 %v7201_v52 }
 0xf6f   : > { %v10200_v56 = vpop.eup %10199 }
 0xf70   : > { %v7204_v59 = vmul.f32 %v10200_v56, %v7190_v25 }
 0xf72   : > { %v7212_v1 = vmul.f32 %v8619_v58, %v7204_v59 }
 0xf73   : > { %v10202_v7 = vpop.eup %10201 }
 0xf74   : > { %v7220_v10 = vadd.f32 %v8620_v63, %v7212_v1  ;;  %v7205_v16 = vmul.f32 %v10202_v7, %v7191_v8 }
 0xf76   : > { %7222 = vst [vmem:[#allocation2] sm:$0xff] %v7220_v10  ;;  %v7213_v20 = vmul.f32 %v8619_v58, %v7205_v16  ;;  %7227 = sbr.rel (%p8621_p5) target bundleno = 5166 (0x142e), region = 160 }
 0xf78   : > { %v7221_v23 = vadd.f32 %v8620_v63, %v7213_v20 }
 0xf7a   : > { %7223 = vst [vmem:[#allocation2 + $0x8] sm:$0xff] %v7221_v23 }
 0xf7b   : > { %v10258_v27 = vld [vmem:[%s12176_s13 + $0x18] sm:$0xff]   ;;  %v10368_v30 = vmov 0.0   ;;  %vm10369_vm7 = vmmov 0   ;;  %vm7317_vm8 = vcmask 523264   ;;  %v7315_v35 = vld [vmem:[%s12177_s17 + $0x30] sm:$0xff]  ;;  %v7314_v13 = vld [vmem:[%s12177_s17 + $0x28] sm:$0xff]  ;;  %v7228_v24 = vpack.c.bf16 %v7221_v23, %v7220_v10 }
 0xf7c   : > { %9862 = vmatprep.subr.bf16.mxu0 %v10368_v30  ;;  %7544 = vst [vmem:[#allocation3] sm:$0xff] %v10368_v30  ;;  %7545 = vst [vmem:[#allocation3 + $0x8] sm:$0xff] %v10368_v30  ;;  %9870 = vmatprep.mubr.msk.bf16.mxu0 %vm10369_vm7, %v10368_v30  ;;  %v7316_v32 = vld [vmem:[%s12177_s17 + $0x38] sm:$0xff]  ;;  %v10259_v0 = vld [vmem:[%s12176_s13 + $0x10] sm:$0xff]   ;;  %vm8015_vm9 = vcmask 7168   ;;  %vm7858_vm10 = vcmask 31744  }
 0xf7d   : > { %9863 = vmatpush3.bf16.xpose.msra.mxu0 %v10258_v27  ;;  %9874 = vmatprep.subr.msk.mxu1 %vm7317_vm8, %v7316_v32  ;;  %v7313_v34 = vld [vmem:[%s12177_s17 + $0x20] sm:$0xff]  ;;  %v10260_v37 = vld [vmem:[%s12176_s13 + $0x8] sm:$0xff]   ;;  %v7312_v42 = vld [vmem:[%s12177_s17 + $0x18] sm:$0xff]  ;;  %vm7519_vm11 = vcmask 97280   ;;  %vm7767_vm12 = vcmask 130112   ;;  %vm7988_vm13 = vcmask 261248  }
 0xf7e   : > { %9864 = vmatprep.subr.bf16.mxu0 %v10368_v30  ;;  %9875 = vmatpush3.xpose.msk.msra.mxu1 %vm7317_vm8, %v7316_v32  ;;  %v7311_v22 = vld [vmem:[%s12177_s17 + $0x10] sm:$0xff]  ;;  %v10261_v26 = vld [vmem:[%s12176_s13] sm:$0xff]   ;;  %v7310_v53 = vld [vmem:[%s12177_s17 + $0x8] sm:$0xff]  ;;  %vm8145_vm14 = vcmask 392448  }
 0xf7f   : > { %9876 = vmatprep.subr.msk.mxu1 %vm7317_vm8, %v7315_v35  ;;  %v7309_v17 = vld [vmem:[%s12177_s17] sm:$0xff]  ;;  %v7549_v61 = vld [vmem:[%s12178_s25 + $0x8] sm:$0xff] }
 0xf80   : > { %v8622_v21 = vld [vmem:[%s12179_s29] ss:$0 sm:$0xff]  ;;  %v8007_v44 = vld [vmem:[%s12182_s0 + $0x8] sm:$0xff] }
 0xf81   : > { %v8658_v18 = vld [vmem:[%s12180_s3] ss:$0 sm:$0xff]  ;;  %v7424_v9 = vld [vmem:[%s12183_s16 + $0x8] sm:$0xf] }
 0xf82   : > { %9877 = vmatpush3.xpose.msk.msra.mxu1 %vm7317_vm8, %v7315_v35  ;;  %v7548_v55 = vld [vmem:[%s12178_s25] sm:$0xff]  ;;  %v7850_v39 = vld [vmem:[%s12185_s26 + $0x8] sm:$0xff] }
 0xf83   : > { %9878 = vmatprep.subr.msk.mxu1 %vm7317_vm8, %v7314_v13  ;;  %v7770_v6 = vld [vmem:[%s12181_s4] sm:$0xf] }
 0xf84   : > { %v8006_v2 = vld [vmem:[%s12182_s0] sm:$0xff] }
 0xf85   : > { %9865 = vmatpush3.bf16.xpose.msra.mxu0 %v10259_v0  ;;  %v7423_v11 = vld [vmem:[%s12183_s16] sm:$0xff] }
 0xf86   : > { %9866 = vmatprep.subr.bf16.mxu0 %v10368_v30  ;;  %9879 = vmatpush3.xpose.msk.msra.mxu1 %vm7317_vm8, %v7314_v13  ;;  %v7631_v5 = vld [vmem:[%s12184_s23] sm:$0xff] }
 0xf87   : > { %9880 = vmatprep.subr.msk.mxu1 %vm7317_vm8, %v7313_v34  ;;  %v7849_v45 = vld [vmem:[%s12185_s26] sm:$0xff] }
 0xf88   : > { %v8637_v33 = vld [vmem:[%s12186_s28] ss:$0 sm:$0xff] }
 0xf89   : > { %v8646_v48 = vld [vmem:[%s12187_s1] ss:$0 sm:$0xff] }
 0xf8a   : > { %9881 = vmatpush3.xpose.msk.msra.mxu1 %vm7317_vm8, %v7313_v34  ;;  %v8653_v7 = vld [vmem:[%s12188_s2] ss:$0 sm:$0xff] }
 0xf8b   : > { %9882 = vmatprep.subr.msk.mxu1 %vm7317_vm8, %v7312_v42  ;;  %v8659_v10 = vld [vmem:[%s12189_s11] ss:$0 sm:$0xff] }
 0xf8d   : > { %9867 = vmatpush3.bf16.xpose.msra.mxu0 %v10260_v37 }
 0xf8e   : > { %9868 = vmatprep.subr.bf16.mxu0 %v10368_v30  ;;  %9883 = vmatpush3.xpose.msk.msra.mxu1 %vm7317_vm8, %v7312_v42 }
 0xf8f   : > { %9884 = vmatprep.subr.msk.mxu1 %vm7317_vm8, %v7311_v22 }
 0xf92   : > { %9885 = vmatpush3.xpose.msk.msra.mxu1 %vm7317_vm8, %v7311_v22 }
 0xf93   : > { %9886 = vmatprep.subr.msk.mxu1 %vm7317_vm8, %v7310_v53 }
 0xf95   : > { %9869 = vmatpush3.bf16.xpose.msra.mxu0 %v10261_v26 }
 0xf96   : > { %9887 = vmatpush3.xpose.msk.msra.mxu1 %vm7317_vm8, %v7310_v53  ;;  %9893 = vmatprep.subr.msk.mxu0 %vm7317_vm8, %v7424_v9 }
 0xf97   : > { %9888 = vmatprep.subr.msk.mxu1 %vm7317_vm8, %v7309_v17 }
 0xf9a   : > { %9889 = vmatpush3.xpose.msk.msra.mxu1 %vm7317_vm8, %v7309_v17 }
 0xf9b   : > { %9900 = vmatprep.subr.msk.mxu1 %vm7317_vm8, %v7549_v61 }
 0xf9c   : > { %9871 = vmatmul.mubr.bf16.vlgmr.msra.gmra.mxu0 %v7228_v24 }
 0xf9d   : > { %9894 = vmatpush3.xpose.msk.msra.mxu0 %vm7317_vm8, %v7424_v9 }
 0xf9e   : > { %9895 = vmatprep.subr.msk.mxu0 %vm7317_vm8, %v7423_v11 }
 0xfa1   : > { %9896 = vmatpush3.xpose.msk.msra.mxu0 %vm7317_vm8, %v7423_v11 }
 0xfa2   : > { %9907 = vmatprep.subr.msk.mxu0 %vm2872_vm3, %v7631_v5 }
0x105c   : > { %v7302_v51 = vpop.f32.mrf.mxu0 }
0x105d   : > { %v7303_v31 = vadd.f32 %v8622_v21, %v7302_v51 }
0x105e   : > { %v9872_v54 = vpop.f32.mrf.mxu0 }
0x105f   : > { %9890 = vmatprep.mubr.msk.f32.mxu1 %vm7317_vm8, %v7303_v31  ;;  %v7998_v28 = vmul.f32 %v8658_v18, %v7303_v31 }
0x1060   : > { %v7305_v14 = vpop.f32.mrf.mxu0 }
0x1061   : > { %v7306_v60 = vadd.f32 %v8622_v21, %v7305_v14  ;;  %v8000_v36 = vsel %vm7317_vm8, %v7998_v28, 0.0 }
0x1062   : > { %8001 = vadd.xlane.f32.xlu0 %v8000_v36  ;;  %v9873_v46 = vpop.f32.mrf.mxu0 }
0x1063   : > { %9891 = vmatmul.mubr.msk.f32.vlgmr.msra.gmra.mxu1 %vm7317_vm8, %v7306_v60  ;;  %v7999_v40 = vmul.f32 %v8658_v18, %v7306_v60 }
0x1064   : > { %9901 = vmatpush3.xpose.msk.msra.mxu1 %vm7317_vm8, %v7549_v61  ;;  %9904 = vmatprep.mubr.msk.f32.mxu1 %vm7317_vm8, %v7303_v31 }
0x1065   : > { %v8003_v41 = vsel %vm7317_vm8, %v7999_v40, 0.0  ;;  %9902 = vmatprep.subr.msk.mxu1 %vm7317_vm8, %v7548_v55 }
0x1066   : > { %8004 = vadd.xlane.f32.xlu0 %v8003_v41 }
0x1068   : > { %9903 = vmatpush3.xpose.msk.msra.mxu1 %vm7317_vm8, %v7548_v55 }
0x1069   : > { %9912 = vmatprep.subr.msk.mxu1 %vm7317_vm8, %v7770_v6 }
0x106b   : > { %9905 = vmatmul.mubr.msk.f32.vlgmr.msra.gmra.mxu1 %vm7317_vm8, %v7306_v60 }
0x106c   : > { %9913 = vmatpush3.xpose.msk.msra.mxu1 %vm7317_vm8, %v7770_v6  ;;  %9914 = vmatprep.mubr.msk.f32.mxu1 %vm7317_vm8, %v7303_v31 }
0x106d   : > { %9924 = vmatprep.subr.msk.mxu1 %vm8015_vm9, %v8007_v44 }
0x106f   : > { %9915 = vmatmul.mubr.msk.f32.vlgmr.msra.gmra.mxu1 %vm7317_vm8, %v7306_v60 }
0x1070   : > { %9925 = vmatpush3.xpose.msk.msra.mxu1 %vm8015_vm9, %v8007_v44 }
0x1071   : > { %9926 = vmatprep.subr.msk.mxu1 %vm8015_vm9, %v8006_v2 }
0x1074   : > { %9927 = vmatpush3.xpose.msk.msra.mxu1 %vm8015_vm9, %v8006_v2 }
0x10eb   : > { %v8002_v15 = vpop.xlane.xlu0 %8001 }
0x10ec   : > { %9928 = vmatprep.mubr.msk.f32.mxu1 %vm8015_vm9, %v8002_v15 }
0x10ef   : > { %v8005_v4 = vpop.xlane.xlu0 %8004 }
0x10f0   : > { %9929 = vmatmul.mubr.msk.f32.vlgmr.msra.gmra.mxu1 %vm8015_vm9, %v8005_v4 }
0x1123   : > { %v9892_v62 = vpop.f32.mrf.mxu1 }
0x1125   : > { %v7414_v19 = vpop.f32.mrf.mxu1 }
0x1126   : > { %9897 = vmatprep.mubr.msk.f32.mxu0 %vm7317_vm8, %v7414_v19 }
0x1127   : > { %9898 = vmatmul.mubr.msk.f32.vlgmr.msra.gmra.mxu0 %vm7317_vm8, %v9892_v62 }
0x1128   : > { %9908 = vmatpush3.xpose.msk.msra.mxu0 %vm2872_vm3, %v7631_v5 }
0x1129   : > { %9917 = vmatprep.subr.msk.mxu0 %vm7858_vm10, %v7850_v39 }
0x112b   : > { %v9906_v3 = vpop.f32.mrf.mxu1 }
0x112d   : > { %v7622_v29 = vpop.f32.mrf.mxu1 }
0x112e   : > { %9909 = vmatprep.mubr.msk.f32.mxu0 %vm2872_vm3, %v7622_v29 }
0x112f   : > { %9910 = vmatmul.mubr.msk.f32.vlgmr.msra.gmra.mxu0 %vm2872_vm3, %v9906_v3  ;;  %v9916_v25 = vpop.f32.mrf.mxu1 }
0x1130   : > { %9918 = vmatpush3.xpose.msk.msra.mxu0 %vm7858_vm10, %v7850_v39 }
0x1131   : > { %v7840_v47 = vpop.f32.mrf.mxu1  ;;  %9919 = vmatprep.subr.msk.mxu0 %vm7858_vm10, %v7849_v45 }
0x1132   : > { %9921 = vmatprep.mubr.msk.f32.mxu0 %vm7858_vm10, %v7840_v47 }
0x1134   : > { %9920 = vmatpush3.xpose.msk.msra.mxu0 %vm7858_vm10, %v7849_v45 }
0x1137   : > { %9922 = vmatmul.mubr.msk.f32.vlgmr.msra.gmra.mxu0 %vm7858_vm10, %v9916_v25 }
0x11b0   : > { %v9930_v1 = vpop.f32.mrf.mxu1 }
0x11b1   : > { %v8100_v30 = vadd.f32 %v9930_v1, %v8659_v10  ;;  %v10372_v1 = vmov 10  }
0x11b2   : > { %v8094_v23 = vpop.f32.mrf.mxu1 }
0x11b3   : > { %v8095_v0 = vadd.f32 %v8659_v10, %v8094_v23  ;;  %v8106_v34 = vsel %vm2872_vm3, %v8100_v30, -inf }
0x11b5   : > { %v8103_v37 = vsel %vm2872_vm3, %v8095_v0, -inf }
0x11e7   : > { %v9899_v49 = vpop.f32.mrf.mxu0 }
0x11e8   : > { %v7516_v43 = vadd.f32 %v9899_v49, %v8637_v33 }
0x11e9   : > { %v7510_v8 = vpop.f32.mrf.mxu0 }
0x11ea   : > { %v7511_v38 = vadd.f32 %v8637_v33, %v7510_v8  ;;  %v7523_v52 = vsel %vm7519_vm11, %v7516_v43, -inf }
0x11ec   : > { %v7520_v12 = vsel %vm7519_vm11, %v7511_v38, -inf }
0x11ed   : > { %7521 = vmax.xlane.f32.xlu1 %v7520_v12 }
0x11ef   : > { %v9911_v50 = vpop.f32.mrf.mxu0 }
0x11f0   : > { %v7720_v57 = vadd.f32 %v9911_v50, %v8646_v48 }
0x11f1   : > { %v7714_v56 = vpop.f32.mrf.mxu0  ;;  %7524 = vmax.xlane.f32.xlu1 %v7523_v52 }
0x11f2   : > { %v7715_v58 = vadd.f32 %v8646_v48, %v7714_v56  ;;  %v7726_v63 = vsel %vm3257_vm6, %v7720_v57, -inf }
0x11f4   : > { %v7723_v59 = vsel %vm3257_vm6, %v7715_v58, -inf }
0x11f5   : > { %7724 = vmax.xlane.f32.xlu0 %v7723_v59  ;;  %7727 = vmax.xlane.f32.xlu1 %v7726_v63  ;;  %v10371_v63 = vmov 9  }
0x11f7   : > { %v9923_v16 = vpop.f32.mrf.mxu0 }
0x11f8   : > { %v7943_v20 = vadd.f32 %v9923_v16, %v8653_v7 }
0x11f9   : > { %v7937_v27 = vpop.f32.mrf.mxu0 }
0x11fa   : > { %v7938_v32 = vadd.f32 %v8653_v7, %v7937_v27  ;;  %v7949_v35 = vsel %vm2872_vm3, %v7943_v20, -inf }
0x11fb   : > { %7950 = vmax.xlane.f32.xlu1 %v7949_v35 }
0x11fc   : > { %v7946_v13 = vsel %vm2872_vm3, %v7938_v32, -inf }
0x11fd   : > { %7947 = vmax.xlane.f32.xlu0 %v7946_v13 }
0x11ff   : > { %8107 = vmax.xlane.f32.xlu1 %v8106_v34 }
0x1201   : > { %8104 = vmax.xlane.f32.xlu0 %v8103_v37 }
0x1276   : > { %v7522_v42 = vpop.xlane.xlu1 %7521 }
0x1277   : > { %v11959_v22 = vsub.f32 %v7511_v38, %v7522_v42 }
0x1279   : > { %v7528_v26 = vmul.f32 1.442695, %v11959_v22 }
0x127a   : > { %v7525_v53 = vpop.xlane.xlu1 %7524 }
0x127b   : > { %10262 = vpow2.f32 %v7528_v26  ;;  %v11962_v24 = vsub.f32 %v7516_v43, %v7525_v53  ;;  %v10370_v43 = vmov 11  }
0x127c   : > { %10253 = vset.pattern.permute.xlu0 %v10370_v43  ;;  %10254 = vset.pattern.permute.xlu1 %v10370_v43 }
0x127d   : > { %v7530_v17 = vmul.f32 1.442695, %v11962_v24 }
0x127e   : > { %v7728_v61 = vpop.xlane.xlu1 %7727  ;;  %v7725_v21 = vpop.xlane.xlu0 %7724 }
0x127f   : > { %10264 = vpow2.f32 %v7530_v17  ;;  %v11965_v18 = vsub.f32 %v7720_v57, %v7728_v61  ;;  %v11967_v28 = vsub.f32 %v7715_v58, %v7725_v21 }
0x1281   : > { %v7733_v46 = vmul.f32 1.442695, %v11965_v18  ;;  %v7731_v2 = vmul.f32 1.442695, %v11967_v28 }
0x1284   : > { %v7951_v51 = vpop.xlane.xlu1 %7950 }
0x1285   : > { %v11973_v40 = vsub.f32 %v7943_v20, %v7951_v51 }
0x1286   : > { %v7948_v31 = vpop.xlane.xlu0 %7947 }
0x1287   : > { %v11979_v9 = vsub.f32 %v7938_v32, %v7948_v31  ;;  %v7956_v15 = vmul.f32 1.442695, %v11973_v40 }
0x1288   : > { %v10263_v54 = vpop.eup %10262  ;;  %v8108_v14 = vpop.xlane.xlu1 %8107 }
0x1289   : > { %v11969_v60 = vsub.f32 %v8100_v30, %v8108_v14  ;;  %v7532_v36 = vsel %vm7519_vm11, %v10263_v54, 0.0  ;;  %v7954_v4 = vmul.f32 1.442695, %v11979_v9 }
0x128a   : > { %v8105_v55 = vpop.xlane.xlu0 %8104  ;;  %7533 = vadd.xlane.f32.xlu0 %v7532_v36 }
0x128b   : > { %v8113_v41 = vmul.f32 1.442695, %v11969_v60  ;;  %v11976_v6 = vsub.f32 %v8095_v0, %v8105_v55 }
0x128c   : > { %v10265_v44 = vpop.eup %10264 }
0x128d   : > { %10266 = vpow2.f32 %v8113_v41  ;;  %v8111_v11 = vmul.f32 1.442695, %v11976_v6  ;;  %v7535_v5 = vsel %vm7519_vm11, %v10265_v44, 0.0 }
0x128e   : > { %10268 = vpow2.f32 %v7733_v46  ;;  %7536 = vadd.xlane.f32.xlu1 %v7535_v5 }
0x128f   : > { %10270 = vpow2.f32 %v8111_v11 }
0x1290   : > { %10272 = vpow2.f32 %v7731_v2 }
0x1291   : > { %10274 = vpow2.f32 %v7956_v15 }
0x1292   : > { %10276 = vpow2.f32 %v7954_v4 }
0x129a   : > { %v10267_v62 = vpop.eup %10266 }
0x129b   : > { %v10269_v19 = vpop.eup %10268  ;;  %v8118_v39 = vsel %vm2872_vm3, %v10267_v62, 0.0 }
0x129c   : > { %v10271_v3 = vpop.eup %10270  ;;  %8119 = vadd.xlane.f32.xlu1 %v8118_v39  ;;  %v7738_v25 = vsel %vm3257_vm6, %v10269_v19, 0.0 }
0x129d   : > { %v8115_v29 = vsel %vm2872_vm3, %v10271_v3, 0.0  ;;  %v10273_v45 = vpop.eup %10272 }
0x129e   : > { %8116 = vadd.xlane.f32.xlu0 %v8115_v29  ;;  %v10275_v47 = vpop.eup %10274  ;;  %v7735_v49 = vsel %vm3257_vm6, %v10273_v45, 0.0 }
0x129f   : > { %v10277_v33 = vpop.eup %10276  ;;  %v7961_v8 = vsel %vm2872_vm3, %v10275_v47, 0.0 }
0x12a0   : > { %7739 = vadd.xlane.f32.xlu1 %v7738_v25  ;;  %v7958_v38 = vsel %vm2872_vm3, %v10277_v33, 0.0 }
0x12a2   : > { %7736 = vadd.xlane.f32.xlu0 %v7735_v49 }
0x12a4   : > { %7962 = vadd.xlane.f32.xlu1 %v7961_v8 }
0x12a6   : > { %7959 = vadd.xlane.f32.xlu0 %v7958_v38 }
0x1313   : > { %v7534_v12 = vpop.xlane.xlu0 %7533 }
0x1314   : > { %10278 = vlog2.f32 %v7534_v12 }
0x1317   : > { %v7537_v48 = vpop.xlane.xlu1 %7536 }
0x1318   : > { %10280 = vlog2.f32 %v7537_v48 }
0x1321   : > { %v10279_v50 = vpop.eup %10278 }
0x1322   : > { %v7539_v57 = vmul.f32 0.6931472, %v10279_v50 }
0x1324   : > { %v7542_v52 = vsub.f32 %v11959_v22, %v7539_v57 }
0x1325   : > { %v10281_v56 = vpop.eup %10280  ;;  %v8120_v7 = vpop.xlane.xlu1 %8119 }
0x1326   : > { %7546 = vst.msk [vmem:[#allocation3] sm:$0xff] %vm3257_vm6, %v7542_v52  ;;  %v7541_v58 = vmul.f32 0.6931472, %v10281_v56  ;;  %7749 = vperm.xlu0 %10253, %v7542_v52  }
0x1327   : > { %v8117_v10 = vpop.xlane.xlu0 %8116 }
0x1328   : > { %v7543_v59 = vsub.f32 %v11962_v24, %v7541_v58 }
0x1329   : > { %v7740_v16 = vpop.xlane.xlu1 %7739 }
0x132a   : > { %7547 = vst.msk [vmem:[#allocation3 + $0x8] sm:$0xff] %vm3257_vm6, %v7543_v59  ;;  %7754 = vperm.xlu1 %10254, %v7543_v59   ;;  %10257 = vset.pattern.permute.xlu0 %v10371_v63  ;;  %10282 = vlog2.f32 %v7740_v16 }
0x132b   : > { %v7737_v20 = vpop.xlane.xlu0 %7736 }
0x132c   : > { %10284 = vlog2.f32 %v7737_v20 }
0x132d   : > { %v7963_v23 = vpop.xlane.xlu1 %7962 }
0x132e   : > { %10255 = vset.pattern.permute.xlu1 %v10372_v1  ;;  %10286 = vlog2.f32 %v7963_v23 }
0x132f   : > { %7975 = vperm.xlu1 %10255, %v7543_v59   ;;  %v7960_v27 = vpop.xlane.xlu0 %7959 }
0x1330   : > { %10288 = vlog2.f32 %v7960_v27 }
0x1331   : > { %10290 = vlog2.f32 %v8117_v10 }
0x1332   : > { %10292 = vlog2.f32 %v8120_v7 }
0x1333   : > { %7971 = vperm.xlu1 %10255, %v7542_v52  }
0x1337   : > { %10256 = vset.pattern.permute.xlu1 %v10371_v63  ;;  %v10283_v30 = vpop.eup %10282 }
0x1338   : > { %8128 = vperm.xlu1 %10256, %v7542_v52   ;;  %v7744_v32 = vmul.f32 0.6931472, %v10283_v30 }
0x1339   : > { %v10285_v35 = vpop.eup %10284 }
0x133a   : > { %v7742_v13 = vmul.f32 0.6931472, %v10285_v35  ;;  %v7746_v34 = vsub.f32 %v11965_v18, %v7744_v32 }
0x133b   : > { %v10287_v0 = vpop.eup %10286 }
0x133c   : > { %8132 = vperm.xlu1 %10256, %v7543_v59   ;;  %v7967_v37 = vmul.f32 0.6931472, %v10287_v0  ;;  %v7745_v24 = vsub.f32 %v11967_v28, %v7742_v13 }
0x133d   : > { %v10289_v22 = vpop.eup %10288 }
0x133e   : > { %v7965_v17 = vmul.f32 0.6931472, %v10289_v22  ;;  %v7969_v61 = vsub.f32 %v11973_v40, %v7967_v37  ;;  %v10291_v31 = vpop.eup %10290 }
0x133f   : > { %v8122_v14 = vmul.f32 0.6931472, %v10291_v31  ;;  %v10293_v46 = vpop.eup %10292 }
0x1340   : > { %v7968_v18 = vsub.f32 %v11979_v9, %v7965_v17  ;;  %v8124_v28 = vmul.f32 0.6931472, %v10293_v46 }
0x1341   : > { %v8125_v41 = vsub.f32 %v11976_v6, %v8122_v14 }
0x1342   : > { %v8126_v40 = vsub.f32 %v11969_v60, %v8124_v28 }
0x13a1   : > { %v7750_v53 = vpop.permute.xlu0 %7749 }
0x13a2   : > { %v7757_v21 = vadd.f32 %v7750_v53, %v7745_v24 }
0x13a5   : > { %v7755_v42 = vpop.permute.xlu1 %7754 }
0x13a6   : > { %v7758_v26 = vadd.f32 %v7755_v42, %v7746_v34 }
0x13a8   : > { %7763 = vrot.lane.b32.xlu1 %v7758_v26, %s10373_s21 }
0x13aa   : > { %v7976_v51 = vpop.permute.xlu1 %7975 }
0x13ab   : > { %v7979_v54 = vadd.f32 %v7976_v51, %v7969_v61 }
0x13ac   : > { %7761 = vrot.lane.b32.xlu1 %v7757_v21, %s10373_s21 }
0x13ad   : > { %7984 = vrot.lane.b32.xlu0 %v7979_v54, %s10374_s7 }
0x13ae   : > { %v7972_v36 = vpop.permute.xlu1 %7971 }
0x13af   : > { %v7978_v55 = vadd.f32 %v7972_v36, %v7968_v18 }
0x13b1   : > { %7982 = vrot.lane.b32.xlu1 %v7978_v55, %s10374_s7 }
0x13b3   : > { %v8129_v44 = vpop.permute.xlu1 %8128 }
0x13b4   : > { %v8135_v2 = vadd.f32 %v8129_v44, %v8125_v41 }
0x13b6   : > { %8139 = vrot.lane.b32.xlu1 %v8135_v2, %s10375_s18 }
0x13b7   : > { %v8133_v11 = vpop.permute.xlu1 %8132 }
0x13b8   : > { %v8136_v5 = vadd.f32 %v8133_v11, %v8126_v40 }
0x13ba   : > { %8141 = vrot.lane.b32.xlu0 %v8136_v5, %s10375_s18 }
0x141a   : > { %v7764_v15 = vpop.permute.xlu1 %7763 }
0x141b   : > { %7769 = vst.msk [vmem:[#allocation3 + $0x8] sm:$0xff] %vm7767_vm12, %v7764_v15 }
0x141e   : > { %v7762_v9 = vpop.permute.xlu1 %7761 }
0x141f   : > { %7768 = vst.msk [vmem:[#allocation3] sm:$0xff] %vm7767_vm12, %v7762_v9  ;;  %v7985_v4 = vpop.permute.xlu0 %7984 }
0x1420   : > { %7990 = vst.msk [vmem:[#allocation3 + $0x8] sm:$0xff] %vm7988_vm13, %v7985_v4 }
0x1423   : > { %v7983_v62 = vpop.permute.xlu1 %7982 }
0x1424   : > { %7989 = vst.msk [vmem:[#allocation3] sm:$0xff] %vm7988_vm13, %v7983_v62 }
0x1428   : > { %v8140_v6 = vpop.permute.xlu1 %8139 }
0x1429   : > { %8146 = vst.msk [vmem:[#allocation3] sm:$0xff] %vm8145_vm14, %v8140_v6 }
0x142c   : > { %v8142_v19 = vpop.permute.xlu0 %8141 }
0x142d   : > { %8147 = vst.msk [vmem:[#allocation3 + $0x8] sm:$0xff] %vm8145_vm14, %v8142_v19 }
0x142e PF: > { %p9935_p6 = scmp.eq.s32.totalorder %s10560_s10, 8  ;;  %s10376_s22 = smov [#allocation3]  }
0x142f   : > { %s8154_s5 = sshll.u32 %s10376_s22, 4  ;;  %s8155_s5 = int_to_ptr.vmem [resolvable:$true] %s8154_s5 }
0x1430   : > { %s10294_s9 = scalar_lea.vmem %s8155_s5, 256  ;;  %p10301_p10 = scmp.lt.s32.totalorder %s8155_s5, %s8155_s5 }
0x1431   : > { %p10295_p7 = scmp.ne.s32.totalorder %s8155_s5, %s10294_s9  ;;  %p10302_p11 = scmp.lt.s32.totalorder %s10294_s9, %s10294_s9 }
0x1433   : > { %p10296_p8 = pnand %p10295_p7, %p9935_p6  ;;  %p10303_p12 = por %p10302_p11, %p10301_p10 }
0x1435   : > { %p10297_p9 = pneg %p10296_p8 }
0x1437   : > { %p10304_p13 = pnand %p10303_p12, %p10297_p9 }
0x1439   : > { %10307 = shalt.err (!%p10304_p13)
}
0x143a   : > { %s10377_s29 = smov 128   ;;  %s12190_s3 = sld [smem:[#allocation30_spill]] }
0x143b   : > { %s10378_s4 = smov 8  }
0x1440   : > { %9932 = dma.vmem_to_hbm [thread:$0]  (%p9935_p6), %s8155_s5, 256, %s12190_s3, [#allocation4], %s10377_s29, %s10377_s29, %s10378_s4  }
0x1441   : > { %10323 = dma.done.wait (%p9935_p6), [#allocation4], 256  }
0x1442   : > { %10325 = vsyncadd (%p9935_p6), [#allocation4], 4294967040 }
0x1443 PF: > { %s12191_s23 = sld [smem:[#allocation31_spill]] }
0x1449   : > { %s78_s7 = sadd.s32 1, %s12191_s23  }
0x144a   : > { %p75_p0 = scmp.ge.s32.totalorder %s78_s7, 11  }
0x144c   :  { %77 = sbr.rel (!%p75_p0) target bundleno = 74 (0x4a), region = 265 }
0x1451   :  { %8170 = vsyncpa [#allocation4], 1 }
0x1452   :  { %8172 = vsyncpa [#allocation4 + $0x1], 1 }

</bundles_post_ra>
